<compile_context>
chip_gen: v7x
topology: tpu7x:2x2x1
jax: 0.10.0
libtpu: 0.0.40
codegen_flags: <defaults>
</compile_context>

<pallas_src>
import functools

import jax
import jax.numpy as jnp
import numpy as np
from jax.experimental import pallas as pl
from jax.experimental.pallas import tpu as pltpu


def _round_up(n, m):
    return (n + m - 1) // m * m


def _largest_divisor(n, cap, mult=1):
    """Largest t <= cap with n % t == 0 and t % mult == 0, else n."""
    if n <= cap:
        return n
    for t in range(cap, 0, -1):
        if n % t == 0 and t % mult == 0:
            return t
    return n


def _padded_vmem_bytes(shape, dtype):
    """Bytes of one VMEM buffer of `shape`, with lane/sublane tile padding."""
    itemsize = jnp.dtype(dtype).itemsize
    granule = 8 * (4 // itemsize) if itemsize in (1, 2, 4) else 8
    dims = list(shape)
    if dims:
        dims[-1] = _round_up(dims[-1], 128)
    if len(dims) >= 2:
        dims[-2] = _round_up(dims[-2], granule)
    size = itemsize
    for d in dims:
        size *= d
    return size


def _vmem_limit(nbytes):
    # 2x headroom + 4 MiB for Mosaic internal scratch, clamped to a range that
    # is safe on every generation (v7x physical VMEM is 64 MiB).
    return int(min(max(2 * nbytes + (4 << 20), 8 << 20), 48 << 20))


# ----------------------------------------------------------------------------
# Bidirectional LSTM kernel.
#   grid = (NC,) over time chunks ("arbitrary": carries fw & bw (h, c) state).
#   Each grid step:
#     1. hoisted input projection (one big bf16 MXU matmul per direction),
#     2. TQ interleaved fw/bw recurrence steps (small recurrent dots + gates).
# ----------------------------------------------------------------------------
def _bilstm_kernel(x_fw_ref, x_bw_ref, wih_ref, whh_ref, b_ref,
                   out_fw_ref, out_bw_ref,
                   h_fw, c_fw, h_bw, c_bw, xw_fw, xw_bw, *, unroll):
    c = pl.program_id(0)

    @pl.when(c == 0)
    def _():
        h_fw[...] = jnp.zeros_like(h_fw)
        c_fw[...] = jnp.zeros_like(c_fw)
        h_bw[...] = jnp.zeros_like(h_bw)
        c_bw[...] = jnp.zeros_like(c_bw)

    TQ, B, Hp = out_fw_ref.shape        # Hp is the 128-padded hidden size

    # --- Hoisted input projection: one MXU matmul (+ bias) per direction per
    # chunk instead of a per-timestep concat + tiny matmul. Accumulate in f32.
    xw_fw[...] = jnp.dot(x_fw_ref[...], wih_ref[0],
                         preferred_element_type=jnp.float32) + b_ref[0]
    xw_bw[...] = jnp.dot(x_bw_ref[...], wih_ref[1],
                         preferred_element_type=jnp.float32) + b_ref[1]

    def lstm_step(xw_ref, t, h_ref, c_ref, d):
        row = pl.multiple_of(t * B, B)
        gates = (xw_ref[pl.ds(row, B), :]
                 + jnp.dot(h_ref[...].astype(jnp.bfloat16), whh_ref[d],
                           preferred_element_type=jnp.float32))
        # PyTorch gate order: i, f, g, o; all slices are 128-lane aligned.
        i_g = jax.nn.sigmoid(gates[:, 0 * Hp:1 * Hp])
        f_g = jax.nn.sigmoid(gates[:, 1 * Hp:2 * Hp])
        g_g = jnp.tanh(gates[:, 2 * Hp:3 * Hp])
        o_g = jax.nn.sigmoid(gates[:, 3 * Hp:4 * Hp])
        c_new = f_g * c_ref[...] + i_g * g_g
        h_new = o_g * jnp.tanh(c_new)
        c_ref[...] = c_new
        h_ref[...] = h_new
        return h_new

    def step(i, carry):
        # Two independent recurrence chains per iteration (fw walks rows
        # 0..TQ-1, bw walks TQ-1..0) -> fills MXU/EUP latency on 1-TC chips.
        h_f = lstm_step(xw_fw, i, h_fw, c_fw, 0)
        out_fw_ref[i] = h_f.astype(out_fw_ref.dtype)
        j = TQ - 1 - i
        h_b = lstm_step(xw_bw, j, h_bw, c_bw, 1)
        out_bw_ref[j] = h_b.astype(out_bw_ref.dtype)
        return carry

    jax.lax.fori_loop(0, TQ, step, 0, unroll=unroll)


def bilstm_pallas(x2, wih, whh, b, T, B, *, time_chunk_cap=32):
    """x2: (T*B, nIn) bf16 (time-major flattened); wih: (2, nIn, 4Hp) bf16;
    whh: (2, Hp, 4Hp) bf16; b: (2, 1, 4Hp) f32.
    Returns (rec_fw, rec_bw), each (T, B, Hp) bf16 in natural time order."""
    nIn = x2.shape[-1]
    Hp = whh.shape[1]
    G = whh.shape[2]
    TQ = _largest_divisor(T, time_chunk_cap)
    NC = T // TQ
    unroll = TQ if TQ <= 8 else 4   # TODO(synk): sweep unroll in {2,4,8}.

    kernel = functools.partial(_bilstm_kernel, unroll=unroll)

    vmem_bytes = (
        2 * 2 * _padded_vmem_bytes((TQ * B, nIn), x2.dtype)       # x chunks (2-buf)
        + 2 * 2 * _padded_vmem_bytes((TQ, B, Hp), jnp.bfloat16)   # out chunks
        + 2 * _padded_vmem_bytes(wih.shape, wih.dtype)            # resident weights
        + 2 * _padded_vmem_bytes(whh.shape, whh.dtype)
        + 2 * _padded_vmem_bytes(b.shape, b.dtype)
        + 4 * _padded_vmem_bytes((B, Hp), jnp.float32)            # h/c scratch
        + 2 * _padded_vmem_bytes((TQ * B, G), jnp.float32))       # hoisted xW scratch

    out_shape = (jax.ShapeDtypeStruct((T, B, Hp), jnp.bfloat16),
                 jax.ShapeDtypeStruct((T, B, Hp), jnp.bfloat16))

    return pl.pallas_call(
        kernel,
        out_shape=out_shape,
        grid_spec=pltpu.PrefetchScalarGridSpec(
            num_scalar_prefetch=0,
            grid=(NC,),
            in_specs=[
                pl.BlockSpec((TQ * B, nIn), lambda c: (c, 0)),            # fw chunk
                pl.BlockSpec((TQ * B, nIn), lambda c: (NC - 1 - c, 0)),   # bw chunk
                pl.BlockSpec(wih.shape, lambda c: (0, 0, 0)),
                pl.BlockSpec(whh.shape, lambda c: (0, 0, 0)),
                pl.BlockSpec(b.shape, lambda c: (0, 0, 0)),
            ],
            out_specs=[
                pl.BlockSpec((TQ, B, Hp), lambda c: (c, 0, 0)),
                pl.BlockSpec((TQ, B, Hp), lambda c: (NC - 1 - c, 0, 0)),
            ],
            scratch_shapes=[
                pltpu.VMEM((B, Hp), jnp.float32),        # h_fw (f32 state)
                pltpu.VMEM((B, Hp), jnp.float32),        # c_fw
                pltpu.VMEM((B, Hp), jnp.float32),        # h_bw
                pltpu.VMEM((B, Hp), jnp.float32),        # c_bw
                pltpu.VMEM((TQ * B, G), jnp.float32),    # hoisted xW (fw)
                pltpu.VMEM((TQ * B, G), jnp.float32),    # hoisted xW (bw)
            ],
        ),
        compiler_params=pltpu.CompilerParams(
            dimension_semantics=("arbitrary",),          # chunks carry (h, c)
            vmem_limit_bytes=_vmem_limit(vmem_bytes),
        ),
    )(x2, x2, wih, whh, b)


# ----------------------------------------------------------------------------
# Embedding (Linear) kernel with the hidden-concat fused in:
#   out[n] = rec_fw[n] @ We_fw + rec_bw[n] @ We_bw + b
# Row-tiled over the flattened (T*B) activation; lane-dense padded nOut.
# ----------------------------------------------------------------------------
def _linear_kernel(rf_ref, rb_ref, wf_ref, wb_ref, b_ref, o_ref):
    acc = jnp.dot(rf_ref[...], wf_ref[...], preferred_element_type=jnp.float32)
    acc = acc + jnp.dot(rb_ref[...], wb_ref[...],
                        preferred_element_type=jnp.float32)
    o_ref[...] = (acc + b_ref[...]).astype(o_ref.dtype)


def linear_pallas(rec_fw, rec_bw, w_fw, w_bw, b, *, row_tile_cap=1024):
    """rec_*: (N, Hp) bf16; w_*: (Hp, Op) bf16; b: (1, Op) f32 -> (N, Op) f32."""
    N, Hp = rec_fw.shape
    Op = w_fw.shape[-1]
    TN = _largest_divisor(N, row_tile_cap, mult=8)

    vmem_bytes = (
        2 * 2 * _padded_vmem_bytes((TN, Hp), rec_fw.dtype)
        + 2 * 2 * _padded_vmem_bytes((Hp, Op), w_fw.dtype)
        + 2 * _padded_vmem_bytes((1, Op), b.dtype)
        + 2 * _padded_vmem_bytes((TN, Op), jnp.float32))

    return pl.pallas_call(
        _linear_kernel,
        out_shape=jax.ShapeDtypeStruct((N, Op), jnp.float32),
        grid_spec=pltpu.PrefetchScalarGridSpec(
            num_scalar_prefetch=0,
            grid=(N // TN,),
            in_specs=[
                pl.BlockSpec((TN, Hp), lambda n: (n, 0)),
                pl.BlockSpec((TN, Hp), lambda n: (n, 0)),
                pl.BlockSpec((Hp, Op), lambda n: (0, 0)),
                pl.BlockSpec((Hp, Op), lambda n: (0, 0)),
                pl.BlockSpec((1, Op), lambda n: (0, 0)),
            ],
            out_specs=pl.BlockSpec((TN, Op), lambda n: (n, 0)),
        ),
        compiler_params=pltpu.CompilerParams(
            dimension_semantics=("parallel",),
            vmem_limit_bytes=_vmem_limit(vmem_bytes),
        ),
    )(rec_fw, rec_bw, w_fw, w_bw, b)


# ----------------------------------------------------------------------------
# BidirectionalLSTM forward (mirrors the PyTorch module semantics exactly).
# ----------------------------------------------------------------------------
def bidirectional_lstm_forward(x, packed, *, n_out):
    T, B, nIn = x.shape
    x2 = x.astype(jnp.bfloat16).reshape(T * B, nIn)     # free reshape
    rec_fw, rec_bw = bilstm_pallas(x2, packed["wih"], packed["whh"],
                                   packed["b"], T, B)
    Hp = rec_fw.shape[-1]
    out = linear_pallas(rec_fw.reshape(T * B, Hp), rec_bw.reshape(T * B, Hp),
                        packed["emb_w_fw"], packed["emb_w_bw"], packed["emb_b"])
    return out.reshape(T, B, -1)[..., :n_out]            # drop padded logits


# ----------------------------------------------------------------------------
# Parameter construction / packing.
# ----------------------------------------------------------------------------
def init_params(key, nIn, nHidden, nOut):
    """Raw params (uniform +-1/sqrt(H), like torch.nn.LSTM); pre-transposed."""
    ks = jax.random.split(key, 10)
    s = 1.0 / np.sqrt(nHidden)

    def u(k, shape):
        return jax.random.uniform(k, shape, jnp.float32, -s, s)

    return {
        "fw_wih_t": u(ks[0], (nIn, 4 * nHidden)),
        "fw_whh_t": u(ks[1], (nHidden, 4 * nHidden)),
        "fw_b": u(ks[2], (1, 4 * nHidden)) + u(ks[3], (1, 4 * nHidden)),
        "bw_wih_t": u(ks[4], (nIn, 4 * nHidden)),
        "bw_whh_t": u(ks[5], (nHidden, 4 * nHidden)),
        "bw_b": u(ks[6], (1, 4 * nHidden)) + u(ks[7], (1, 4 * nHidden)),
        "emb_w_t": u(ks[8], (2 * nHidden, nOut)),
        "emb_b": u(ks[9], (1, nOut)),
    }


def pack_params(p, nIn, nHidden, nOut, lane=128):
    """Pack once (outside the kernel): pad H/nOut to 128 lanes (zeros in the
    padded gate columns / rows so padded h, c, logits stay exactly zero),
    stack directions, split the embedding weight so the hidden concat fuses
    into two dots, and cast matmul operands to bf16."""
    H = nHidden
    Hp = _round_up(H, lane)
    Op = _round_up(nOut, lane)

    def pad_gate_cols(w):          # (..., 4H) -> (..., 4Hp), per-gate zero pad
        lead = w.shape[:-1]
        w4 = w.reshape(lead + (4, H))
        w4 = jnp.pad(w4, [(0, 0)] * len(lead) + [(0, 0), (0, Hp - H)])
        return w4.reshape(lead + (4 * Hp,))

    def pad_rows(w, rows_to):
        return jnp.pad(w, [(0, rows_to - w.shape[0]), (0, 0)])

    wih = jnp.stack([pad_gate_cols(p["fw_wih_t"]),
                     pad_gate_cols(p["bw_wih_t"])], 0).astype(jnp.bfloat16)
    whh = jnp.stack([pad_gate_cols(pad_rows(p["fw_whh_t"], Hp)),
                     pad_gate_cols(pad_rows(p["bw_whh_t"], Hp))],
                    0).astype(jnp.bfloat16)
    b = jnp.stack([pad_gate_cols(p["fw_b"]),
                   pad_gate_cols(p["bw_b"])], 0).astype(jnp.float32)

    def pad_emb(w):                # (H, nOut) -> (Hp, Op) bf16, zero padded
        return jnp.pad(w, [(0, Hp - H), (0, Op - nOut)]).astype(jnp.bfloat16)

    return {
        "wih": wih,                                        # (2, nIn, 4Hp) bf16
        "whh": whh,                                        # (2, Hp, 4Hp)  bf16
        "b": b,                                            # (2, 1, 4Hp)   f32
        "emb_w_fw": pad_emb(p["emb_w_t"][:H]),             # (Hp, Op)      bf16
        "emb_w_bw": pad_emb(p["emb_w_t"][H:]),             # (Hp, Op)      bf16
        "emb_b": jnp.pad(p["emb_b"], [(0, 0), (0, Op - nOut)]).astype(jnp.float32),
    }


# ----------------------------------------------------------------------------
# Pure-JAX f32 reference (lax.scan), mirrors the PyTorch module.
# ----------------------------------------------------------------------------
def _lstm_ref(x, wih_t, whh_t, bias):
    B = x.shape[1]
    H = whh_t.shape[0]

    def step(carry, xt):
        h, c = carry
        gates = xt @ wih_t + h @ whh_t + bias[0]
        i, f, g, o = jnp.split(gates, 4, axis=-1)
        i, f, o = jax.nn.sigmoid(i), jax.nn.sigmoid(f), jax.nn.sigmoid(o)
        g = jnp.tanh(g)
        c = f * c + i * g
        h = o * jnp.tanh(c)
        return (h, c), h

    init = (jnp.zeros((B, H), jnp.float32), jnp.zeros((B, H), jnp.float32))
    _, hs = jax.lax.scan(step, init, x)
    return hs


def _forward_ref(x, params):
    T, B, _ = x.shape
    rec_fw = _lstm_ref(x, params["fw_wih_t"], params["fw_whh_t"], params["fw_b"])
    rec_bw = _lstm_ref(jnp.flip(x, axis=0), params["bw_wih_t"],
                       params["bw_whh_t"], params["bw_b"])
    rec_bw = jnp.flip(rec_bw, axis=0)
    rec = jnp.concatenate([rec_fw, rec_bw], axis=2)
    out = rec.reshape(T * B, -1) @ params["emb_w_t"] + params["emb_b"][0]
    return out.reshape(T, B, -1)


# ----------------------------------------------------------------------------
if __name__ == "__main__":
    T, B, nIn, nHidden, nOut = 8, 8, 32, 32, 16

    key = jax.random.PRNGKey(0)
    k_x, k_p = jax.random.split(key)
    x = jax.random.normal(k_x, (T, B, nIn), jnp.float32)
    params = init_params(k_p, nIn, nHidden, nOut)
    packed = pack_params(params, nIn, nHidden, nOut)

    fwd = jax.jit(functools.partial(bidirectional_lstm_forward, n_out=nOut))
    out = jax.block_until_ready(fwd(x, packed))

    ref = _forward_ref(x, params)
    assert out.shape == (T, B, nOut), out.shape
    # bf16 matmul operands -> compare against the f32 reference with a
    # correspondingly looser tolerance (structural bugs would be O(0.3+) off).
    np.testing.assert_allclose(np.asarray(out), np.asarray(ref),
                               rtol=7e-2, atol=7e-2)

    print("KERNEL_OK")
</pallas_src>

<mosaic_0001>
module attributes {stable_mosaic.version = 11 : i64} {
  func.func @_linear_kernel(%arg0: i32, %arg1: memref<64x128xbf16, #tpu.memory_space<vmem>>, %arg2: memref<64x128xbf16, #tpu.memory_space<vmem>>, %arg3: memref<128x128xbf16, #tpu.memory_space<vmem>>, %arg4: memref<128x128xbf16, #tpu.memory_space<vmem>>, %arg5: memref<1x128xf32, #tpu.memory_space<vmem>>, %arg6: memref<64x128xf32, #tpu.memory_space<vmem>>) attributes {dimension_semantics = [#tpu.dimension_semantics<parallel>], iteration_bounds = array<i64: 1>, scalar_prefetch = 0 : i64, scratch_operands = 0 : i64, tpu.core_type = #tpu.core_type<tc>, window_params = [{transform_indices = @transform_0, window_bounds = array<i64: 64, 128>}, {transform_indices = @transform_1, window_bounds = array<i64: 64, 128>}, {pipeline_mode = #tpu.pipeline_mode<synchronous>, transform_indices = @transform_2, window_bounds = array<i64: 128, 128>}, {pipeline_mode = #tpu.pipeline_mode<synchronous>, transform_indices = @transform_3, window_bounds = array<i64: 128, 128>}, {pipeline_mode = #tpu.pipeline_mode<synchronous>, transform_indices = @transform_4, window_bounds = array<i64: 1, 128>}, {transform_indices = @transform_5, window_bounds = array<i64: 64, 128>}]} {
    %c0 = arith.constant 0 : index
    %c0_0 = arith.constant 0 : index
    %0 = vector.load %arg1[%c0, %c0_0] : memref<64x128xbf16, #tpu.memory_space<vmem>>, vector<64x128xbf16>
    %c0_1 = arith.constant 0 : index
    %c0_2 = arith.constant 0 : index
    %1 = vector.load %arg3[%c0_1, %c0_2] : memref<128x128xbf16, #tpu.memory_space<vmem>>, vector<128x128xbf16>
    %cst = arith.constant dense<0.000000e+00> : vector<64x128xf32>
    %2 = tpu.matmul %0, %1, %cst {dimension_numbers = #tpu.dot_dimension_numbers<[1], [0], [0], [1], [0, 0, 1, 1], [], []>} : vector<64x128xbf16>, vector<128x128xbf16>, vector<64x128xf32> -> vector<64x128xf32>
    %c0_3 = arith.constant 0 : index
    %c0_4 = arith.constant 0 : index
    %3 = vector.load %arg2[%c0_3, %c0_4] : memref<64x128xbf16, #tpu.memory_space<vmem>>, vector<64x128xbf16>
    %c0_5 = arith.constant 0 : index
    %c0_6 = arith.constant 0 : index
    %4 = vector.load %arg4[%c0_5, %c0_6] : memref<128x128xbf16, #tpu.memory_space<vmem>>, vector<128x128xbf16>
    %cst_7 = arith.constant dense<0.000000e+00> : vector<64x128xf32>
    %5 = tpu.matmul %3, %4, %cst_7 {dimension_numbers = #tpu.dot_dimension_numbers<[1], [0], [0], [1], [0, 0, 1, 1], [], []>} : vector<64x128xbf16>, vector<128x128xbf16>, vector<64x128xf32> -> vector<64x128xf32>
    %6 = arith.addf %2, %5 : vector<64x128xf32>
    %c0_8 = arith.constant 0 : index
    %c0_9 = arith.constant 0 : index
    %7 = vector.load %arg5[%c0_8, %c0_9] : memref<1x128xf32, #tpu.memory_space<vmem>>, vector<1x128xf32>
    %8 = vector.broadcast %7 : vector<1x128xf32> to vector<64x128xf32>
    %9 = arith.addf %6, %8 : vector<64x128xf32>
    %c0_10 = arith.constant 0 : index
    %c0_11 = arith.constant 0 : index
    %10 = vector.load %arg6[%c0_10, %c0_11] : memref<64x128xf32, #tpu.memory_space<vmem>>, vector<64x128xf32>
    tpu.vector_store %arg6[%c0_10, %c0_11], %9 {strides = array<i32>} : memref<64x128xf32, #tpu.memory_space<vmem>>, vector<64x128xf32>,
    return
  }
  func.func @transform_0(%arg0: i32) -> (i32, i32) {
    %c0_i32 = arith.constant 0 : i32
    %c0_i32_0 = arith.constant 0 : i32
    return %arg0, %c0_i32 : i32, i32
  }
  func.func @transform_1(%arg0: i32) -> (i32, i32) {
    %c0_i32 = arith.constant 0 : i32
    %c0_i32_0 = arith.constant 0 : i32
    return %arg0, %c0_i32 : i32, i32
  }
  func.func @transform_2(%arg0: i32) -> (i32, i32) {
    %c0_i32 = arith.constant 0 : i32
    %c0_i32_0 = arith.constant 0 : i32
    %c0_i32_1 = arith.constant 0 : i32
    return %c0_i32, %c0_i32_0 : i32, i32
  }
  func.func @transform_3(%arg0: i32) -> (i32, i32) {
    %c0_i32 = arith.constant 0 : i32
    %c0_i32_0 = arith.constant 0 : i32
    %c0_i32_1 = arith.constant 0 : i32
    return %c0_i32, %c0_i32_0 : i32, i32
  }
  func.func @transform_4(%arg0: i32) -> (i32, i32) {
    %c0_i32 = arith.constant 0 : i32
    %c0_i32_0 = arith.constant 0 : i32
    %c0_i32_1 = arith.constant 0 : i32
    return %c0_i32, %c0_i32_0 : i32, i32
  }
  func.func @transform_5(%arg0: i32) -> (i32, i32) {
    %c0_i32 = arith.constant 0 : i32
    %c0_i32_0 = arith.constant 0 : i32
    return %arg0, %c0_i32 : i32, i32
  }
}

module attributes {stable_mosaic.version = 11 : i64} {
  func.func @_bilstm_kernel(%arg0: i32, %arg1: memref<64x32xbf16, #tpu.memory_space<vmem>>, %arg2: memref<64x32xbf16, #tpu.memory_space<vmem>>, %arg3: memref<2x32x512xbf16, #tpu.memory_space<vmem>>, %arg4: memref<2x128x512xbf16, #tpu.memory_space<vmem>>, %arg5: memref<2x1x512xf32, #tpu.memory_space<vmem>>, %arg6: memref<8x8x128xbf16, #tpu.memory_space<vmem>>, %arg7: memref<8x8x128xbf16, #tpu.memory_space<vmem>>, %arg8: memref<8x128xf32, #tpu.memory_space<vmem>>, %arg9: memref<8x128xf32, #tpu.memory_space<vmem>>, %arg10: memref<8x128xf32, #tpu.memory_space<vmem>>, %arg11: memref<8x128xf32, #tpu.memory_space<vmem>>, %arg12: memref<64x512xf32, #tpu.memory_space<vmem>>, %arg13: memref<64x512xf32, #tpu.memory_space<vmem>>) attributes {dimension_semantics = [#tpu.dimension_semantics<arbitrary>], iteration_bounds = array<i64: 1>, scalar_prefetch = 0 : i64, scratch_operands = 6 : i64, tpu.core_type = #tpu.core_type<tc>, window_params = [{transform_indices = @transform_0, window_bounds = array<i64: 64, 32>}, {transform_indices = @transform_1, window_bounds = array<i64: 64, 32>}, {pipeline_mode = #tpu.pipeline_mode<synchronous>, transform_indices = @transform_2, window_bounds = array<i64: 2, 32, 512>}, {pipeline_mode = #tpu.pipeline_mode<synchronous>, transform_indices = @transform_3, window_bounds = array<i64: 2, 128, 512>}, {pipeline_mode = #tpu.pipeline_mode<synchronous>, transform_indices = @transform_4, window_bounds = array<i64: 2, 1, 512>}, {transform_indices = @transform_5, window_bounds = array<i64: 8, 8, 128>}, {transform_indices = @transform_6, window_bounds = array<i64: 8, 8, 128>}]} {
    %c0_i32 = arith.constant 0 : i32
    %0 = arith.cmpi eq, %arg0, %c0_i32 : i32
    %1 = arith.extui %0 : i1 to i32
    %c0_i32_0 = arith.constant 0 : i32
    %2 = arith.cmpi ne, %1, %c0_i32_0 : i32
    scf.if %2 {
      %cst_333 = arith.constant 0.000000e+00 : f32
      %717 = vector.broadcast %cst_333 : f32 to vector<8x128xf32>
      %c0_334 = arith.constant 0 : index
      %c0_335 = arith.constant 0 : index
      %718 = vector.load %arg8[%c0_334, %c0_335] : memref<8x128xf32, #tpu.memory_space<vmem>>, vector<8x128xf32>
      tpu.vector_store %arg8[%c0_334, %c0_335], %717 {strides = array<i32>} : memref<8x128xf32, #tpu.memory_space<vmem>>, vector<8x128xf32>,
      %cst_336 = arith.constant 0.000000e+00 : f32
      %719 = vector.broadcast %cst_336 : f32 to vector<8x128xf32>
      %c0_337 = arith.constant 0 : index
      %c0_338 = arith.constant 0 : index
      %720 = vector.load %arg9[%c0_337, %c0_338] : memref<8x128xf32, #tpu.memory_space<vmem>>, vector<8x128xf32>
      tpu.vector_store %arg9[%c0_337, %c0_338], %719 {strides = array<i32>} : memref<8x128xf32, #tpu.memory_space<vmem>>, vector<8x128xf32>,
      %cst_339 = arith.constant 0.000000e+00 : f32
      %721 = vector.broadcast %cst_339 : f32 to vector<8x128xf32>
      %c0_340 = arith.constant 0 : index
      %c0_341 = arith.constant 0 : index
      %722 = vector.load %arg10[%c0_340, %c0_341] : memref<8x128xf32, #tpu.memory_space<vmem>>, vector<8x128xf32>
      tpu.vector_store %arg10[%c0_340, %c0_341], %721 {strides = array<i32>} : memref<8x128xf32, #tpu.memory_space<vmem>>, vector<8x128xf32>,
      %cst_342 = arith.constant 0.000000e+00 : f32
      %723 = vector.broadcast %cst_342 : f32 to vector<8x128xf32>
      %c0_343 = arith.constant 0 : index
      %c0_344 = arith.constant 0 : index
      %724 = vector.load %arg11[%c0_343, %c0_344] : memref<8x128xf32, #tpu.memory_space<vmem>>, vector<8x128xf32>
      tpu.vector_store %arg11[%c0_343, %c0_344], %723 {strides = array<i32>} : memref<8x128xf32, #tpu.memory_space<vmem>>, vector<8x128xf32>,
    } else {
    }
    %c0 = arith.constant 0 : index
    %c0_1 = arith.constant 0 : index
    %3 = vector.load %arg1[%c0, %c0_1] : memref<64x32xbf16, #tpu.memory_space<vmem>>, vector<64x32xbf16>
    %c0_2 = arith.constant 0 : index
    %c0_3 = arith.constant 0 : index
    %c0_4 = arith.constant 0 : index
    %4 = vector.load %arg3[%c0_2, %c0_3, %c0_4] : memref<2x32x512xbf16, #tpu.memory_space<vmem>>, vector<1x32x512xbf16>
    %5 = vector.shape_cast %4 : vector<1x32x512xbf16> to vector<32x512xbf16>
    %cst = arith.constant dense<0.000000e+00> : vector<64x512xf32>
    %6 = tpu.matmul %3, %5, %cst {dimension_numbers = #tpu.dot_dimension_numbers<[1], [0], [0], [1], [0, 0, 1, 1], [], []>} : vector<64x32xbf16>, vector<32x512xbf16>, vector<64x512xf32> -> vector<64x512xf32>
    %c0_5 = arith.constant 0 : index
    %c0_6 = arith.constant 0 : index
    %c0_7 = arith.constant 0 : index
    %7 = vector.load %arg5[%c0_5, %c0_6, %c0_7] : memref<2x1x512xf32, #tpu.memory_space<vmem>>, vector<1x1x512xf32>
    %8 = vector.shape_cast %7 : vector<1x1x512xf32> to vector<1x512xf32>
    %9 = vector.broadcast %8 : vector<1x512xf32> to vector<64x512xf32>
    %10 = arith.addf %6, %9 : vector<64x512xf32>
    %c0_8 = arith.constant 0 : index
    %c0_9 = arith.constant 0 : index
    %11 = vector.load %arg12[%c0_8, %c0_9] : memref<64x512xf32, #tpu.memory_space<vmem>>, vector<64x512xf32>
    tpu.vector_store %arg12[%c0_8, %c0_9], %10 {strides = array<i32>} : memref<64x512xf32, #tpu.memory_space<vmem>>, vector<64x512xf32>,
    %c0_10 = arith.constant 0 : index
    %c0_11 = arith.constant 0 : index
    %12 = vector.load %arg2[%c0_10, %c0_11] : memref<64x32xbf16, #tpu.memory_space<vmem>>, vector<64x32xbf16>
    %c1 = arith.constant 1 : index
    %c0_12 = arith.constant 0 : index
    %c0_13 = arith.constant 0 : index
    %13 = vector.load %arg3[%c1, %c0_12, %c0_13] : memref<2x32x512xbf16, #tpu.memory_space<vmem>>, vector<1x32x512xbf16>
    %14 = vector.shape_cast %13 : vector<1x32x512xbf16> to vector<32x512xbf16>
    %cst_14 = arith.constant dense<0.000000e+00> : vector<64x512xf32>
    %15 = tpu.matmul %12, %14, %cst_14 {dimension_numbers = #tpu.dot_dimension_numbers<[1], [0], [0], [1], [0, 0, 1, 1], [], []>} : vector<64x32xbf16>, vector<32x512xbf16>, vector<64x512xf32> -> vector<64x512xf32>
    %c1_15 = arith.constant 1 : index
    %c0_16 = arith.constant 0 : index
    %c0_17 = arith.constant 0 : index
    %16 = vector.load %arg5[%c1_15, %c0_16, %c0_17] : memref<2x1x512xf32, #tpu.memory_space<vmem>>, vector<1x1x512xf32>
    %17 = vector.shape_cast %16 : vector<1x1x512xf32> to vector<1x512xf32>
    %18 = vector.broadcast %17 : vector<1x512xf32> to vector<64x512xf32>
    %19 = arith.addf %15, %18 : vector<64x512xf32>
    %c0_18 = arith.constant 0 : index
    %c0_19 = arith.constant 0 : index
    %20 = vector.load %arg13[%c0_18, %c0_19] : memref<64x512xf32, #tpu.memory_space<vmem>>, vector<64x512xf32>
    tpu.vector_store %arg13[%c0_18, %c0_19], %19 {strides = array<i32>} : memref<64x512xf32, #tpu.memory_space<vmem>>, vector<64x512xf32>,
    %c0_i32_20 = arith.constant 0 : i32
    %c8_i32 = arith.constant 8 : i32
    %21 = arith.muli %c0_i32_20, %c8_i32 : i32
    %22 = tpu.assume_multiple %21, 8 : i32
    %23 = arith.index_cast %22 : i32 to index
    %c0_21 = arith.constant 0 : index
    %24 = vector.load %arg12[%23, %c0_21] : memref<64x512xf32, #tpu.memory_space<vmem>>, vector<8x512xf32>
    %c0_22 = arith.constant 0 : index
    %c0_23 = arith.constant 0 : index
    %25 = vector.load %arg8[%c0_22, %c0_23] : memref<8x128xf32, #tpu.memory_space<vmem>>, vector<8x128xf32>
    %26 = arith.truncf %25 : vector<8x128xf32> to vector<8x128xbf16>
    %c0_24 = arith.constant 0 : index
    %c0_25 = arith.constant 0 : index
    %c0_26 = arith.constant 0 : index
    %27 = vector.load %arg4[%c0_24, %c0_25, %c0_26] : memref<2x128x512xbf16, #tpu.memory_space<vmem>>, vector<1x128x512xbf16>
    %28 = vector.shape_cast %27 : vector<1x128x512xbf16> to vector<128x512xbf16>
    %cst_27 = arith.constant dense<0.000000e+00> : vector<8x512xf32>
    %29 = tpu.matmul %26, %28, %cst_27 {dimension_numbers = #tpu.dot_dimension_numbers<[1], [0], [0], [1], [0, 0, 1, 1], [], []>} : vector<8x128xbf16>, vector<128x512xbf16>, vector<8x512xf32> -> vector<8x512xf32>
    %30 = arith.addf %24, %29 : vector<8x512xf32>
    %31 = vector.extract_strided_slice %30 {offsets = [0, 0], sizes = [8, 128], strides = [1, 1]} : vector<8x512xf32> to vector<8x128xf32>
    %32 = arith.negf %31 : vector<8x128xf32>
    %33 = math.exp %32 : vector<8x128xf32>
    %cst_28 = arith.constant 1.000000e+00 : f32
    %34 = vector.broadcast %cst_28 : f32 to vector<8x128xf32>
    %35 = arith.addf %34, %33 : vector<8x128xf32>
    %36 = arith.divf %34, %35 : vector<8x128xf32>
    %37 = vector.extract_strided_slice %30 {offsets = [0, 128], sizes = [8, 128], strides = [1, 1]} : vector<8x512xf32> to vector<8x128xf32>
    %38 = arith.negf %37 : vector<8x128xf32>
    %39 = math.exp %38 : vector<8x128xf32>
    %cst_29 = arith.constant 1.000000e+00 : f32
    %40 = vector.broadcast %cst_29 : f32 to vector<8x128xf32>
    %41 = arith.addf %40, %39 : vector<8x128xf32>
    %42 = arith.divf %40, %41 : vector<8x128xf32>
    %43 = vector.extract_strided_slice %30 {offsets = [0, 256], sizes = [8, 128], strides = [1, 1]} : vector<8x512xf32> to vector<8x128xf32>
    %44 = math.tanh %43 : vector<8x128xf32>
    %45 = vector.extract_strided_slice %30 {offsets = [0, 384], sizes = [8, 128], strides = [1, 1]} : vector<8x512xf32> to vector<8x128xf32>
    %46 = arith.negf %45 : vector<8x128xf32>
    %47 = math.exp %46 : vector<8x128xf32>
    %cst_30 = arith.constant 1.000000e+00 : f32
    %48 = vector.broadcast %cst_30 : f32 to vector<8x128xf32>
    %49 = arith.addf %48, %47 : vector<8x128xf32>
    %50 = arith.divf %48, %49 : vector<8x128xf32>
    %c0_31 = arith.constant 0 : index
    %c0_32 = arith.constant 0 : index
    %51 = vector.load %arg9[%c0_31, %c0_32] : memref<8x128xf32, #tpu.memory_space<vmem>>, vector<8x128xf32>
    %52 = arith.mulf %42, %51 : vector<8x128xf32>
    %53 = arith.mulf %36, %44 : vector<8x128xf32>
    %54 = arith.addf %52, %53 : vector<8x128xf32>
    %55 = math.tanh %54 : vector<8x128xf32>
    %56 = arith.mulf %50, %55 : vector<8x128xf32>
    %c0_33 = arith.constant 0 : index
    %c0_34 = arith.constant 0 : index
    %57 = vector.load %arg9[%c0_33, %c0_34] : memref<8x128xf32, #tpu.memory_space<vmem>>, vector<8x128xf32>
    tpu.vector_store %arg9[%c0_33, %c0_34], %54 {strides = array<i32>} : memref<8x128xf32, #tpu.memory_space<vmem>>, vector<8x128xf32>,
    %c0_35 = arith.constant 0 : index
    %c0_36 = arith.constant 0 : index
    %58 = vector.load %arg8[%c0_35, %c0_36] : memref<8x128xf32, #tpu.memory_space<vmem>>, vector<8x128xf32>
    tpu.vector_store %arg8[%c0_35, %c0_36], %56 {strides = array<i32>} : memref<8x128xf32, #tpu.memory_space<vmem>>, vector<8x128xf32>,
    %59 = arith.truncf %56 : vector<8x128xf32> to vector<8x128xbf16>
    %60 = arith.index_cast %c0_i32_20 : i32 to index
    %c0_37 = arith.constant 0 : index
    %c0_38 = arith.constant 0 : index
    %61 = vector.load %arg6[%60, %c0_37, %c0_38] : memref<8x8x128xbf16, #tpu.memory_space<vmem>>, vector<1x8x128xbf16>
    %62 = vector.shape_cast %61 : vector<1x8x128xbf16> to vector<8x128xbf16>
    %63 = vector.shape_cast %59 : vector<8x128xbf16> to vector<1x8x128xbf16>
    tpu.vector_store %arg6[%60, %c0_37, %c0_38], %63 {strides = array<i32>} : memref<8x8x128xbf16, #tpu.memory_space<vmem>>, vector<1x8x128xbf16>,
    %c7_i32 = arith.constant 7 : i32
    %64 = arith.subi %c7_i32, %c0_i32_20 : i32
    %c8_i32_39 = arith.constant 8 : i32
    %65 = arith.muli %64, %c8_i32_39 : i32
    %66 = tpu.assume_multiple %65, 8 : i32
    %67 = arith.index_cast %66 : i32 to index
    %c0_40 = arith.constant 0 : index
    %68 = vector.load %arg13[%67, %c0_40] : memref<64x512xf32, #tpu.memory_space<vmem>>, vector<8x512xf32>
    %c0_41 = arith.constant 0 : index
    %c0_42 = arith.constant 0 : index
    %69 = vector.load %arg10[%c0_41, %c0_42] : memref<8x128xf32, #tpu.memory_space<vmem>>, vector<8x128xf32>
    %70 = arith.truncf %69 : vector<8x128xf32> to vector<8x128xbf16>
    %c1_43 = arith.constant 1 : index
    %c0_44 = arith.constant 0 : index
    %c0_45 = arith.constant 0 : index
    %71 = vector.load %arg4[%c1_43, %c0_44, %c0_45] : memref<2x128x512xbf16, #tpu.memory_space<vmem>>, vector<1x128x512xbf16>
    %72 = vector.shape_cast %71 : vector<1x128x512xbf16> to vector<128x512xbf16>
    %cst_46 = arith.constant dense<0.000000e+00> : vector<8x512xf32>
    %73 = tpu.matmul %70, %72, %cst_46 {dimension_numbers = #tpu.dot_dimension_numbers<[1], [0], [0], [1], [0, 0, 1, 1], [], []>} : vector<8x128xbf16>, vector<128x512xbf16>, vector<8x512xf32> -> vector<8x512xf32>
    %74 = arith.addf %68, %73 : vector<8x512xf32>
    %75 = vector.extract_strided_slice %74 {offsets = [0, 0], sizes = [8, 128], strides = [1, 1]} : vector<8x512xf32> to vector<8x128xf32>
    %76 = arith.negf %75 : vector<8x128xf32>
    %77 = math.exp %76 : vector<8x128xf32>
    %cst_47 = arith.constant 1.000000e+00 : f32
    %78 = vector.broadcast %cst_47 : f32 to vector<8x128xf32>
    %79 = arith.addf %78, %77 : vector<8x128xf32>
    %80 = arith.divf %78, %79 : vector<8x128xf32>
    %81 = vector.extract_strided_slice %74 {offsets = [0, 128], sizes = [8, 128], strides = [1, 1]} : vector<8x512xf32> to vector<8x128xf32>
    %82 = arith.negf %81 : vector<8x128xf32>
    %83 = math.exp %82 : vector<8x128xf32>
    %cst_48 = arith.constant 1.000000e+00 : f32
    %84 = vector.broadcast %cst_48 : f32 to vector<8x128xf32>
    %85 = arith.addf %84, %83 : vector<8x128xf32>
    %86 = arith.divf %84, %85 : vector<8x128xf32>
    %87 = vector.extract_strided_slice %74 {offsets = [0, 256], sizes = [8, 128], strides = [1, 1]} : vector<8x512xf32> to vector<8x128xf32>
    %88 = math.tanh %87 : vector<8x128xf32>
    %89 = vector.extract_strided_slice %74 {offsets = [0, 384], sizes = [8, 128], strides = [1, 1]} : vector<8x512xf32> to vector<8x128xf32>
    %90 = arith.negf %89 : vector<8x128xf32>
    %91 = math.exp %90 : vector<8x128xf32>
    %cst_49 = arith.constant 1.000000e+00 : f32
    %92 = vector.broadcast %cst_49 : f32 to vector<8x128xf32>
    %93 = arith.addf %92, %91 : vector<8x128xf32>
    %94 = arith.divf %92, %93 : vector<8x128xf32>
    %c0_50 = arith.constant 0 : index
    %c0_51 = arith.constant 0 : index
    %95 = vector.load %arg11[%c0_50, %c0_51] : memref<8x128xf32, #tpu.memory_space<vmem>>, vector<8x128xf32>
    %96 = arith.mulf %86, %95 : vector<8x128xf32>
    %97 = arith.mulf %80, %88 : vector<8x128xf32>
    %98 = arith.addf %96, %97 : vector<8x128xf32>
    %99 = math.tanh %98 : vector<8x128xf32>
    %100 = arith.mulf %94, %99 : vector<8x128xf32>
    %c0_52 = arith.constant 0 : index
    %c0_53 = arith.constant 0 : index
    %101 = vector.load %arg11[%c0_52, %c0_53] : memref<8x128xf32, #tpu.memory_space<vmem>>, vector<8x128xf32>
    tpu.vector_store %arg11[%c0_52, %c0_53], %98 {strides = array<i32>} : memref<8x128xf32, #tpu.memory_space<vmem>>, vector<8x128xf32>,
    %c0_54 = arith.constant 0 : index
    %c0_55 = arith.constant 0 : index
    %102 = vector.load %arg10[%c0_54, %c0_55] : memref<8x128xf32, #tpu.memory_space<vmem>>, vector<8x128xf32>
    tpu.vector_store %arg10[%c0_54, %c0_55], %100 {strides = array<i32>} : memref<8x128xf32, #tpu.memory_space<vmem>>, vector<8x128xf32>,
    %103 = arith.truncf %100 : vector<8x128xf32> to vector<8x128xbf16>
    %104 = arith.index_cast %64 : i32 to index
    %c0_56 = arith.constant 0 : index
    %c0_57 = arith.constant 0 : index
    %105 = vector.load %arg7[%104, %c0_56, %c0_57] : memref<8x8x128xbf16, #tpu.memory_space<vmem>>, vector<1x8x128xbf16>
    %106 = vector.shape_cast %105 : vector<1x8x128xbf16> to vector<8x128xbf16>
    %107 = vector.shape_cast %103 : vector<8x128xbf16> to vector<1x8x128xbf16>
    tpu.vector_store %arg7[%104, %c0_56, %c0_57], %107 {strides = array<i32>} : memref<8x8x128xbf16, #tpu.memory_space<vmem>>, vector<1x8x128xbf16>,
    %c1_i32 = arith.constant 1 : i32
    %c8_i32_58 = arith.constant 8 : i32
    %108 = arith.muli %c1_i32, %c8_i32_58 : i32
    %109 = tpu.assume_multiple %108, 8 : i32
    %110 = arith.index_cast %109 : i32 to index
    %c0_59 = arith.constant 0 : index
    %111 = vector.load %arg12[%110, %c0_59] : memref<64x512xf32, #tpu.memory_space<vmem>>, vector<8x512xf32>
    %c0_60 = arith.constant 0 : index
    %c0_61 = arith.constant 0 : index
    %112 = vector.load %arg8[%c0_60, %c0_61] : memref<8x128xf32, #tpu.memory_space<vmem>>, vector<8x128xf32>
    %113 = arith.truncf %112 : vector<8x128xf32> to vector<8x128xbf16>
    %c0_62 = arith.constant 0 : index
    %c0_63 = arith.constant 0 : index
    %c0_64 = arith.constant 0 : index
    %114 = vector.load %arg4[%c0_62, %c0_63, %c0_64] : memref<2x128x512xbf16, #tpu.memory_space<vmem>>, vector<1x128x512xbf16>
    %115 = vector.shape_cast %114 : vector<1x128x512xbf16> to vector<128x512xbf16>
    %cst_65 = arith.constant dense<0.000000e+00> : vector<8x512xf32>
    %116 = tpu.matmul %113, %115, %cst_65 {dimension_numbers = #tpu.dot_dimension_numbers<[1], [0], [0], [1], [0, 0, 1, 1], [], []>} : vector<8x128xbf16>, vector<128x512xbf16>, vector<8x512xf32> -> vector<8x512xf32>
    %117 = arith.addf %111, %116 : vector<8x512xf32>
    %118 = vector.extract_strided_slice %117 {offsets = [0, 0], sizes = [8, 128], strides = [1, 1]} : vector<8x512xf32> to vector<8x128xf32>
    %119 = arith.negf %118 : vector<8x128xf32>
    %120 = math.exp %119 : vector<8x128xf32>
    %cst_66 = arith.constant 1.000000e+00 : f32
    %121 = vector.broadcast %cst_66 : f32 to vector<8x128xf32>
    %122 = arith.addf %121, %120 : vector<8x128xf32>
    %123 = arith.divf %121, %122 : vector<8x128xf32>
    %124 = vector.extract_strided_slice %117 {offsets = [0, 128], sizes = [8, 128], strides = [1, 1]} : vector<8x512xf32> to vector<8x128xf32>
    %125 = arith.negf %124 : vector<8x128xf32>
    %126 = math.exp %125 : vector<8x128xf32>
    %cst_67 = arith.constant 1.000000e+00 : f32
    %127 = vector.broadcast %cst_67 : f32 to vector<8x128xf32>
    %128 = arith.addf %127, %126 : vector<8x128xf32>
    %129 = arith.divf %127, %128 : vector<8x128xf32>
    %130 = vector.extract_strided_slice %117 {offsets = [0, 256], sizes = [8, 128], strides = [1, 1]} : vector<8x512xf32> to vector<8x128xf32>
    %131 = math.tanh %130 : vector<8x128xf32>
    %132 = vector.extract_strided_slice %117 {offsets = [0, 384], sizes = [8, 128], strides = [1, 1]} : vector<8x512xf32> to vector<8x128xf32>
    %133 = arith.negf %132 : vector<8x128xf32>
    %134 = math.exp %133 : vector<8x128xf32>
    %cst_68 = arith.constant 1.000000e+00 : f32
    %135 = vector.broadcast %cst_68 : f32 to vector<8x128xf32>
    %136 = arith.addf %135, %134 : vector<8x128xf32>
    %137 = arith.divf %135, %136 : vector<8x128xf32>
    %c0_69 = arith.constant 0 : index
    %c0_70 = arith.constant 0 : index
    %138 = vector.load %arg9[%c0_69, %c0_70] : memref<8x128xf32, #tpu.memory_space<vmem>>, vector<8x128xf32>
    %139 = arith.mulf %129, %138 : vector<8x128xf32>
    %140 = arith.mulf %123, %131 : vector<8x128xf32>
    %141 = arith.addf %139, %140 : vector<8x128xf32>
    %142 = math.tanh %141 : vector<8x128xf32>
    %143 = arith.mulf %137, %142 : vector<8x128xf32>
    %c0_71 = arith.constant 0 : index
    %c0_72 = arith.constant 0 : index
    %144 = vector.load %arg9[%c0_71, %c0_72] : memref<8x128xf32, #tpu.memory_space<vmem>>, vector<8x128xf32>
    tpu.vector_store %arg9[%c0_71, %c0_72], %141 {strides = array<i32>} : memref<8x128xf32, #tpu.memory_space<vmem>>, vector<8x128xf32>,
    %c0_73 = arith.constant 0 : index
    %c0_74 = arith.constant 0 : index
    %145 = vector.load %arg8[%c0_73, %c0_74] : memref<8x128xf32, #tpu.memory_space<vmem>>, vector<8x128xf32>
    tpu.vector_store %arg8[%c0_73, %c0_74], %143 {strides = array<i32>} : memref<8x128xf32, #tpu.memory_space<vmem>>, vector<8x128xf32>,
    %146 = arith.truncf %143 : vector<8x128xf32> to vector<8x128xbf16>
    %147 = arith.index_cast %c1_i32 : i32 to index
    %c0_75 = arith.constant 0 : index
    %c0_76 = arith.constant 0 : index
    %148 = vector.load %arg6[%147, %c0_75, %c0_76] : memref<8x8x128xbf16, #tpu.memory_space<vmem>>, vector<1x8x128xbf16>
    %149 = vector.shape_cast %148 : vector<1x8x128xbf16> to vector<8x128xbf16>
    %150 = vector.shape_cast %146 : vector<8x128xbf16> to vector<1x8x128xbf16>
    tpu.vector_store %arg6[%147, %c0_75, %c0_76], %150 {strides = array<i32>} : memref<8x8x128xbf16, #tpu.memory_space<vmem>>, vector<1x8x128xbf16>,
    %c7_i32_77 = arith.constant 7 : i32
    %151 = arith.subi %c7_i32_77, %c1_i32 : i32
    %c8_i32_78 = arith.constant 8 : i32
    %152 = arith.muli %151, %c8_i32_78 : i32
    %153 = tpu.assume_multiple %152, 8 : i32
    %154 = arith.index_cast %153 : i32 to index
    %c0_79 = arith.constant 0 : index
    %155 = vector.load %arg13[%154, %c0_79] : memref<64x512xf32, #tpu.memory_space<vmem>>, vector<8x512xf32>
    %c0_80 = arith.constant 0 : index
    %c0_81 = arith.constant 0 : index
    %156 = vector.load %arg10[%c0_80, %c0_81] : memref<8x128xf32, #tpu.memory_space<vmem>>, vector<8x128xf32>
    %157 = arith.truncf %156 : vector<8x128xf32> to vector<8x128xbf16>
    %c1_82 = arith.constant 1 : index
    %c0_83 = arith.constant 0 : index
    %c0_84 = arith.constant 0 : index
    %158 = vector.load %arg4[%c1_82, %c0_83, %c0_84] : memref<2x128x512xbf16, #tpu.memory_space<vmem>>, vector<1x128x512xbf16>
    %159 = vector.shape_cast %158 : vector<1x128x512xbf16> to vector<128x512xbf16>
    %cst_85 = arith.constant dense<0.000000e+00> : vector<8x512xf32>
    %160 = tpu.matmul %157, %159, %cst_85 {dimension_numbers = #tpu.dot_dimension_numbers<[1], [0], [0], [1], [0, 0, 1, 1], [], []>} : vector<8x128xbf16>, vector<128x512xbf16>, vector<8x512xf32> -> vector<8x512xf32>
    %161 = arith.addf %155, %160 : vector<8x512xf32>
    %162 = vector.extract_strided_slice %161 {offsets = [0, 0], sizes = [8, 128], strides = [1, 1]} : vector<8x512xf32> to vector<8x128xf32>
    %163 = arith.negf %162 : vector<8x128xf32>
    %164 = math.exp %163 : vector<8x128xf32>
    %cst_86 = arith.constant 1.000000e+00 : f32
    %165 = vector.broadcast %cst_86 : f32 to vector<8x128xf32>
    %166 = arith.addf %165, %164 : vector<8x128xf32>
    %167 = arith.divf %165, %166 : vector<8x128xf32>
    %168 = vector.extract_strided_slice %161 {offsets = [0, 128], sizes = [8, 128], strides = [1, 1]} : vector<8x512xf32> to vector<8x128xf32>
    %169 = arith.negf %168 : vector<8x128xf32>
    %170 = math.exp %169 : vector<8x128xf32>
    %cst_87 = arith.constant 1.000000e+00 : f32
    %171 = vector.broadcast %cst_87 : f32 to vector<8x128xf32>
    %172 = arith.addf %171, %170 : vector<8x128xf32>
    %173 = arith.divf %171, %172 : vector<8x128xf32>
    %174 = vector.extract_strided_slice %161 {offsets = [0, 256], sizes = [8, 128], strides = [1, 1]} : vector<8x512xf32> to vector<8x128xf32>
    %175 = math.tanh %174 : vector<8x128xf32>
    %176 = vector.extract_strided_slice %161 {offsets = [0, 384], sizes = [8, 128], strides = [1, 1]} : vector<8x512xf32> to vector<8x128xf32>
    %177 = arith.negf %176 : vector<8x128xf32>
    %178 = math.exp %177 : vector<8x128xf32>
    %cst_88 = arith.constant 1.000000e+00 : f32
    %179 = vector.broadcast %cst_88 : f32 to vector<8x128xf32>
    %180 = arith.addf %179, %178 : vector<8x128xf32>
    %181 = arith.divf %179, %180 : vector<8x128xf32>
    %c0_89 = arith.constant 0 : index
    %c0_90 = arith.constant 0 : index
    %182 = vector.load %arg11[%c0_89, %c0_90] : memref<8x128xf32, #tpu.memory_space<vmem>>, vector<8x128xf32>
    %183 = arith.mulf %173, %182 : vector<8x128xf32>
    %184 = arith.mulf %167, %175 : vector<8x128xf32>
    %185 = arith.addf %183, %184 : vector<8x128xf32>
    %186 = math.tanh %185 : vector<8x128xf32>
    %187 = arith.mulf %181, %186 : vector<8x128xf32>
    %c0_91 = arith.constant 0 : index
    %c0_92 = arith.constant 0 : index
    %188 = vector.load %arg11[%c0_91, %c0_92] : memref<8x128xf32, #tpu.memory_space<vmem>>, vector<8x128xf32>
    tpu.vector_store %arg11[%c0_91, %c0_92], %185 {strides = array<i32>} : memref<8x128xf32, #tpu.memory_space<vmem>>, vector<8x128xf32>,
    %c0_93 = arith.constant 0 : index
    %c0_94 = arith.constant 0 : index
    %189 = vector.load %arg10[%c0_93, %c0_94] : memref<8x128xf32, #tpu.memory_space<vmem>>, vector<8x128xf32>
    tpu.vector_store %arg10[%c0_93, %c0_94], %187 {strides = array<i32>} : memref<8x128xf32, #tpu.memory_space<vmem>>, vector<8x128xf32>,
    %190 = arith.truncf %187 : vector<8x128xf32> to vector<8x128xbf16>
    %191 = arith.index_cast %151 : i32 to index
    %c0_95 = arith.constant 0 : index
    %c0_96 = arith.constant 0 : index
    %192 = vector.load %arg7[%191, %c0_95, %c0_96] : memref<8x8x128xbf16, #tpu.memory_space<vmem>>, vector<1x8x128xbf16>
    %193 = vector.shape_cast %192 : vector<1x8x128xbf16> to vector<8x128xbf16>
    %194 = vector.shape_cast %190 : vector<8x128xbf16> to vector<1x8x128xbf16>
    tpu.vector_store %arg7[%191, %c0_95, %c0_96], %194 {strides = array<i32>} : memref<8x8x128xbf16, #tpu.memory_space<vmem>>, vector<1x8x128xbf16>,
    %c2_i32 = arith.constant 2 : i32
    %c8_i32_97 = arith.constant 8 : i32
    %195 = arith.muli %c2_i32, %c8_i32_97 : i32
    %196 = tpu.assume_multiple %195, 8 : i32
    %197 = arith.index_cast %196 : i32 to index
    %c0_98 = arith.constant 0 : index
    %198 = vector.load %arg12[%197, %c0_98] : memref<64x512xf32, #tpu.memory_space<vmem>>, vector<8x512xf32>
    %c0_99 = arith.constant 0 : index
    %c0_100 = arith.constant 0 : index
    %199 = vector.load %arg8[%c0_99, %c0_100] : memref<8x128xf32, #tpu.memory_space<vmem>>, vector<8x128xf32>
    %200 = arith.truncf %199 : vector<8x128xf32> to vector<8x128xbf16>
    %c0_101 = arith.constant 0 : index
    %c0_102 = arith.constant 0 : index
    %c0_103 = arith.constant 0 : index
    %201 = vector.load %arg4[%c0_101, %c0_102, %c0_103] : memref<2x128x512xbf16, #tpu.memory_space<vmem>>, vector<1x128x512xbf16>
    %202 = vector.shape_cast %201 : vector<1x128x512xbf16> to vector<128x512xbf16>
    %cst_104 = arith.constant dense<0.000000e+00> : vector<8x512xf32>
    %203 = tpu.matmul %200, %202, %cst_104 {dimension_numbers = #tpu.dot_dimension_numbers<[1], [0], [0], [1], [0, 0, 1, 1], [], []>} : vector<8x128xbf16>, vector<128x512xbf16>, vector<8x512xf32> -> vector<8x512xf32>
    %204 = arith.addf %198, %203 : vector<8x512xf32>
    %205 = vector.extract_strided_slice %204 {offsets = [0, 0], sizes = [8, 128], strides = [1, 1]} : vector<8x512xf32> to vector<8x128xf32>
    %206 = arith.negf %205 : vector<8x128xf32>
    %207 = math.exp %206 : vector<8x128xf32>
    %cst_105 = arith.constant 1.000000e+00 : f32
    %208 = vector.broadcast %cst_105 : f32 to vector<8x128xf32>
    %209 = arith.addf %208, %207 : vector<8x128xf32>
    %210 = arith.divf %208, %209 : vector<8x128xf32>
    %211 = vector.extract_strided_slice %204 {offsets = [0, 128], sizes = [8, 128], strides = [1, 1]} : vector<8x512xf32> to vector<8x128xf32>
    %212 = arith.negf %211 : vector<8x128xf32>
    %213 = math.exp %212 : vector<8x128xf32>
    %cst_106 = arith.constant 1.000000e+00 : f32
    %214 = vector.broadcast %cst_106 : f32 to vector<8x128xf32>
    %215 = arith.addf %214, %213 : vector<8x128xf32>
    %216 = arith.divf %214, %215 : vector<8x128xf32>
    %217 = vector.extract_strided_slice %204 {offsets = [0, 256], sizes = [8, 128], strides = [1, 1]} : vector<8x512xf32> to vector<8x128xf32>
    %218 = math.tanh %217 : vector<8x128xf32>
    %219 = vector.extract_strided_slice %204 {offsets = [0, 384], sizes = [8, 128], strides = [1, 1]} : vector<8x512xf32> to vector<8x128xf32>
    %220 = arith.negf %219 : vector<8x128xf32>
    %221 = math.exp %220 : vector<8x128xf32>
    %cst_107 = arith.constant 1.000000e+00 : f32
    %222 = vector.broadcast %cst_107 : f32 to vector<8x128xf32>
    %223 = arith.addf %222, %221 : vector<8x128xf32>
    %224 = arith.divf %222, %223 : vector<8x128xf32>
    %c0_108 = arith.constant 0 : index
    %c0_109 = arith.constant 0 : index
    %225 = vector.load %arg9[%c0_108, %c0_109] : memref<8x128xf32, #tpu.memory_space<vmem>>, vector<8x128xf32>
    %226 = arith.mulf %216, %225 : vector<8x128xf32>
    %227 = arith.mulf %210, %218 : vector<8x128xf32>
    %228 = arith.addf %226, %227 : vector<8x128xf32>
    %229 = math.tanh %228 : vector<8x128xf32>
    %230 = arith.mulf %224, %229 : vector<8x128xf32>
    %c0_110 = arith.constant 0 : index
    %c0_111 = arith.constant 0 : index
    %231 = vector.load %arg9[%c0_110, %c0_111] : memref<8x128xf32, #tpu.memory_space<vmem>>, vector<8x128xf32>
    tpu.vector_store %arg9[%c0_110, %c0_111], %228 {strides = array<i32>} : memref<8x128xf32, #tpu.memory_space<vmem>>, vector<8x128xf32>,
    %c0_112 = arith.constant 0 : index
    %c0_113 = arith.constant 0 : index
    %232 = vector.load %arg8[%c0_112, %c0_113] : memref<8x128xf32, #tpu.memory_space<vmem>>, vector<8x128xf32>
    tpu.vector_store %arg8[%c0_112, %c0_113], %230 {strides = array<i32>} : memref<8x128xf32, #tpu.memory_space<vmem>>, vector<8x128xf32>,
    %233 = arith.truncf %230 : vector<8x128xf32> to vector<8x128xbf16>
    %234 = arith.index_cast %c2_i32 : i32 to index
    %c0_114 = arith.constant 0 : index
    %c0_115 = arith.constant 0 : index
    %235 = vector.load %arg6[%234, %c0_114, %c0_115] : memref<8x8x128xbf16, #tpu.memory_space<vmem>>, vector<1x8x128xbf16>
    %236 = vector.shape_cast %235 : vector<1x8x128xbf16> to vector<8x128xbf16>
    %237 = vector.shape_cast %233 : vector<8x128xbf16> to vector<1x8x128xbf16>
    tpu.vector_store %arg6[%234, %c0_114, %c0_115], %237 {strides = array<i32>} : memref<8x8x128xbf16, #tpu.memory_space<vmem>>, vector<1x8x128xbf16>,
    %c7_i32_116 = arith.constant 7 : i32
    %238 = arith.subi %c7_i32_116, %c2_i32 : i32
    %c8_i32_117 = arith.constant 8 : i32
    %239 = arith.muli %238, %c8_i32_117 : i32
    %240 = tpu.assume_multiple %239, 8 : i32
    %241 = arith.index_cast %240 : i32 to index
    %c0_118 = arith.constant 0 : index
    %242 = vector.load %arg13[%241, %c0_118] : memref<64x512xf32, #tpu.memory_space<vmem>>, vector<8x512xf32>
    %c0_119 = arith.constant 0 : index
    %c0_120 = arith.constant 0 : index
    %243 = vector.load %arg10[%c0_119, %c0_120] : memref<8x128xf32, #tpu.memory_space<vmem>>, vector<8x128xf32>
    %244 = arith.truncf %243 : vector<8x128xf32> to vector<8x128xbf16>
    %c1_121 = arith.constant 1 : index
    %c0_122 = arith.constant 0 : index
    %c0_123 = arith.constant 0 : index
    %245 = vector.load %arg4[%c1_121, %c0_122, %c0_123] : memref<2x128x512xbf16, #tpu.memory_space<vmem>>, vector<1x128x512xbf16>
    %246 = vector.shape_cast %245 : vector<1x128x512xbf16> to vector<128x512xbf16>
    %cst_124 = arith.constant dense<0.000000e+00> : vector<8x512xf32>
    %247 = tpu.matmul %244, %246, %cst_124 {dimension_numbers = #tpu.dot_dimension_numbers<[1], [0], [0], [1], [0, 0, 1, 1], [], []>} : vector<8x128xbf16>, vector<128x512xbf16>, vector<8x512xf32> -> vector<8x512xf32>
    %248 = arith.addf %242, %247 : vector<8x512xf32>
    %249 = vector.extract_strided_slice %248 {offsets = [0, 0], sizes = [8, 128], strides = [1, 1]} : vector<8x512xf32> to vector<8x128xf32>
    %250 = arith.negf %249 : vector<8x128xf32>
    %251 = math.exp %250 : vector<8x128xf32>
    %cst_125 = arith.constant 1.000000e+00 : f32
    %252 = vector.broadcast %cst_125 : f32 to vector<8x128xf32>
    %253 = arith.addf %252, %251 : vector<8x128xf32>
    %254 = arith.divf %252, %253 : vector<8x128xf32>
    %255 = vector.extract_strided_slice %248 {offsets = [0, 128], sizes = [8, 128], strides = [1, 1]} : vector<8x512xf32> to vector<8x128xf32>
    %256 = arith.negf %255 : vector<8x128xf32>
    %257 = math.exp %256 : vector<8x128xf32>
    %cst_126 = arith.constant 1.000000e+00 : f32
    %258 = vector.broadcast %cst_126 : f32 to vector<8x128xf32>
    %259 = arith.addf %258, %257 : vector<8x128xf32>
    %260 = arith.divf %258, %259 : vector<8x128xf32>
    %261 = vector.extract_strided_slice %248 {offsets = [0, 256], sizes = [8, 128], strides = [1, 1]} : vector<8x512xf32> to vector<8x128xf32>
    %262 = math.tanh %261 : vector<8x128xf32>
    %263 = vector.extract_strided_slice %248 {offsets = [0, 384], sizes = [8, 128], strides = [1, 1]} : vector<8x512xf32> to vector<8x128xf32>
    %264 = arith.negf %263 : vector<8x128xf32>
    %265 = math.exp %264 : vector<8x128xf32>
    %cst_127 = arith.constant 1.000000e+00 : f32
    %266 = vector.broadcast %cst_127 : f32 to vector<8x128xf32>
    %267 = arith.addf %266, %265 : vector<8x128xf32>
    %268 = arith.divf %266, %267 : vector<8x128xf32>
    %c0_128 = arith.constant 0 : index
    %c0_129 = arith.constant 0 : index
    %269 = vector.load %arg11[%c0_128, %c0_129] : memref<8x128xf32, #tpu.memory_space<vmem>>, vector<8x128xf32>
    %270 = arith.mulf %260, %269 : vector<8x128xf32>
    %271 = arith.mulf %254, %262 : vector<8x128xf32>
    %272 = arith.addf %270, %271 : vector<8x128xf32>
    %273 = math.tanh %272 : vector<8x128xf32>
    %274 = arith.mulf %268, %273 : vector<8x128xf32>
    %c0_130 = arith.constant 0 : index
    %c0_131 = arith.constant 0 : index
    %275 = vector.load %arg11[%c0_130, %c0_131] : memref<8x128xf32, #tpu.memory_space<vmem>>, vector<8x128xf32>
    tpu.vector_store %arg11[%c0_130, %c0_131], %272 {strides = array<i32>} : memref<8x128xf32, #tpu.memory_space<vmem>>, vector<8x128xf32>,
    %c0_132 = arith.constant 0 : index
    %c0_133 = arith.constant 0 : index
    %276 = vector.load %arg10[%c0_132, %c0_133] : memref<8x128xf32, #tpu.memory_space<vmem>>, vector<8x128xf32>
    tpu.vector_store %arg10[%c0_132, %c0_133], %274 {strides = array<i32>} : memref<8x128xf32, #tpu.memory_space<vmem>>, vector<8x128xf32>,
    %277 = arith.truncf %274 : vector<8x128xf32> to vector<8x128xbf16>
    %278 = arith.index_cast %238 : i32 to index
    %c0_134 = arith.constant 0 : index
    %c0_135 = arith.constant 0 : index
    %279 = vector.load %arg7[%278, %c0_134, %c0_135] : memref<8x8x128xbf16, #tpu.memory_space<vmem>>, vector<1x8x128xbf16>
    %280 = vector.shape_cast %279 : vector<1x8x128xbf16> to vector<8x128xbf16>
    %281 = vector.shape_cast %277 : vector<8x128xbf16> to vector<1x8x128xbf16>
    tpu.vector_store %arg7[%278, %c0_134, %c0_135], %281 {strides = array<i32>} : memref<8x8x128xbf16, #tpu.memory_space<vmem>>, vector<1x8x128xbf16>,
    %c3_i32 = arith.constant 3 : i32
    %c8_i32_136 = arith.constant 8 : i32
    %282 = arith.muli %c3_i32, %c8_i32_136 : i32
    %283 = tpu.assume_multiple %282, 8 : i32
    %284 = arith.index_cast %283 : i32 to index
    %c0_137 = arith.constant 0 : index
    %285 = vector.load %arg12[%284, %c0_137] : memref<64x512xf32, #tpu.memory_space<vmem>>, vector<8x512xf32>
    %c0_138 = arith.constant 0 : index
    %c0_139 = arith.constant 0 : index
    %286 = vector.load %arg8[%c0_138, %c0_139] : memref<8x128xf32, #tpu.memory_space<vmem>>, vector<8x128xf32>
    %287 = arith.truncf %286 : vector<8x128xf32> to vector<8x128xbf16>
    %c0_140 = arith.constant 0 : index
    %c0_141 = arith.constant 0 : index
    %c0_142 = arith.constant 0 : index
    %288 = vector.load %arg4[%c0_140, %c0_141, %c0_142] : memref<2x128x512xbf16, #tpu.memory_space<vmem>>, vector<1x128x512xbf16>
    %289 = vector.shape_cast %288 : vector<1x128x512xbf16> to vector<128x512xbf16>
    %cst_143 = arith.constant dense<0.000000e+00> : vector<8x512xf32>
    %290 = tpu.matmul %287, %289, %cst_143 {dimension_numbers = #tpu.dot_dimension_numbers<[1], [0], [0], [1], [0, 0, 1, 1], [], []>} : vector<8x128xbf16>, vector<128x512xbf16>, vector<8x512xf32> -> vector<8x512xf32>
    %291 = arith.addf %285, %290 : vector<8x512xf32>
    %292 = vector.extract_strided_slice %291 {offsets = [0, 0], sizes = [8, 128], strides = [1, 1]} : vector<8x512xf32> to vector<8x128xf32>
    %293 = arith.negf %292 : vector<8x128xf32>
    %294 = math.exp %293 : vector<8x128xf32>
    %cst_144 = arith.constant 1.000000e+00 : f32
    %295 = vector.broadcast %cst_144 : f32 to vector<8x128xf32>
    %296 = arith.addf %295, %294 : vector<8x128xf32>
    %297 = arith.divf %295, %296 : vector<8x128xf32>
    %298 = vector.extract_strided_slice %291 {offsets = [0, 128], sizes = [8, 128], strides = [1, 1]} : vector<8x512xf32> to vector<8x128xf32>
    %299 = arith.negf %298 : vector<8x128xf32>
    %300 = math.exp %299 : vector<8x128xf32>
    %cst_145 = arith.constant 1.000000e+00 : f32
    %301 = vector.broadcast %cst_145 : f32 to vector<8x128xf32>
    %302 = arith.addf %301, %300 : vector<8x128xf32>
    %303 = arith.divf %301, %302 : vector<8x128xf32>
    %304 = vector.extract_strided_slice %291 {offsets = [0, 256], sizes = [8, 128], strides = [1, 1]} : vector<8x512xf32> to vector<8x128xf32>
    %305 = math.tanh %304 : vector<8x128xf32>
    %306 = vector.extract_strided_slice %291 {offsets = [0, 384], sizes = [8, 128], strides = [1, 1]} : vector<8x512xf32> to vector<8x128xf32>
    %307 = arith.negf %306 : vector<8x128xf32>
    %308 = math.exp %307 : vector<8x128xf32>
    %cst_146 = arith.constant 1.000000e+00 : f32
    %309 = vector.broadcast %cst_146 : f32 to vector<8x128xf32>
    %310 = arith.addf %309, %308 : vector<8x128xf32>
    %311 = arith.divf %309, %310 : vector<8x128xf32>
    %c0_147 = arith.constant 0 : index
    %c0_148 = arith.constant 0 : index
    %312 = vector.load %arg9[%c0_147, %c0_148] : memref<8x128xf32, #tpu.memory_space<vmem>>, vector<8x128xf32>
    %313 = arith.mulf %303, %312 : vector<8x128xf32>
    %314 = arith.mulf %297, %305 : vector<8x128xf32>
    %315 = arith.addf %313, %314 : vector<8x128xf32>
    %316 = math.tanh %315 : vector<8x128xf32>
    %317 = arith.mulf %311, %316 : vector<8x128xf32>
    %c0_149 = arith.constant 0 : index
    %c0_150 = arith.constant 0 : index
    %318 = vector.load %arg9[%c0_149, %c0_150] : memref<8x128xf32, #tpu.memory_space<vmem>>, vector<8x128xf32>
    tpu.vector_store %arg9[%c0_149, %c0_150], %315 {strides = array<i32>} : memref<8x128xf32, #tpu.memory_space<vmem>>, vector<8x128xf32>,
    %c0_151 = arith.constant 0 : index
    %c0_152 = arith.constant 0 : index
    %319 = vector.load %arg8[%c0_151, %c0_152] : memref<8x128xf32, #tpu.memory_space<vmem>>, vector<8x128xf32>
    tpu.vector_store %arg8[%c0_151, %c0_152], %317 {strides = array<i32>} : memref<8x128xf32, #tpu.memory_space<vmem>>, vector<8x128xf32>,
    %320 = arith.truncf %317 : vector<8x128xf32> to vector<8x128xbf16>
    %321 = arith.index_cast %c3_i32 : i32 to index
    %c0_153 = arith.constant 0 : index
    %c0_154 = arith.constant 0 : index
    %322 = vector.load %arg6[%321, %c0_153, %c0_154] : memref<8x8x128xbf16, #tpu.memory_space<vmem>>, vector<1x8x128xbf16>
    %323 = vector.shape_cast %322 : vector<1x8x128xbf16> to vector<8x128xbf16>
    %324 = vector.shape_cast %320 : vector<8x128xbf16> to vector<1x8x128xbf16>
    tpu.vector_store %arg6[%321, %c0_153, %c0_154], %324 {strides = array<i32>} : memref<8x8x128xbf16, #tpu.memory_space<vmem>>, vector<1x8x128xbf16>,
    %c7_i32_155 = arith.constant 7 : i32
    %325 = arith.subi %c7_i32_155, %c3_i32 : i32
    %c8_i32_156 = arith.constant 8 : i32
    %326 = arith.muli %325, %c8_i32_156 : i32
    %327 = tpu.assume_multiple %326, 8 : i32
    %328 = arith.index_cast %327 : i32 to index
    %c0_157 = arith.constant 0 : index
    %329 = vector.load %arg13[%328, %c0_157] : memref<64x512xf32, #tpu.memory_space<vmem>>, vector<8x512xf32>
    %c0_158 = arith.constant 0 : index
    %c0_159 = arith.constant 0 : index
    %330 = vector.load %arg10[%c0_158, %c0_159] : memref<8x128xf32, #tpu.memory_space<vmem>>, vector<8x128xf32>
    %331 = arith.truncf %330 : vector<8x128xf32> to vector<8x128xbf16>
    %c1_160 = arith.constant 1 : index
    %c0_161 = arith.constant 0 : index
    %c0_162 = arith.constant 0 : index
    %332 = vector.load %arg4[%c1_160, %c0_161, %c0_162] : memref<2x128x512xbf16, #tpu.memory_space<vmem>>, vector<1x128x512xbf16>
    %333 = vector.shape_cast %332 : vector<1x128x512xbf16> to vector<128x512xbf16>
    %cst_163 = arith.constant dense<0.000000e+00> : vector<8x512xf32>
    %334 = tpu.matmul %331, %333, %cst_163 {dimension_numbers = #tpu.dot_dimension_numbers<[1], [0], [0], [1], [0, 0, 1, 1], [], []>} : vector<8x128xbf16>, vector<128x512xbf16>, vector<8x512xf32> -> vector<8x512xf32>
    %335 = arith.addf %329, %334 : vector<8x512xf32>
    %336 = vector.extract_strided_slice %335 {offsets = [0, 0], sizes = [8, 128], strides = [1, 1]} : vector<8x512xf32> to vector<8x128xf32>
    %337 = arith.negf %336 : vector<8x128xf32>
    %338 = math.exp %337 : vector<8x128xf32>
    %cst_164 = arith.constant 1.000000e+00 : f32
    %339 = vector.broadcast %cst_164 : f32 to vector<8x128xf32>
    %340 = arith.addf %339, %338 : vector<8x128xf32>
    %341 = arith.divf %339, %340 : vector<8x128xf32>
    %342 = vector.extract_strided_slice %335 {offsets = [0, 128], sizes = [8, 128], strides = [1, 1]} : vector<8x512xf32> to vector<8x128xf32>
    %343 = arith.negf %342 : vector<8x128xf32>
    %344 = math.exp %343 : vector<8x128xf32>
    %cst_165 = arith.constant 1.000000e+00 : f32
    %345 = vector.broadcast %cst_165 : f32 to vector<8x128xf32>
    %346 = arith.addf %345, %344 : vector<8x128xf32>
    %347 = arith.divf %345, %346 : vector<8x128xf32>
    %348 = vector.extract_strided_slice %335 {offsets = [0, 256], sizes = [8, 128], strides = [1, 1]} : vector<8x512xf32> to vector<8x128xf32>
    %349 = math.tanh %348 : vector<8x128xf32>
    %350 = vector.extract_strided_slice %335 {offsets = [0, 384], sizes = [8, 128], strides = [1, 1]} : vector<8x512xf32> to vector<8x128xf32>
    %351 = arith.negf %350 : vector<8x128xf32>
    %352 = math.exp %351 : vector<8x128xf32>
    %cst_166 = arith.constant 1.000000e+00 : f32
    %353 = vector.broadcast %cst_166 : f32 to vector<8x128xf32>
    %354 = arith.addf %353, %352 : vector<8x128xf32>
    %355 = arith.divf %353, %354 : vector<8x128xf32>
    %c0_167 = arith.constant 0 : index
    %c0_168 = arith.constant 0 : index
    %356 = vector.load %arg11[%c0_167, %c0_168] : memref<8x128xf32, #tpu.memory_space<vmem>>, vector<8x128xf32>
    %357 = arith.mulf %347, %356 : vector<8x128xf32>
    %358 = arith.mulf %341, %349 : vector<8x128xf32>
    %359 = arith.addf %357, %358 : vector<8x128xf32>
    %360 = math.tanh %359 : vector<8x128xf32>
    %361 = arith.mulf %355, %360 : vector<8x128xf32>
    %c0_169 = arith.constant 0 : index
    %c0_170 = arith.constant 0 : index
    %362 = vector.load %arg11[%c0_169, %c0_170] : memref<8x128xf32, #tpu.memory_space<vmem>>, vector<8x128xf32>
    tpu.vector_store %arg11[%c0_169, %c0_170], %359 {strides = array<i32>} : memref<8x128xf32, #tpu.memory_space<vmem>>, vector<8x128xf32>,
    %c0_171 = arith.constant 0 : index
    %c0_172 = arith.constant 0 : index
    %363 = vector.load %arg10[%c0_171, %c0_172] : memref<8x128xf32, #tpu.memory_space<vmem>>, vector<8x128xf32>
    tpu.vector_store %arg10[%c0_171, %c0_172], %361 {strides = array<i32>} : memref<8x128xf32, #tpu.memory_space<vmem>>, vector<8x128xf32>,
    %364 = arith.truncf %361 : vector<8x128xf32> to vector<8x128xbf16>
    %365 = arith.index_cast %325 : i32 to index
    %c0_173 = arith.constant 0 : index
    %c0_174 = arith.constant 0 : index
    %366 = vector.load %arg7[%365, %c0_173, %c0_174] : memref<8x8x128xbf16, #tpu.memory_space<vmem>>, vector<1x8x128xbf16>
    %367 = vector.shape_cast %366 : vector<1x8x128xbf16> to vector<8x128xbf16>
    %368 = vector.shape_cast %364 : vector<8x128xbf16> to vector<1x8x128xbf16>
    tpu.vector_store %arg7[%365, %c0_173, %c0_174], %368 {strides = array<i32>} : memref<8x8x128xbf16, #tpu.memory_space<vmem>>, vector<1x8x128xbf16>,
    %c4_i32 = arith.constant 4 : i32
    %c8_i32_175 = arith.constant 8 : i32
    %369 = arith.muli %c4_i32, %c8_i32_175 : i32
    %370 = tpu.assume_multiple %369, 8 : i32
    %371 = arith.index_cast %370 : i32 to index
    %c0_176 = arith.constant 0 : index
    %372 = vector.load %arg12[%371, %c0_176] : memref<64x512xf32, #tpu.memory_space<vmem>>, vector<8x512xf32>
    %c0_177 = arith.constant 0 : index
    %c0_178 = arith.constant 0 : index
    %373 = vector.load %arg8[%c0_177, %c0_178] : memref<8x128xf32, #tpu.memory_space<vmem>>, vector<8x128xf32>
    %374 = arith.truncf %373 : vector<8x128xf32> to vector<8x128xbf16>
    %c0_179 = arith.constant 0 : index
    %c0_180 = arith.constant 0 : index
    %c0_181 = arith.constant 0 : index
    %375 = vector.load %arg4[%c0_179, %c0_180, %c0_181] : memref<2x128x512xbf16, #tpu.memory_space<vmem>>, vector<1x128x512xbf16>
    %376 = vector.shape_cast %375 : vector<1x128x512xbf16> to vector<128x512xbf16>
    %cst_182 = arith.constant dense<0.000000e+00> : vector<8x512xf32>
    %377 = tpu.matmul %374, %376, %cst_182 {dimension_numbers = #tpu.dot_dimension_numbers<[1], [0], [0], [1], [0, 0, 1, 1], [], []>} : vector<8x128xbf16>, vector<128x512xbf16>, vector<8x512xf32> -> vector<8x512xf32>
    %378 = arith.addf %372, %377 : vector<8x512xf32>
    %379 = vector.extract_strided_slice %378 {offsets = [0, 0], sizes = [8, 128], strides = [1, 1]} : vector<8x512xf32> to vector<8x128xf32>
    %380 = arith.negf %379 : vector<8x128xf32>
    %381 = math.exp %380 : vector<8x128xf32>
    %cst_183 = arith.constant 1.000000e+00 : f32
    %382 = vector.broadcast %cst_183 : f32 to vector<8x128xf32>
    %383 = arith.addf %382, %381 : vector<8x128xf32>
    %384 = arith.divf %382, %383 : vector<8x128xf32>
    %385 = vector.extract_strided_slice %378 {offsets = [0, 128], sizes = [8, 128], strides = [1, 1]} : vector<8x512xf32> to vector<8x128xf32>
    %386 = arith.negf %385 : vector<8x128xf32>
    %387 = math.exp %386 : vector<8x128xf32>
    %cst_184 = arith.constant 1.000000e+00 : f32
    %388 = vector.broadcast %cst_184 : f32 to vector<8x128xf32>
    %389 = arith.addf %388, %387 : vector<8x128xf32>
    %390 = arith.divf %388, %389 : vector<8x128xf32>
    %391 = vector.extract_strided_slice %378 {offsets = [0, 256], sizes = [8, 128], strides = [1, 1]} : vector<8x512xf32> to vector<8x128xf32>
    %392 = math.tanh %391 : vector<8x128xf32>
    %393 = vector.extract_strided_slice %378 {offsets = [0, 384], sizes = [8, 128], strides = [1, 1]} : vector<8x512xf32> to vector<8x128xf32>
    %394 = arith.negf %393 : vector<8x128xf32>
    %395 = math.exp %394 : vector<8x128xf32>
    %cst_185 = arith.constant 1.000000e+00 : f32
    %396 = vector.broadcast %cst_185 : f32 to vector<8x128xf32>
    %397 = arith.addf %396, %395 : vector<8x128xf32>
    %398 = arith.divf %396, %397 : vector<8x128xf32>
    %c0_186 = arith.constant 0 : index
    %c0_187 = arith.constant 0 : index
    %399 = vector.load %arg9[%c0_186, %c0_187] : memref<8x128xf32, #tpu.memory_space<vmem>>, vector<8x128xf32>
    %400 = arith.mulf %390, %399 : vector<8x128xf32>
    %401 = arith.mulf %384, %392 : vector<8x128xf32>
    %402 = arith.addf %400, %401 : vector<8x128xf32>
    %403 = math.tanh %402 : vector<8x128xf32>
    %404 = arith.mulf %398, %403 : vector<8x128xf32>
    %c0_188 = arith.constant 0 : index
    %c0_189 = arith.constant 0 : index
    %405 = vector.load %arg9[%c0_188, %c0_189] : memref<8x128xf32, #tpu.memory_space<vmem>>, vector<8x128xf32>
    tpu.vector_store %arg9[%c0_188, %c0_189], %402 {strides = array<i32>} : memref<8x128xf32, #tpu.memory_space<vmem>>, vector<8x128xf32>,
    %c0_190 = arith.constant 0 : index
    %c0_191 = arith.constant 0 : index
    %406 = vector.load %arg8[%c0_190, %c0_191] : memref<8x128xf32, #tpu.memory_space<vmem>>, vector<8x128xf32>
    tpu.vector_store %arg8[%c0_190, %c0_191], %404 {strides = array<i32>} : memref<8x128xf32, #tpu.memory_space<vmem>>, vector<8x128xf32>,
    %407 = arith.truncf %404 : vector<8x128xf32> to vector<8x128xbf16>
    %408 = arith.index_cast %c4_i32 : i32 to index
    %c0_192 = arith.constant 0 : index
    %c0_193 = arith.constant 0 : index
    %409 = vector.load %arg6[%408, %c0_192, %c0_193] : memref<8x8x128xbf16, #tpu.memory_space<vmem>>, vector<1x8x128xbf16>
    %410 = vector.shape_cast %409 : vector<1x8x128xbf16> to vector<8x128xbf16>
    %411 = vector.shape_cast %407 : vector<8x128xbf16> to vector<1x8x128xbf16>
    tpu.vector_store %arg6[%408, %c0_192, %c0_193], %411 {strides = array<i32>} : memref<8x8x128xbf16, #tpu.memory_space<vmem>>, vector<1x8x128xbf16>,
    %c7_i32_194 = arith.constant 7 : i32
    %412 = arith.subi %c7_i32_194, %c4_i32 : i32
    %c8_i32_195 = arith.constant 8 : i32
    %413 = arith.muli %412, %c8_i32_195 : i32
    %414 = tpu.assume_multiple %413, 8 : i32
    %415 = arith.index_cast %414 : i32 to index
    %c0_196 = arith.constant 0 : index
    %416 = vector.load %arg13[%415, %c0_196] : memref<64x512xf32, #tpu.memory_space<vmem>>, vector<8x512xf32>
    %c0_197 = arith.constant 0 : index
    %c0_198 = arith.constant 0 : index
    %417 = vector.load %arg10[%c0_197, %c0_198] : memref<8x128xf32, #tpu.memory_space<vmem>>, vector<8x128xf32>
    %418 = arith.truncf %417 : vector<8x128xf32> to vector<8x128xbf16>
    %c1_199 = arith.constant 1 : index
    %c0_200 = arith.constant 0 : index
    %c0_201 = arith.constant 0 : index
    %419 = vector.load %arg4[%c1_199, %c0_200, %c0_201] : memref<2x128x512xbf16, #tpu.memory_space<vmem>>, vector<1x128x512xbf16>
    %420 = vector.shape_cast %419 : vector<1x128x512xbf16> to vector<128x512xbf16>
    %cst_202 = arith.constant dense<0.000000e+00> : vector<8x512xf32>
    %421 = tpu.matmul %418, %420, %cst_202 {dimension_numbers = #tpu.dot_dimension_numbers<[1], [0], [0], [1], [0, 0, 1, 1], [], []>} : vector<8x128xbf16>, vector<128x512xbf16>, vector<8x512xf32> -> vector<8x512xf32>
    %422 = arith.addf %416, %421 : vector<8x512xf32>
    %423 = vector.extract_strided_slice %422 {offsets = [0, 0], sizes = [8, 128], strides = [1, 1]} : vector<8x512xf32> to vector<8x128xf32>
    %424 = arith.negf %423 : vector<8x128xf32>
    %425 = math.exp %424 : vector<8x128xf32>
    %cst_203 = arith.constant 1.000000e+00 : f32
    %426 = vector.broadcast %cst_203 : f32 to vector<8x128xf32>
    %427 = arith.addf %426, %425 : vector<8x128xf32>
    %428 = arith.divf %426, %427 : vector<8x128xf32>
    %429 = vector.extract_strided_slice %422 {offsets = [0, 128], sizes = [8, 128], strides = [1, 1]} : vector<8x512xf32> to vector<8x128xf32>
    %430 = arith.negf %429 : vector<8x128xf32>
    %431 = math.exp %430 : vector<8x128xf32>
    %cst_204 = arith.constant 1.000000e+00 : f32
    %432 = vector.broadcast %cst_204 : f32 to vector<8x128xf32>
    %433 = arith.addf %432, %431 : vector<8x128xf32>
    %434 = arith.divf %432, %433 : vector<8x128xf32>
    %435 = vector.extract_strided_slice %422 {offsets = [0, 256], sizes = [8, 128], strides = [1, 1]} : vector<8x512xf32> to vector<8x128xf32>
    %436 = math.tanh %435 : vector<8x128xf32>
    %437 = vector.extract_strided_slice %422 {offsets = [0, 384], sizes = [8, 128], strides = [1, 1]} : vector<8x512xf32> to vector<8x128xf32>
    %438 = arith.negf %437 : vector<8x128xf32>
    %439 = math.exp %438 : vector<8x128xf32>
    %cst_205 = arith.constant 1.000000e+00 : f32
    %440 = vector.broadcast %cst_205 : f32 to vector<8x128xf32>
    %441 = arith.addf %440, %439 : vector<8x128xf32>
    %442 = arith.divf %440, %441 : vector<8x128xf32>
    %c0_206 = arith.constant 0 : index
    %c0_207 = arith.constant 0 : index
    %443 = vector.load %arg11[%c0_206, %c0_207] : memref<8x128xf32, #tpu.memory_space<vmem>>, vector<8x128xf32>
    %444 = arith.mulf %434, %443 : vector<8x128xf32>
    %445 = arith.mulf %428, %436 : vector<8x128xf32>
    %446 = arith.addf %444, %445 : vector<8x128xf32>
    %447 = math.tanh %446 : vector<8x128xf32>
    %448 = arith.mulf %442, %447 : vector<8x128xf32>
    %c0_208 = arith.constant 0 : index
    %c0_209 = arith.constant 0 : index
    %449 = vector.load %arg11[%c0_208, %c0_209] : memref<8x128xf32, #tpu.memory_space<vmem>>, vector<8x128xf32>
    tpu.vector_store %arg11[%c0_208, %c0_209], %446 {strides = array<i32>} : memref<8x128xf32, #tpu.memory_space<vmem>>, vector<8x128xf32>,
    %c0_210 = arith.constant 0 : index
    %c0_211 = arith.constant 0 : index
    %450 = vector.load %arg10[%c0_210, %c0_211] : memref<8x128xf32, #tpu.memory_space<vmem>>, vector<8x128xf32>
    tpu.vector_store %arg10[%c0_210, %c0_211], %448 {strides = array<i32>} : memref<8x128xf32, #tpu.memory_space<vmem>>, vector<8x128xf32>,
    %451 = arith.truncf %448 : vector<8x128xf32> to vector<8x128xbf16>
    %452 = arith.index_cast %412 : i32 to index
    %c0_212 = arith.constant 0 : index
    %c0_213 = arith.constant 0 : index
    %453 = vector.load %arg7[%452, %c0_212, %c0_213] : memref<8x8x128xbf16, #tpu.memory_space<vmem>>, vector<1x8x128xbf16>
    %454 = vector.shape_cast %453 : vector<1x8x128xbf16> to vector<8x128xbf16>
    %455 = vector.shape_cast %451 : vector<8x128xbf16> to vector<1x8x128xbf16>
    tpu.vector_store %arg7[%452, %c0_212, %c0_213], %455 {strides = array<i32>} : memref<8x8x128xbf16, #tpu.memory_space<vmem>>, vector<1x8x128xbf16>,
    %c5_i32 = arith.constant 5 : i32
    %c8_i32_214 = arith.constant 8 : i32
    %456 = arith.muli %c5_i32, %c8_i32_214 : i32
    %457 = tpu.assume_multiple %456, 8 : i32
    %458 = arith.index_cast %457 : i32 to index
    %c0_215 = arith.constant 0 : index
    %459 = vector.load %arg12[%458, %c0_215] : memref<64x512xf32, #tpu.memory_space<vmem>>, vector<8x512xf32>
    %c0_216 = arith.constant 0 : index
    %c0_217 = arith.constant 0 : index
    %460 = vector.load %arg8[%c0_216, %c0_217] : memref<8x128xf32, #tpu.memory_space<vmem>>, vector<8x128xf32>
    %461 = arith.truncf %460 : vector<8x128xf32> to vector<8x128xbf16>
    %c0_218 = arith.constant 0 : index
    %c0_219 = arith.constant 0 : index
    %c0_220 = arith.constant 0 : index
    %462 = vector.load %arg4[%c0_218, %c0_219, %c0_220] : memref<2x128x512xbf16, #tpu.memory_space<vmem>>, vector<1x128x512xbf16>
    %463 = vector.shape_cast %462 : vector<1x128x512xbf16> to vector<128x512xbf16>
    %cst_221 = arith.constant dense<0.000000e+00> : vector<8x512xf32>
    %464 = tpu.matmul %461, %463, %cst_221 {dimension_numbers = #tpu.dot_dimension_numbers<[1], [0], [0], [1], [0, 0, 1, 1], [], []>} : vector<8x128xbf16>, vector<128x512xbf16>, vector<8x512xf32> -> vector<8x512xf32>
    %465 = arith.addf %459, %464 : vector<8x512xf32>
    %466 = vector.extract_strided_slice %465 {offsets = [0, 0], sizes = [8, 128], strides = [1, 1]} : vector<8x512xf32> to vector<8x128xf32>
    %467 = arith.negf %466 : vector<8x128xf32>
    %468 = math.exp %467 : vector<8x128xf32>
    %cst_222 = arith.constant 1.000000e+00 : f32
    %469 = vector.broadcast %cst_222 : f32 to vector<8x128xf32>
    %470 = arith.addf %469, %468 : vector<8x128xf32>
    %471 = arith.divf %469, %470 : vector<8x128xf32>
    %472 = vector.extract_strided_slice %465 {offsets = [0, 128], sizes = [8, 128], strides = [1, 1]} : vector<8x512xf32> to vector<8x128xf32>
    %473 = arith.negf %472 : vector<8x128xf32>
    %474 = math.exp %473 : vector<8x128xf32>
    %cst_223 = arith.constant 1.000000e+00 : f32
    %475 = vector.broadcast %cst_223 : f32 to vector<8x128xf32>
    %476 = arith.addf %475, %474 : vector<8x128xf32>
    %477 = arith.divf %475, %476 : vector<8x128xf32>
    %478 = vector.extract_strided_slice %465 {offsets = [0, 256], sizes = [8, 128], strides = [1, 1]} : vector<8x512xf32> to vector<8x128xf32>
    %479 = math.tanh %478 : vector<8x128xf32>
    %480 = vector.extract_strided_slice %465 {offsets = [0, 384], sizes = [8, 128], strides = [1, 1]} : vector<8x512xf32> to vector<8x128xf32>
    %481 = arith.negf %480 : vector<8x128xf32>
    %482 = math.exp %481 : vector<8x128xf32>
    %cst_224 = arith.constant 1.000000e+00 : f32
    %483 = vector.broadcast %cst_224 : f32 to vector<8x128xf32>
    %484 = arith.addf %483, %482 : vector<8x128xf32>
    %485 = arith.divf %483, %484 : vector<8x128xf32>
    %c0_225 = arith.constant 0 : index
    %c0_226 = arith.constant 0 : index
    %486 = vector.load %arg9[%c0_225, %c0_226] : memref<8x128xf32, #tpu.memory_space<vmem>>, vector<8x128xf32>
    %487 = arith.mulf %477, %486 : vector<8x128xf32>
    %488 = arith.mulf %471, %479 : vector<8x128xf32>
    %489 = arith.addf %487, %488 : vector<8x128xf32>
    %490 = math.tanh %489 : vector<8x128xf32>
    %491 = arith.mulf %485, %490 : vector<8x128xf32>
    %c0_227 = arith.constant 0 : index
    %c0_228 = arith.constant 0 : index
    %492 = vector.load %arg9[%c0_227, %c0_228] : memref<8x128xf32, #tpu.memory_space<vmem>>, vector<8x128xf32>
    tpu.vector_store %arg9[%c0_227, %c0_228], %489 {strides = array<i32>} : memref<8x128xf32, #tpu.memory_space<vmem>>, vector<8x128xf32>,
    %c0_229 = arith.constant 0 : index
    %c0_230 = arith.constant 0 : index
    %493 = vector.load %arg8[%c0_229, %c0_230] : memref<8x128xf32, #tpu.memory_space<vmem>>, vector<8x128xf32>
    tpu.vector_store %arg8[%c0_229, %c0_230], %491 {strides = array<i32>} : memref<8x128xf32, #tpu.memory_space<vmem>>, vector<8x128xf32>,
    %494 = arith.truncf %491 : vector<8x128xf32> to vector<8x128xbf16>
    %495 = arith.index_cast %c5_i32 : i32 to index
    %c0_231 = arith.constant 0 : index
    %c0_232 = arith.constant 0 : index
    %496 = vector.load %arg6[%495, %c0_231, %c0_232] : memref<8x8x128xbf16, #tpu.memory_space<vmem>>, vector<1x8x128xbf16>
    %497 = vector.shape_cast %496 : vector<1x8x128xbf16> to vector<8x128xbf16>
    %498 = vector.shape_cast %494 : vector<8x128xbf16> to vector<1x8x128xbf16>
    tpu.vector_store %arg6[%495, %c0_231, %c0_232], %498 {strides = array<i32>} : memref<8x8x128xbf16, #tpu.memory_space<vmem>>, vector<1x8x128xbf16>,
    %c7_i32_233 = arith.constant 7 : i32
    %499 = arith.subi %c7_i32_233, %c5_i32 : i32
    %c8_i32_234 = arith.constant 8 : i32
    %500 = arith.muli %499, %c8_i32_234 : i32
    %501 = tpu.assume_multiple %500, 8 : i32
    %502 = arith.index_cast %501 : i32 to index
    %c0_235 = arith.constant 0 : index
    %503 = vector.load %arg13[%502, %c0_235] : memref<64x512xf32, #tpu.memory_space<vmem>>, vector<8x512xf32>
    %c0_236 = arith.constant 0 : index
    %c0_237 = arith.constant 0 : index
    %504 = vector.load %arg10[%c0_236, %c0_237] : memref<8x128xf32, #tpu.memory_space<vmem>>, vector<8x128xf32>
    %505 = arith.truncf %504 : vector<8x128xf32> to vector<8x128xbf16>
    %c1_238 = arith.constant 1 : index
    %c0_239 = arith.constant 0 : index
    %c0_240 = arith.constant 0 : index
    %506 = vector.load %arg4[%c1_238, %c0_239, %c0_240] : memref<2x128x512xbf16, #tpu.memory_space<vmem>>, vector<1x128x512xbf16>
    %507 = vector.shape_cast %506 : vector<1x128x512xbf16> to vector<128x512xbf16>
    %cst_241 = arith.constant dense<0.000000e+00> : vector<8x512xf32>
    %508 = tpu.matmul %505, %507, %cst_241 {dimension_numbers = #tpu.dot_dimension_numbers<[1], [0], [0], [1], [0, 0, 1, 1], [], []>} : vector<8x128xbf16>, vector<128x512xbf16>, vector<8x512xf32> -> vector<8x512xf32>
    %509 = arith.addf %503, %508 : vector<8x512xf32>
    %510 = vector.extract_strided_slice %509 {offsets = [0, 0], sizes = [8, 128], strides = [1, 1]} : vector<8x512xf32> to vector<8x128xf32>
    %511 = arith.negf %510 : vector<8x128xf32>
    %512 = math.exp %511 : vector<8x128xf32>
    %cst_242 = arith.constant 1.000000e+00 : f32
    %513 = vector.broadcast %cst_242 : f32 to vector<8x128xf32>
    %514 = arith.addf %513, %512 : vector<8x128xf32>
    %515 = arith.divf %513, %514 : vector<8x128xf32>
    %516 = vector.extract_strided_slice %509 {offsets = [0, 128], sizes = [8, 128], strides = [1, 1]} : vector<8x512xf32> to vector<8x128xf32>
    %517 = arith.negf %516 : vector<8x128xf32>
    %518 = math.exp %517 : vector<8x128xf32>
    %cst_243 = arith.constant 1.000000e+00 : f32
    %519 = vector.broadcast %cst_243 : f32 to vector<8x128xf32>
    %520 = arith.addf %519, %518 : vector<8x128xf32>
    %521 = arith.divf %519, %520 : vector<8x128xf32>
    %522 = vector.extract_strided_slice %509 {offsets = [0, 256], sizes = [8, 128], strides = [1, 1]} : vector<8x512xf32> to vector<8x128xf32>
    %523 = math.tanh %522 : vector<8x128xf32>
    %524 = vector.extract_strided_slice %509 {offsets = [0, 384], sizes = [8, 128], strides = [1, 1]} : vector<8x512xf32> to vector<8x128xf32>
    %525 = arith.negf %524 : vector<8x128xf32>
    %526 = math.exp %525 : vector<8x128xf32>
    %cst_244 = arith.constant 1.000000e+00 : f32
    %527 = vector.broadcast %cst_244 : f32 to vector<8x128xf32>
    %528 = arith.addf %527, %526 : vector<8x128xf32>
    %529 = arith.divf %527, %528 : vector<8x128xf32>
    %c0_245 = arith.constant 0 : index
    %c0_246 = arith.constant 0 : index
    %530 = vector.load %arg11[%c0_245, %c0_246] : memref<8x128xf32, #tpu.memory_space<vmem>>, vector<8x128xf32>
    %531 = arith.mulf %521, %530 : vector<8x128xf32>
    %532 = arith.mulf %515, %523 : vector<8x128xf32>
    %533 = arith.addf %531, %532 : vector<8x128xf32>
    %534 = math.tanh %533 : vector<8x128xf32>
    %535 = arith.mulf %529, %534 : vector<8x128xf32>
    %c0_247 = arith.constant 0 : index
    %c0_248 = arith.constant 0 : index
    %536 = vector.load %arg11[%c0_247, %c0_248] : memref<8x128xf32, #tpu.memory_space<vmem>>, vector<8x128xf32>
    tpu.vector_store %arg11[%c0_247, %c0_248], %533 {strides = array<i32>} : memref<8x128xf32, #tpu.memory_space<vmem>>, vector<8x128xf32>,
    %c0_249 = arith.constant 0 : index
    %c0_250 = arith.constant 0 : index
    %537 = vector.load %arg10[%c0_249, %c0_250] : memref<8x128xf32, #tpu.memory_space<vmem>>, vector<8x128xf32>
    tpu.vector_store %arg10[%c0_249, %c0_250], %535 {strides = array<i32>} : memref<8x128xf32, #tpu.memory_space<vmem>>, vector<8x128xf32>,
    %538 = arith.truncf %535 : vector<8x128xf32> to vector<8x128xbf16>
    %539 = arith.index_cast %499 : i32 to index
    %c0_251 = arith.constant 0 : index
    %c0_252 = arith.constant 0 : index
    %540 = vector.load %arg7[%539, %c0_251, %c0_252] : memref<8x8x128xbf16, #tpu.memory_space<vmem>>, vector<1x8x128xbf16>
    %541 = vector.shape_cast %540 : vector<1x8x128xbf16> to vector<8x128xbf16>
    %542 = vector.shape_cast %538 : vector<8x128xbf16> to vector<1x8x128xbf16>
    tpu.vector_store %arg7[%539, %c0_251, %c0_252], %542 {strides = array<i32>} : memref<8x8x128xbf16, #tpu.memory_space<vmem>>, vector<1x8x128xbf16>,
    %c6_i32 = arith.constant 6 : i32
    %c8_i32_253 = arith.constant 8 : i32
    %543 = arith.muli %c6_i32, %c8_i32_253 : i32
    %544 = tpu.assume_multiple %543, 8 : i32
    %545 = arith.index_cast %544 : i32 to index
    %c0_254 = arith.constant 0 : index
    %546 = vector.load %arg12[%545, %c0_254] : memref<64x512xf32, #tpu.memory_space<vmem>>, vector<8x512xf32>
    %c0_255 = arith.constant 0 : index
    %c0_256 = arith.constant 0 : index
    %547 = vector.load %arg8[%c0_255, %c0_256] : memref<8x128xf32, #tpu.memory_space<vmem>>, vector<8x128xf32>
    %548 = arith.truncf %547 : vector<8x128xf32> to vector<8x128xbf16>
    %c0_257 = arith.constant 0 : index
    %c0_258 = arith.constant 0 : index
    %c0_259 = arith.constant 0 : index
    %549 = vector.load %arg4[%c0_257, %c0_258, %c0_259] : memref<2x128x512xbf16, #tpu.memory_space<vmem>>, vector<1x128x512xbf16>
    %550 = vector.shape_cast %549 : vector<1x128x512xbf16> to vector<128x512xbf16>
    %cst_260 = arith.constant dense<0.000000e+00> : vector<8x512xf32>
    %551 = tpu.matmul %548, %550, %cst_260 {dimension_numbers = #tpu.dot_dimension_numbers<[1], [0], [0], [1], [0, 0, 1, 1], [], []>} : vector<8x128xbf16>, vector<128x512xbf16>, vector<8x512xf32> -> vector<8x512xf32>
    %552 = arith.addf %546, %551 : vector<8x512xf32>
    %553 = vector.extract_strided_slice %552 {offsets = [0, 0], sizes = [8, 128], strides = [1, 1]} : vector<8x512xf32> to vector<8x128xf32>
    %554 = arith.negf %553 : vector<8x128xf32>
    %555 = math.exp %554 : vector<8x128xf32>
    %cst_261 = arith.constant 1.000000e+00 : f32
    %556 = vector.broadcast %cst_261 : f32 to vector<8x128xf32>
    %557 = arith.addf %556, %555 : vector<8x128xf32>
    %558 = arith.divf %556, %557 : vector<8x128xf32>
    %559 = vector.extract_strided_slice %552 {offsets = [0, 128], sizes = [8, 128], strides = [1, 1]} : vector<8x512xf32> to vector<8x128xf32>
    %560 = arith.negf %559 : vector<8x128xf32>
    %561 = math.exp %560 : vector<8x128xf32>
    %cst_262 = arith.constant 1.000000e+00 : f32
    %562 = vector.broadcast %cst_262 : f32 to vector<8x128xf32>
    %563 = arith.addf %562, %561 : vector<8x128xf32>
    %564 = arith.divf %562, %563 : vector<8x128xf32>
    %565 = vector.extract_strided_slice %552 {offsets = [0, 256], sizes = [8, 128], strides = [1, 1]} : vector<8x512xf32> to vector<8x128xf32>
    %566 = math.tanh %565 : vector<8x128xf32>
    %567 = vector.extract_strided_slice %552 {offsets = [0, 384], sizes = [8, 128], strides = [1, 1]} : vector<8x512xf32> to vector<8x128xf32>
    %568 = arith.negf %567 : vector<8x128xf32>
    %569 = math.exp %568 : vector<8x128xf32>
    %cst_263 = arith.constant 1.000000e+00 : f32
    %570 = vector.broadcast %cst_263 : f32 to vector<8x128xf32>
    %571 = arith.addf %570, %569 : vector<8x128xf32>
    %572 = arith.divf %570, %571 : vector<8x128xf32>
    %c0_264 = arith.constant 0 : index
    %c0_265 = arith.constant 0 : index
    %573 = vector.load %arg9[%c0_264, %c0_265] : memref<8x128xf32, #tpu.memory_space<vmem>>, vector<8x128xf32>
    %574 = arith.mulf %564, %573 : vector<8x128xf32>
    %575 = arith.mulf %558, %566 : vector<8x128xf32>
    %576 = arith.addf %574, %575 : vector<8x128xf32>
    %577 = math.tanh %576 : vector<8x128xf32>
    %578 = arith.mulf %572, %577 : vector<8x128xf32>
    %c0_266 = arith.constant 0 : index
    %c0_267 = arith.constant 0 : index
    %579 = vector.load %arg9[%c0_266, %c0_267] : memref<8x128xf32, #tpu.memory_space<vmem>>, vector<8x128xf32>
    tpu.vector_store %arg9[%c0_266, %c0_267], %576 {strides = array<i32>} : memref<8x128xf32, #tpu.memory_space<vmem>>, vector<8x128xf32>,
    %c0_268 = arith.constant 0 : index
    %c0_269 = arith.constant 0 : index
    %580 = vector.load %arg8[%c0_268, %c0_269] : memref<8x128xf32, #tpu.memory_space<vmem>>, vector<8x128xf32>
    tpu.vector_store %arg8[%c0_268, %c0_269], %578 {strides = array<i32>} : memref<8x128xf32, #tpu.memory_space<vmem>>, vector<8x128xf32>,
    %581 = arith.truncf %578 : vector<8x128xf32> to vector<8x128xbf16>
    %582 = arith.index_cast %c6_i32 : i32 to index
    %c0_270 = arith.constant 0 : index
    %c0_271 = arith.constant 0 : index
    %583 = vector.load %arg6[%582, %c0_270, %c0_271] : memref<8x8x128xbf16, #tpu.memory_space<vmem>>, vector<1x8x128xbf16>
    %584 = vector.shape_cast %583 : vector<1x8x128xbf16> to vector<8x128xbf16>
    %585 = vector.shape_cast %581 : vector<8x128xbf16> to vector<1x8x128xbf16>
    tpu.vector_store %arg6[%582, %c0_270, %c0_271], %585 {strides = array<i32>} : memref<8x8x128xbf16, #tpu.memory_space<vmem>>, vector<1x8x128xbf16>,
    %c7_i32_272 = arith.constant 7 : i32
    %586 = arith.subi %c7_i32_272, %c6_i32 : i32
    %c8_i32_273 = arith.constant 8 : i32
    %587 = arith.muli %586, %c8_i32_273 : i32
    %588 = tpu.assume_multiple %587, 8 : i32
    %589 = arith.index_cast %588 : i32 to index
    %c0_274 = arith.constant 0 : index
    %590 = vector.load %arg13[%589, %c0_274] : memref<64x512xf32, #tpu.memory_space<vmem>>, vector<8x512xf32>
    %c0_275 = arith.constant 0 : index
    %c0_276 = arith.constant 0 : index
    %591 = vector.load %arg10[%c0_275, %c0_276] : memref<8x128xf32, #tpu.memory_space<vmem>>, vector<8x128xf32>
    %592 = arith.truncf %591 : vector<8x128xf32> to vector<8x128xbf16>
    %c1_277 = arith.constant 1 : index
    %c0_278 = arith.constant 0 : index
    %c0_279 = arith.constant 0 : index
    %593 = vector.load %arg4[%c1_277, %c0_278, %c0_279] : memref<2x128x512xbf16, #tpu.memory_space<vmem>>, vector<1x128x512xbf16>
    %594 = vector.shape_cast %593 : vector<1x128x512xbf16> to vector<128x512xbf16>
    %cst_280 = arith.constant dense<0.000000e+00> : vector<8x512xf32>
    %595 = tpu.matmul %592, %594, %cst_280 {dimension_numbers = #tpu.dot_dimension_numbers<[1], [0], [0], [1], [0, 0, 1, 1], [], []>} : vector<8x128xbf16>, vector<128x512xbf16>, vector<8x512xf32> -> vector<8x512xf32>
    %596 = arith.addf %590, %595 : vector<8x512xf32>
    %597 = vector.extract_strided_slice %596 {offsets = [0, 0], sizes = [8, 128], strides = [1, 1]} : vector<8x512xf32> to vector<8x128xf32>
    %598 = arith.negf %597 : vector<8x128xf32>
    %599 = math.exp %598 : vector<8x128xf32>
    %cst_281 = arith.constant 1.000000e+00 : f32
    %600 = vector.broadcast %cst_281 : f32 to vector<8x128xf32>
    %601 = arith.addf %600, %599 : vector<8x128xf32>
    %602 = arith.divf %600, %601 : vector<8x128xf32>
    %603 = vector.extract_strided_slice %596 {offsets = [0, 128], sizes = [8, 128], strides = [1, 1]} : vector<8x512xf32> to vector<8x128xf32>
    %604 = arith.negf %603 : vector<8x128xf32>
    %605 = math.exp %604 : vector<8x128xf32>
    %cst_282 = arith.constant 1.000000e+00 : f32
    %606 = vector.broadcast %cst_282 : f32 to vector<8x128xf32>
    %607 = arith.addf %606, %605 : vector<8x128xf32>
    %608 = arith.divf %606, %607 : vector<8x128xf32>
    %609 = vector.extract_strided_slice %596 {offsets = [0, 256], sizes = [8, 128], strides = [1, 1]} : vector<8x512xf32> to vector<8x128xf32>
    %610 = math.tanh %609 : vector<8x128xf32>
    %611 = vector.extract_strided_slice %596 {offsets = [0, 384], sizes = [8, 128], strides = [1, 1]} : vector<8x512xf32> to vector<8x128xf32>
    %612 = arith.negf %611 : vector<8x128xf32>
    %613 = math.exp %612 : vector<8x128xf32>
    %cst_283 = arith.constant 1.000000e+00 : f32
    %614 = vector.broadcast %cst_283 : f32 to vector<8x128xf32>
    %615 = arith.addf %614, %613 : vector<8x128xf32>
    %616 = arith.divf %614, %615 : vector<8x128xf32>
    %c0_284 = arith.constant 0 : index
    %c0_285 = arith.constant 0 : index
    %617 = vector.load %arg11[%c0_284, %c0_285] : memref<8x128xf32, #tpu.memory_space<vmem>>, vector<8x128xf32>
    %618 = arith.mulf %608, %617 : vector<8x128xf32>
    %619 = arith.mulf %602, %610 : vector<8x128xf32>
    %620 = arith.addf %618, %619 : vector<8x128xf32>
    %621 = math.tanh %620 : vector<8x128xf32>
    %622 = arith.mulf %616, %621 : vector<8x128xf32>
    %c0_286 = arith.constant 0 : index
    %c0_287 = arith.constant 0 : index
    %623 = vector.load %arg11[%c0_286, %c0_287] : memref<8x128xf32, #tpu.memory_space<vmem>>, vector<8x128xf32>
    tpu.vector_store %arg11[%c0_286, %c0_287], %620 {strides = array<i32>} : memref<8x128xf32, #tpu.memory_space<vmem>>, vector<8x128xf32>,
    %c0_288 = arith.constant 0 : index
    %c0_289 = arith.constant 0 : index
    %624 = vector.load %arg10[%c0_288, %c0_289] : memref<8x128xf32, #tpu.memory_space<vmem>>, vector<8x128xf32>
    tpu.vector_store %arg10[%c0_288, %c0_289], %622 {strides = array<i32>} : memref<8x128xf32, #tpu.memory_space<vmem>>, vector<8x128xf32>,
    %625 = arith.truncf %622 : vector<8x128xf32> to vector<8x128xbf16>
    %626 = arith.index_cast %586 : i32 to index
    %c0_290 = arith.constant 0 : index
    %c0_291 = arith.constant 0 : index
    %627 = vector.load %arg7[%626, %c0_290, %c0_291] : memref<8x8x128xbf16, #tpu.memory_space<vmem>>, vector<1x8x128xbf16>
    %628 = vector.shape_cast %627 : vector<1x8x128xbf16> to vector<8x128xbf16>
    %629 = vector.shape_cast %625 : vector<8x128xbf16> to vector<1x8x128xbf16>
    tpu.vector_store %arg7[%626, %c0_290, %c0_291], %629 {strides = array<i32>} : memref<8x8x128xbf16, #tpu.memory_space<vmem>>, vector<1x8x128xbf16>,
    %c7_i32_292 = arith.constant 7 : i32
    %c8_i32_293 = arith.constant 8 : i32
    %630 = arith.muli %c7_i32_292, %c8_i32_293 : i32
    %631 = tpu.assume_multiple %630, 8 : i32
    %632 = arith.index_cast %631 : i32 to index
    %c0_294 = arith.constant 0 : index
    %633 = vector.load %arg12[%632, %c0_294] : memref<64x512xf32, #tpu.memory_space<vmem>>, vector<8x512xf32>
    %c0_295 = arith.constant 0 : index
    %c0_296 = arith.constant 0 : index
    %634 = vector.load %arg8[%c0_295, %c0_296] : memref<8x128xf32, #tpu.memory_space<vmem>>, vector<8x128xf32>
    %635 = arith.truncf %634 : vector<8x128xf32> to vector<8x128xbf16>
    %c0_297 = arith.constant 0 : index
    %c0_298 = arith.constant 0 : index
    %c0_299 = arith.constant 0 : index
    %636 = vector.load %arg4[%c0_297, %c0_298, %c0_299] : memref<2x128x512xbf16, #tpu.memory_space<vmem>>, vector<1x128x512xbf16>
    %637 = vector.shape_cast %636 : vector<1x128x512xbf16> to vector<128x512xbf16>
    %cst_300 = arith.constant dense<0.000000e+00> : vector<8x512xf32>
    %638 = tpu.matmul %635, %637, %cst_300 {dimension_numbers = #tpu.dot_dimension_numbers<[1], [0], [0], [1], [0, 0, 1, 1], [], []>} : vector<8x128xbf16>, vector<128x512xbf16>, vector<8x512xf32> -> vector<8x512xf32>
    %639 = arith.addf %633, %638 : vector<8x512xf32>
    %640 = vector.extract_strided_slice %639 {offsets = [0, 0], sizes = [8, 128], strides = [1, 1]} : vector<8x512xf32> to vector<8x128xf32>
    %641 = arith.negf %640 : vector<8x128xf32>
    %642 = math.exp %641 : vector<8x128xf32>
    %cst_301 = arith.constant 1.000000e+00 : f32
    %643 = vector.broadcast %cst_301 : f32 to vector<8x128xf32>
    %644 = arith.addf %643, %642 : vector<8x128xf32>
    %645 = arith.divf %643, %644 : vector<8x128xf32>
    %646 = vector.extract_strided_slice %639 {offsets = [0, 128], sizes = [8, 128], strides = [1, 1]} : vector<8x512xf32> to vector<8x128xf32>
    %647 = arith.negf %646 : vector<8x128xf32>
    %648 = math.exp %647 : vector<8x128xf32>
    %cst_302 = arith.constant 1.000000e+00 : f32
    %649 = vector.broadcast %cst_302 : f32 to vector<8x128xf32>
    %650 = arith.addf %649, %648 : vector<8x128xf32>
    %651 = arith.divf %649, %650 : vector<8x128xf32>
    %652 = vector.extract_strided_slice %639 {offsets = [0, 256], sizes = [8, 128], strides = [1, 1]} : vector<8x512xf32> to vector<8x128xf32>
    %653 = math.tanh %652 : vector<8x128xf32>
    %654 = vector.extract_strided_slice %639 {offsets = [0, 384], sizes = [8, 128], strides = [1, 1]} : vector<8x512xf32> to vector<8x128xf32>
    %655 = arith.negf %654 : vector<8x128xf32>
    %656 = math.exp %655 : vector<8x128xf32>
    %cst_303 = arith.constant 1.000000e+00 : f32
    %657 = vector.broadcast %cst_303 : f32 to vector<8x128xf32>
    %658 = arith.addf %657, %656 : vector<8x128xf32>
    %659 = arith.divf %657, %658 : vector<8x128xf32>
    %c0_304 = arith.constant 0 : index
    %c0_305 = arith.constant 0 : index
    %660 = vector.load %arg9[%c0_304, %c0_305] : memref<8x128xf32, #tpu.memory_space<vmem>>, vector<8x128xf32>
    %661 = arith.mulf %651, %660 : vector<8x128xf32>
    %662 = arith.mulf %645, %653 : vector<8x128xf32>
    %663 = arith.addf %661, %662 : vector<8x128xf32>
    %664 = math.tanh %663 : vector<8x128xf32>
    %665 = arith.mulf %659, %664 : vector<8x128xf32>
    %c0_306 = arith.constant 0 : index
    %c0_307 = arith.constant 0 : index
    %666 = vector.load %arg9[%c0_306, %c0_307] : memref<8x128xf32, #tpu.memory_space<vmem>>, vector<8x128xf32>
    tpu.vector_store %arg9[%c0_306, %c0_307], %663 {strides = array<i32>} : memref<8x128xf32, #tpu.memory_space<vmem>>, vector<8x128xf32>,
    %c0_308 = arith.constant 0 : index
    %c0_309 = arith.constant 0 : index
    %667 = vector.load %arg8[%c0_308, %c0_309] : memref<8x128xf32, #tpu.memory_space<vmem>>, vector<8x128xf32>
    tpu.vector_store %arg8[%c0_308, %c0_309], %665 {strides = array<i32>} : memref<8x128xf32, #tpu.memory_space<vmem>>, vector<8x128xf32>,
    %668 = arith.truncf %665 : vector<8x128xf32> to vector<8x128xbf16>
    %669 = arith.index_cast %c7_i32_292 : i32 to index
    %c0_310 = arith.constant 0 : index
    %c0_311 = arith.constant 0 : index
    %670 = vector.load %arg6[%669, %c0_310, %c0_311] : memref<8x8x128xbf16, #tpu.memory_space<vmem>>, vector<1x8x128xbf16>
    %671 = vector.shape_cast %670 : vector<1x8x128xbf16> to vector<8x128xbf16>
    %672 = vector.shape_cast %668 : vector<8x128xbf16> to vector<1x8x128xbf16>
    tpu.vector_store %arg6[%669, %c0_310, %c0_311], %672 {strides = array<i32>} : memref<8x8x128xbf16, #tpu.memory_space<vmem>>, vector<1x8x128xbf16>,
    %c7_i32_312 = arith.constant 7 : i32
    %673 = arith.subi %c7_i32_312, %c7_i32_292 : i32
    %c8_i32_313 = arith.constant 8 : i32
    %674 = arith.muli %673, %c8_i32_313 : i32
    %675 = tpu.assume_multiple %674, 8 : i32
    %676 = arith.index_cast %675 : i32 to index
    %c0_314 = arith.constant 0 : index
    %677 = vector.load %arg13[%676, %c0_314] : memref<64x512xf32, #tpu.memory_space<vmem>>, vector<8x512xf32>
    %c0_315 = arith.constant 0 : index
    %c0_316 = arith.constant 0 : index
    %678 = vector.load %arg10[%c0_315, %c0_316] : memref<8x128xf32, #tpu.memory_space<vmem>>, vector<8x128xf32>
    %679 = arith.truncf %678 : vector<8x128xf32> to vector<8x128xbf16>
    %c1_317 = arith.constant 1 : index
    %c0_318 = arith.constant 0 : index
    %c0_319 = arith.constant 0 : index
    %680 = vector.load %arg4[%c1_317, %c0_318, %c0_319] : memref<2x128x512xbf16, #tpu.memory_space<vmem>>, vector<1x128x512xbf16>
    %681 = vector.shape_cast %680 : vector<1x128x512xbf16> to vector<128x512xbf16>
    %cst_320 = arith.constant dense<0.000000e+00> : vector<8x512xf32>
    %682 = tpu.matmul %679, %681, %cst_320 {dimension_numbers = #tpu.dot_dimension_numbers<[1], [0], [0], [1], [0, 0, 1, 1], [], []>} : vector<8x128xbf16>, vector<128x512xbf16>, vector<8x512xf32> -> vector<8x512xf32>
    %683 = arith.addf %677, %682 : vector<8x512xf32>
    %684 = vector.extract_strided_slice %683 {offsets = [0, 0], sizes = [8, 128], strides = [1, 1]} : vector<8x512xf32> to vector<8x128xf32>
    %685 = arith.negf %684 : vector<8x128xf32>
    %686 = math.exp %685 : vector<8x128xf32>
    %cst_321 = arith.constant 1.000000e+00 : f32
    %687 = vector.broadcast %cst_321 : f32 to vector<8x128xf32>
    %688 = arith.addf %687, %686 : vector<8x128xf32>
    %689 = arith.divf %687, %688 : vector<8x128xf32>
    %690 = vector.extract_strided_slice %683 {offsets = [0, 128], sizes = [8, 128], strides = [1, 1]} : vector<8x512xf32> to vector<8x128xf32>
    %691 = arith.negf %690 : vector<8x128xf32>
    %692 = math.exp %691 : vector<8x128xf32>
    %cst_322 = arith.constant 1.000000e+00 : f32
    %693 = vector.broadcast %cst_322 : f32 to vector<8x128xf32>
    %694 = arith.addf %693, %692 : vector<8x128xf32>
    %695 = arith.divf %693, %694 : vector<8x128xf32>
    %696 = vector.extract_strided_slice %683 {offsets = [0, 256], sizes = [8, 128], strides = [1, 1]} : vector<8x512xf32> to vector<8x128xf32>
    %697 = math.tanh %696 : vector<8x128xf32>
    %698 = vector.extract_strided_slice %683 {offsets = [0, 384], sizes = [8, 128], strides = [1, 1]} : vector<8x512xf32> to vector<8x128xf32>
    %699 = arith.negf %698 : vector<8x128xf32>
    %700 = math.exp %699 : vector<8x128xf32>
    %cst_323 = arith.constant 1.000000e+00 : f32
    %701 = vector.broadcast %cst_323 : f32 to vector<8x128xf32>
    %702 = arith.addf %701, %700 : vector<8x128xf32>
    %703 = arith.divf %701, %702 : vector<8x128xf32>
    %c0_324 = arith.constant 0 : index
    %c0_325 = arith.constant 0 : index
    %704 = vector.load %arg11[%c0_324, %c0_325] : memref<8x128xf32, #tpu.memory_space<vmem>>, vector<8x128xf32>
    %705 = arith.mulf %695, %704 : vector<8x128xf32>
    %706 = arith.mulf %689, %697 : vector<8x128xf32>
    %707 = arith.addf %705, %706 : vector<8x128xf32>
    %708 = math.tanh %707 : vector<8x128xf32>
    %709 = arith.mulf %703, %708 : vector<8x128xf32>
    %c0_326 = arith.constant 0 : index
    %c0_327 = arith.constant 0 : index
    %710 = vector.load %arg11[%c0_326, %c0_327] : memref<8x128xf32, #tpu.memory_space<vmem>>, vector<8x128xf32>
    tpu.vector_store %arg11[%c0_326, %c0_327], %707 {strides = array<i32>} : memref<8x128xf32, #tpu.memory_space<vmem>>, vector<8x128xf32>,
    %c0_328 = arith.constant 0 : index
    %c0_329 = arith.constant 0 : index
    %711 = vector.load %arg10[%c0_328, %c0_329] : memref<8x128xf32, #tpu.memory_space<vmem>>, vector<8x128xf32>
    tpu.vector_store %arg10[%c0_328, %c0_329], %709 {strides = array<i32>} : memref<8x128xf32, #tpu.memory_space<vmem>>, vector<8x128xf32>,
    %712 = arith.truncf %709 : vector<8x128xf32> to vector<8x128xbf16>
    %713 = arith.index_cast %673 : i32 to index
    %c0_330 = arith.constant 0 : index
    %c0_331 = arith.constant 0 : index
    %714 = vector.load %arg7[%713, %c0_330, %c0_331] : memref<8x8x128xbf16, #tpu.memory_space<vmem>>, vector<1x8x128xbf16>
    %715 = vector.shape_cast %714 : vector<1x8x128xbf16> to vector<8x128xbf16>
    %716 = vector.shape_cast %712 : vector<8x128xbf16> to vector<1x8x128xbf16>
    tpu.vector_store %arg7[%713, %c0_330, %c0_331], %716 {strides = array<i32>} : memref<8x8x128xbf16, #tpu.memory_space<vmem>>, vector<1x8x128xbf16>,
    %c8_i32_332 = arith.constant 8 : i32
    return
  }
  func.func @transform_0(%arg0: i32) -> (i32, i32) {
    %c0_i32 = arith.constant 0 : i32
    %c0_i32_0 = arith.constant 0 : i32
    return %arg0, %c0_i32 : i32, i32
  }
  func.func @transform_1(%arg0: i32) -> (i32, i32) {
    %c0_i32 = arith.constant 0 : i32
    %0 = arith.subi %c0_i32, %arg0 : i32
    %c0_i32_0 = arith.constant 0 : i32
    %c0_i32_1 = arith.constant 0 : i32
    return %0, %c0_i32_0 : i32, i32
  }
  func.func @transform_2(%arg0: i32) -> (i32, i32, i32) {
    %c0_i32 = arith.constant 0 : i32
    %c0_i32_0 = arith.constant 0 : i32
    %c0_i32_1 = arith.constant 0 : i32
    %c0_i32_2 = arith.constant 0 : i32
    return %c0_i32, %c0_i32_0, %c0_i32_1 : i32, i32, i32
  }
  func.func @transform_3(%arg0: i32) -> (i32, i32, i32) {
    %c0_i32 = arith.constant 0 : i32
    %c0_i32_0 = arith.constant 0 : i32
    %c0_i32_1 = arith.constant 0 : i32
    %c0_i32_2 = arith.constant 0 : i32
    return %c0_i32, %c0_i32_0, %c0_i32_1 : i32, i32, i32
  }
  func.func @transform_4(%arg0: i32) -> (i32, i32, i32) {
    %c0_i32 = arith.constant 0 : i32
    %c0_i32_0 = arith.constant 0 : i32
    %c0_i32_1 = arith.constant 0 : i32
    %c0_i32_2 = arith.constant 0 : i32
    return %c0_i32, %c0_i32_0, %c0_i32_1 : i32, i32, i32
  }
  func.func @transform_5(%arg0: i32) -> (i32, i32, i32) {
    %c0_i32 = arith.constant 0 : i32
    %c0_i32_0 = arith.constant 0 : i32
    %c0_i32_1 = arith.constant 0 : i32
    return %arg0, %c0_i32, %c0_i32_0 : i32, i32, i32
  }
  func.func @transform_6(%arg0: i32) -> (i32, i32, i32) {
    %c0_i32 = arith.constant 0 : i32
    %0 = arith.subi %c0_i32, %arg0 : i32
    %c0_i32_0 = arith.constant 0 : i32
    %c0_i32_1 = arith.constant 0 : i32
    %c0_i32_2 = arith.constant 0 : i32
    return %0, %c0_i32_0, %c0_i32_1 : i32, i32, i32
  }
}

</mosaic_0001>

<bundles_post_ra>
// kernel: bidirectional_lstm_forward.3
= control target key start
LH: loop header
LB: loop body
LE: loop exit
PB: predicated region body
PF: predicated region fallthrough
CT: control target
= control target key end

     0   :  { %s659_s0 = inlined_call_operand.vmem [shape: bf16[64,128], index: 0, kind: input, shape index: {}]   ;;  %s660_s1 = inlined_call_operand.vmem [shape: bf16[64,128], index: 1, kind: input, shape index: {}]   ;;  %s661_s2 = inlined_call_operand.vmem [shape: bf16[128,128], index: 2, kind: input, shape index: {}]   ;;  %s662_s3 = inlined_call_operand.vmem [shape: bf16[128,128], index: 3, kind: input, shape index: {}]   ;;  %s663_s4 = inlined_call_operand.vmem [shape: f32[1,128], index: 4, kind: input, shape index: {}]   ;;  %s664_s5 = inlined_call_operand.hbm [shape: f32[64,128], index: 5, kind: output, shape index: {}]  }
   0x1   :  { %v491_v0 = vld [vmem:[%s662_s3] sm:$0xff]   ;;  %v493_v2 = vld [vmem:[%s662_s3 + $0x8] sm:$0xff]   ;;  %v495_v4 = vld [vmem:[%s662_s3 + $0x10] sm:$0xff]  }
   0x2   :  { %v492_v1 = vld [vmem:[%s661_s2] sm:$0xff]   ;;  %432 = vmatprep.subr.bf16.mxu1 %v491_v0  ;;  %v494_v3 = vld [vmem:[%s661_s2 + $0x8] sm:$0xff]   ;;  %v496_v5 = vld [vmem:[%s661_s2 + $0x10] sm:$0xff]  }
   0x3   :  { %456 = vmatprep.subr.bf16.mxu0 %v492_v1  ;;  %433 = vmatpush3.bf16.msra.mxu1 %v491_v0  ;;  %v497_v6 = vld [vmem:[%s662_s3 + $0x18] sm:$0xff]   ;;  %v499_v8 = vld [vmem:[%s662_s3 + $0x20] sm:$0xff]   ;;  %v501_v10 = vld [vmem:[%s662_s3 + $0x28] sm:$0xff]  }
   0x4   :  { %457 = vmatpush3.bf16.msra.mxu0 %v492_v1  ;;  %434 = vmatprep.subr.bf16.mxu1 %v493_v2  ;;  %v498_v7 = vld [vmem:[%s661_s2 + $0x18] sm:$0xff]   ;;  %v500_v9 = vld [vmem:[%s661_s2 + $0x20] sm:$0xff]   ;;  %v502_v11 = vld [vmem:[%s661_s2 + $0x28] sm:$0xff]  }
   0x5   :  { %458 = vmatprep.subr.bf16.mxu0 %v494_v3  ;;  %v507_v12 = vld [vmem:[%s660_s1] sm:$0xff]   ;;  %v503_v14 = vld [vmem:[%s662_s3 + $0x30] sm:$0xff]   ;;  %v505_v16 = vld [vmem:[%s662_s3 + $0x38] sm:$0xff]  }
   0x6   :  { %v508_v13 = vld [vmem:[%s659_s0] sm:$0xff]   ;;  %448 = vmatprep.mubr.bf16.mxu1 %v507_v12  ;;  %v504_v15 = vld [vmem:[%s661_s2 + $0x30] sm:$0xff]  }
   0x7   :  { %435 = vmatpush3.bf16.msra.mxu1 %v493_v2  ;;  %472 = vmatprep.mubr.bf16.mxu0 %v508_v13 }
   0x8   :  { %459 = vmatpush3.bf16.msra.mxu0 %v494_v3  ;;  %436 = vmatprep.subr.bf16.mxu1 %v495_v4 }
   0x9   :  { %460 = vmatprep.subr.bf16.mxu0 %v496_v5 }
   0xb   :  { %437 = vmatpush3.bf16.msra.mxu1 %v495_v4 }
   0xc   :  { %461 = vmatpush3.bf16.msra.mxu0 %v496_v5  ;;  %438 = vmatprep.subr.bf16.mxu1 %v497_v6 }
   0xd   :  { %462 = vmatprep.subr.bf16.mxu0 %v498_v7 }
   0xf   :  { %439 = vmatpush3.bf16.msra.mxu1 %v497_v6 }
  0x10   :  { %463 = vmatpush3.bf16.msra.mxu0 %v498_v7  ;;  %440 = vmatprep.subr.bf16.mxu1 %v499_v8 }
  0x11   :  { %464 = vmatprep.subr.bf16.mxu0 %v500_v9 }
  0x13   :  { %441 = vmatpush3.bf16.msra.mxu1 %v499_v8 }
  0x14   :  { %465 = vmatpush3.bf16.msra.mxu0 %v500_v9  ;;  %442 = vmatprep.subr.bf16.mxu1 %v501_v10 }
  0x15   :  { %466 = vmatprep.subr.bf16.mxu0 %v502_v11 }
  0x17   :  { %443 = vmatpush3.bf16.msra.mxu1 %v501_v10 }
  0x18   :  { %467 = vmatpush3.bf16.msra.mxu0 %v502_v11  ;;  %444 = vmatprep.subr.bf16.mxu1 %v503_v14 }
  0x19   :  { %10 = vsyncpa [#allocation3], 0  ;;  %468 = vmatprep.subr.bf16.mxu0 %v504_v15  ;;  %v506_v17 = vld [vmem:[%s661_s2 + $0x38] sm:$0xff]   ;;  %v509_v18 = vld [vmem:[%s660_s1 + $0x8] sm:$0xff]  }
  0x1a   :  { %v510_v19 = vld [vmem:[%s659_s0 + $0x8] sm:$0xff]   ;;  %v511_v20 = vld [vmem:[%s660_s1 + $0x10] sm:$0xff]   ;;  %v513_v22 = vld [vmem:[%s660_s1 + $0x18] sm:$0xff]  }
  0x1b   :  { %445 = vmatpush3.bf16.msra.mxu1 %v503_v14  ;;  %v512_v21 = vld [vmem:[%s659_s0 + $0x10] sm:$0xff]   ;;  %v514_v23 = vld [vmem:[%s659_s0 + $0x18] sm:$0xff]   ;;  %v407_v26 = vld [vmem:[%s663_s4] ss:$0 sm:$0xff]  ;;  %s539_s0 = smov [#allocation2]  }
  0x1c   :  { %469 = vmatpush3.bf16.msra.mxu0 %v504_v15  ;;  %446 = vmatprep.subr.bf16.mxu1 %v505_v16  ;;  %s372_s1 = sshll.u32 %s539_s0, 4  ;;  %s373_s1 = int_to_ptr.vmem [resolvable:$true] %s372_s1 }
  0x1d   :  { %470 = vmatprep.subr.bf16.mxu0 %v506_v17  ;;  %s515_s4 = scalar_lea.vmem %s373_s1, 1024  ;;  %p520_p1 = scmp.lt.s32.totalorder %s373_s1, %s373_s1 }
  0x1e   :  { %p516_p0 = scmp.ne.s32.totalorder %s373_s1, %s515_s4  ;;  %p521_p2 = scmp.lt.s32.totalorder %s515_s4, %s515_s4 }
  0x1f   :  { %447 = vmatpush3.bf16.msra.mxu1 %v505_v16 }
  0x20   :  { %471 = vmatpush3.bf16.msra.mxu0 %v506_v17  ;;  %p522_p3 = por %p521_p2, %p520_p1 }
  0x22   :  { %449 = vmatmul.mubr.bf16.vlgmr.msra.gmra.mrb[0].mxu1 %v509_v18  ;;  %p523_p4 = pnand %p522_p3, %p516_p0 }
  0x23   :  { %473 = vmatmul.mubr.bf16.vlgmr.msra.gmra.mrb[0].mxu0 %v510_v19  ;;  %452 = vmatprep.mubr.bf16.mxu1 %v511_v20 }
  0x24   :  { %476 = vmatprep.mubr.bf16.mxu0 %v512_v21 }
  0x2a   :  { %453 = vmatmul.mubr.bf16.gmra.mrb[4].mxu1 %v513_v22 }
  0x2b   :  { %477 = vmatmul.mubr.bf16.gmra.mrb[4].mxu0 %v514_v23 }
  0xf5   :  { %v450_v24 = vpop.f32.mrb[0].mxu1 }
  0xf6   :  { %v474_v25 = vpop.f32.mrb[0].mxu0  ;;  %v176_v27 = vpop.f32.mrb[1].mxu1 }
  0xf7   :  { %v322_v28 = vadd.f32 %v474_v25, %v450_v24  ;;  %v313_v29 = vpop.f32.mrb[1].mxu0  ;;  %v451_v30 = vpop.f32.mrb[2].mxu1 }
  0xf8   :  { %v314_v31 = vadd.f32 %v313_v29, %v176_v27  ;;  %v475_v32 = vpop.f32.mrb[2].mxu0  ;;  %v179_v33 = vpop.f32.mrb[3].mxu1 }
  0xf9   :  { %v353_v34 = vadd.f32 %v407_v26, %v322_v28  ;;  %v325_v35 = vadd.f32 %v475_v32, %v451_v30  ;;  %v316_v36 = vpop.f32.mrb[3].mxu0 }
  0xfa   :  { %v351_v37 = vadd.f32 %v407_v26, %v314_v31  ;;  %v317_v38 = vadd.f32 %v316_v36, %v179_v33 }
  0xfb   :  { %361 = vst [vmem:[#allocation2 + $0x10] sm:$0xff] %v353_v34  ;;  %v354_v39 = vadd.f32 %v407_v26, %v325_v35 }
  0xfc   :  { %359 = vst [vmem:[#allocation2] sm:$0xff] %v351_v37  ;;  %v352_v40 = vadd.f32 %v407_v26, %v317_v38 }
  0xfd   :  { %362 = vst [vmem:[#allocation2 + $0x18] sm:$0xff] %v354_v39  ;;  %v454_v41 = vpop.f32.mrb[4].mxu1 }
  0xfe   :  { %360 = vst [vmem:[#allocation2 + $0x8] sm:$0xff] %v352_v40  ;;  %v478_v42 = vpop.f32.mrb[4].mxu0  ;;  %v192_v43 = vpop.f32.mrb[5].mxu1 }
  0xff   :  { %v338_v44 = vadd.f32 %v478_v42, %v454_v41  ;;  %v329_v45 = vpop.f32.mrb[5].mxu0  ;;  %v455_v46 = vpop.f32.mrb[6].mxu1 }
 0x100   :  { %v330_v47 = vadd.f32 %v329_v45, %v192_v43  ;;  %v479_v48 = vpop.f32.mrb[6].mxu0  ;;  %v195_v49 = vpop.f32.mrb[7].mxu1 }
 0x101   :  { %v357_v50 = vadd.f32 %v407_v26, %v338_v44  ;;  %v341_v51 = vadd.f32 %v479_v48, %v455_v46  ;;  %v332_v52 = vpop.f32.mrb[7].mxu0 }
 0x102   :  { %v355_v53 = vadd.f32 %v407_v26, %v330_v47  ;;  %v333_v54 = vadd.f32 %v332_v52, %v195_v49 }
 0x103   :  { %365 = vst [vmem:[#allocation2 + $0x30] sm:$0xff] %v357_v50  ;;  %v358_v55 = vadd.f32 %v407_v26, %v341_v51 }
 0x104   :  { %363 = vst [vmem:[#allocation2 + $0x20] sm:$0xff] %v355_v53  ;;  %v356_v56 = vadd.f32 %v407_v26, %v333_v54 }
 0x105   :  { %366 = vst [vmem:[#allocation2 + $0x38] sm:$0xff] %v358_v55 }
 0x106   :  { %364 = vst [vmem:[#allocation2 + $0x28] sm:$0xff] %v356_v56 }
 0x107   :  { %526 = shalt.err (!%p523_p4)
}
 0x108   :  { %s527_s18 = scalar_lea.hbm %s664_s5, 1024 }
 0x109   :  { %p528_p5 = scmp.ne.s32.totalorder %s664_s5, %s527_s18  ;;  %p531_p6 = scmp.lt.u32.totalorder %s527_s18, %s664_s5 }
 0x10b   :  { %p533_p7 = pnand %p531_p6, %p528_p5 }
 0x10d   :  { %536 = shalt.err (!%p533_p7)
}
 0x10e   :  { %s540_s23 = smov 128   ;;  %s541_s24 = smov 8  }
 0x10f   :  { %378 = dma.vmem_to_hbm [thread:$0]  %s373_s1, 1024, %s664_s5, [#allocation3], %s540_s23, %s540_s23, %s541_s24  }
 0x110   :  { %537 = dma.done.wait [#allocation3], 1024  }
 0x111   :  { %538 = vsyncadd [#allocation3], 4294966272 }
 0x112   :  { %382 = vsyncpa [#allocation3], 1 }

// kernel: bidirectional_lstm_forward.2
= control target key start
LH: loop header
LB: loop body
LE: loop exit
PB: predicated region body
PF: predicated region fallthrough
CT: control target
= control target key end

     0   :  { %12 = vsyncpa [#allocation9], 0  ;;  %s8699_s0 = inlined_call_operand.vmem [shape: bf16[64,32], index: 0, kind: input, shape index: {}, may-alias: {0,1}]   ;;  %s8700_s1 = inlined_call_operand.vmem [shape: bf16[64,32], index: 1, kind: input, shape index: {}, may-alias: {0,1}]   ;;  %s8701_s2 = inlined_call_operand.hbm [shape: bf16[2,32,512], index: 2, kind: input, shape index: {}]   ;;  %s8702_s3 = inlined_call_operand.hbm [shape: bf16[2,128,512], index: 3, kind: input, shape index: {}]   ;;  %s8703_s4 = inlined_call_operand.vmem [shape: f32[2,1,512], index: 4, kind: input, shape index: {}]   ;;  %s8704_s5 = inlined_call_operand.vmem [shape: bf16[8,8,128], index: 5, kind: output, shape index: {0}]   ;;  %s8705_s6 = inlined_call_operand.vmem [shape: bf16[8,8,128], index: 6, kind: output, shape index: {1}]  }
   0x1   :  { %13 = vsyncpa [#allocation11], 0  ;;  %s7130_s21 = smov [#allocation8]   ;;  %s7082_s25 = scalar_lea.hbm %s8701_s2, 2048 }
   0x2   :  { %s31_s22 = sshll.u32 %s7130_s21, 4  ;;  %p7083_p0 = scmp.ne.s32.totalorder %s8701_s2, %s7082_s25  ;;  %s32_s22 = int_to_ptr.vmem [resolvable:$true] %s31_s22 }
   0x3   :  { %p7086_p1 = scmp.lt.u32.totalorder %s7082_s25, %s8701_s2 }
   0x5   :  { %p7088_p2 = pnand %p7086_p1, %p7083_p0 }
   0x7   :  { %7091 = shalt.err (!%p7088_p2)
}
   0x8   :  { %s7092_s30 = scalar_lea.vmem %s32_s22, 2048  ;;  %p7097_p4 = scmp.lt.s32.totalorder %s32_s22, %s32_s22 }
   0x9   :  { %p7093_p3 = scmp.ne.s32.totalorder %s32_s22, %s7092_s30  ;;  %p7098_p5 = scmp.lt.s32.totalorder %s7092_s30, %s7092_s30 }
   0xb   :  { %p7099_p6 = por %p7098_p5, %p7097_p4 }
   0xd   :  { %p7100_p7 = pnand %p7099_p6, %p7093_p3 }
   0xf   :  { %7103 = shalt.err (!%p7100_p7)
}
  0x10   :  { %s7131_s7 = smov 256   ;;  %s7132_s8 = smov 16  }
  0x11   :  { %37 = dma.hbm_to_vmem [thread:$0]  %s8701_s2, 2048, %s32_s22, [#allocation9], %s7131_s7, %s7131_s7, %s7132_s8  }
  0x12   :  { %s7133_s11 = smov [#allocation10]   ;;  %s7104_s15 = scalar_lea.hbm %s8702_s3, 8192 }
  0x13   :  { %s43_s12 = sshll.u32 %s7133_s11, 4  ;;  %p7105_p8 = scmp.ne.s32.totalorder %s8702_s3, %s7104_s15  ;;  %s44_s12 = int_to_ptr.vmem [resolvable:$true] %s43_s12 }
  0x14   :  { %p7108_p9 = scmp.lt.u32.totalorder %s7104_s15, %s8702_s3 }
  0x16   :  { %p7110_p10 = pnand %p7108_p9, %p7105_p8 }
  0x18   :  { %7113 = shalt.err (!%p7110_p10)
}
  0x19   :  { %s7114_s20 = scalar_lea.vmem %s44_s12, 8192  ;;  %p7119_p12 = scmp.lt.s32.totalorder %s44_s12, %s44_s12 }
  0x1a   :  { %p7115_p11 = scmp.ne.s32.totalorder %s44_s12, %s7114_s20  ;;  %p7120_p13 = scmp.lt.s32.totalorder %s7114_s20, %s7114_s20 }
  0x1c   :  { %p7121_p0 = por %p7120_p13, %p7119_p12 }
  0x1e   :  { %p7122_p1 = pnand %p7121_p0, %p7115_p11 }
  0x20   :  { %7125 = shalt.err (!%p7122_p1)
}
  0x21   :  { %49 = dma.hbm_to_vmem [thread:$0]  %s8702_s3, 8192, %s44_s12, [#allocation11], %s7131_s7, %s7131_s7, %s7132_s8  }
  0x22   :  { %7126 = dma.done.wait [#allocation9], 2048  }
  0x23   :  { %7127 = vsyncadd [#allocation9], 4294965248 }
  0x24   :  { %7128 = dma.done.wait [#allocation11], 8192  }
  0x25   :  { %7129 = vsyncadd [#allocation11], 4294959104  ;;  %v8706_v0 = vmov 0   ;;  %v6410_v1 = vld [vmem:[#allocation8 + $0x4] ss:$16 sps:$4 sm:$0xff]   ;;  %vm193_vm0 = vcmask 261120  }
  0x26   :  { %238 = vmatprep.mubr.bf16.mxu0 %v8706_v0  ;;  %311 = vmatprep.mubr.bf16.mxu1 %v8706_v0  ;;  %v6412_v2 = vld [vmem:[#allocation8 + $0xc] ss:$16 sps:$4 sm:$0xff]   ;;  %v6414_v3 = vld [vmem:[#allocation8] ss:$16 sps:$4 sm:$0xff]   ;;  %v6415_v4 = vld [vmem:[#allocation8 + $0x8] ss:$16 sps:$4 sm:$0xff]  }
  0x27   :  { %206 = vmatprep.subr.bf16.mxu0 %v6410_v1  ;;  %279 = vmatprep.subr.bf16.mxu1 %v6412_v2  ;;  %v6416_v5 = vld [vmem:[#allocation8 + $0x24] ss:$16 sps:$4 sm:$0xff]   ;;  %v6418_v6 = vld [vmem:[#allocation8 + $0x2c] ss:$16 sps:$4 sm:$0xff]   ;;  %v6420_v7 = vld [vmem:[#allocation8 + $0x20] ss:$16 sps:$4 sm:$0xff]  }
  0x28   :  { %207 = vmatpush1.bf16.msra.mxu0 %v6414_v3  ;;  %280 = vmatpush1.bf16.msra.mxu1 %v6415_v4  ;;  %v6421_v8 = vld [vmem:[#allocation8 + $0x28] ss:$16 sps:$4 sm:$0xff]   ;;  %v6422_v9 = vld [vmem:[%s8699_s0] sm:$0xff]   ;;  %v6429_v12 = vld [vmem:[#allocation8 + $0x4c] ss:$16 sps:$4 sm:$0xff]   ;;  %v7135_v2 = vmov 0.0|0.0  }
  0x29   :  { %208 = vmatprep.subr.bf16.mxu0 %v6416_v5  ;;  %281 = vmatprep.subr.bf16.mxu1 %v6418_v6  ;;  %v6425_v10 = vld [vmem:[#allocation8 + $0x44] ss:$16 sps:$4 sm:$0xff]   ;;  %v6423_v11 = vld [vmem:[#allocation8 + $0x40] ss:$16 sps:$4 sm:$0xff]   ;;  %v6427_v13 = vld [vmem:[#allocation8 + $0x48] ss:$16 sps:$4 sm:$0xff]  }
  0x2a   :  { %v6431_v14 = vld [vmem:[#allocation8 + $0x60] ss:$16 sps:$4 sm:$0xff]   ;;  %v6433_v15 = vld [vmem:[#allocation8 + $0x64] ss:$16 sps:$4 sm:$0xff]   ;;  %v6435_v16 = vld [vmem:[#allocation8 + $0x68] ss:$16 sps:$4 sm:$0xff]  }
  0x2b   :  { %v6437_v17 = vld [vmem:[#allocation8 + $0x6c] ss:$16 sps:$4 sm:$0xff]   ;;  %v7207_v19 = vld [vmem:[#allocation10 + $0x4] ss:$16 sps:$4 sm:$0xff]   ;;  %v7231_v23 = vld [vmem:[#allocation10] ss:$16 sps:$4 sm:$0xff]  }
  0x2c   :  { %209 = vmatpush1.bf16.msra.mxu0 %v6420_v7  ;;  %282 = vmatpush1.bf16.msra.mxu1 %v6421_v8  ;;  %v6426_v18 = vld [vmem:[%s8699_s0 + $0x8] sm:$0xff]   ;;  %v6430_v21 = vld [vmem:[%s8699_s0 + $0x10] sm:$0xff]   ;;  %v6434_v22 = vld [vmem:[%s8699_s0 + $0x18] sm:$0xff]  }
  0x2d   :  { %496 = vmatprep.subr.bf16.mxu0 %v6425_v10  ;;  %569 = vmatprep.subr.bf16.mxu1 %v6429_v12  ;;  %v7210_v20 = vld [vmem:[#allocation10 + $0xc] ss:$16 sps:$4 sm:$0xff]   ;;  %v7233_v24 = vld [vmem:[#allocation10 + $0x8] ss:$16 sps:$4 sm:$0xff]   ;;  %v6444_v25 = vld [vmem:[%s8700_s1] sm:$0xff]  }
  0x2e   :  { %v7238_v26 = vld [vmem:[#allocation10 + $0x24] ss:$16 sps:$4 sm:$0xff]   ;;  %v7240_v27 = vld [vmem:[#allocation10 + $0x2c] ss:$16 sps:$4 sm:$0xff]   ;;  %v7244_v28 = vld [vmem:[#allocation10 + $0x20] ss:$16 sps:$4 sm:$0xff]  }
  0x2f   :  { %5801 = vmatmul.mubr.msk.bf16.vlgmr.msra.gmra.mrb[0].mxu0 %vm193_vm0, %v6422_v9  ;;  %5805 = vmatmul.mubr.msk.bf16.vlgmr.msra.gmra.mrb[0].mxu1 %vm193_vm0, %v6422_v9  ;;  %v7246_v29 = vld [vmem:[#allocation10 + $0x28] ss:$16 sps:$4 sm:$0xff]   ;;  %v7250_v30 = vld [vmem:[#allocation10 + $0x44] ss:$16 sps:$4 sm:$0xff]   ;;  %v7254_v31 = vld [vmem:[#allocation10 + $0x4c] ss:$16 sps:$4 sm:$0xff]  }
  0x30   :  { %497 = vmatpush1.bf16.msra.mxu0 %v6423_v11  ;;  %248 = vmatprep.mubr.bf16.mxu0 %v8706_v0  ;;  %v7258_v32 = vld [vmem:[#allocation10 + $0x40] ss:$16 sps:$4 sm:$0xff]   ;;  %v7260_v33 = vld [vmem:[#allocation10 + $0x48] ss:$16 sps:$4 sm:$0xff]   ;;  %v7267_v35 = vld [vmem:[#allocation10 + $0x64] ss:$16 sps:$4 sm:$0xff]  }
  0x31   :  { %321 = vmatprep.mubr.bf16.mxu1 %v8706_v0  ;;  %498 = vmatprep.subr.bf16.mxu0 %v6433_v15  ;;  %v6457_v34 = vld [vmem:[%s8700_s1 + $0x8] sm:$0xff]   ;;  %v7275_v37 = vld [vmem:[#allocation10 + $0x60] ss:$16 sps:$4 sm:$0xff]   ;;  %v7281_v39 = vld [vmem:[#allocation10 + $0x84] ss:$16 sps:$4 sm:$0xff]  }
  0x32   :  { %570 = vmatpush1.bf16.msra.mxu1 %v6427_v13  ;;  %v7271_v36 = vld [vmem:[#allocation10 + $0x6c] ss:$16 sps:$4 sm:$0xff]   ;;  %v7277_v38 = vld [vmem:[#allocation10 + $0x68] ss:$16 sps:$4 sm:$0xff]   ;;  %v7289_v41 = vld [vmem:[#allocation10 + $0x80] ss:$16 sps:$4 sm:$0xff]  }
  0x33   :  { %571 = vmatprep.subr.bf16.mxu1 %v6437_v17  ;;  %v7285_v40 = vld [vmem:[#allocation10 + $0x8c] ss:$16 sps:$4 sm:$0xff]   ;;  %v7291_v42 = vld [vmem:[#allocation10 + $0x88] ss:$16 sps:$4 sm:$0xff]   ;;  %v6470_v43 = vld [vmem:[%s8700_s1 + $0x10] sm:$0xff]  }
  0x34   :  { %499 = vmatpush1.bf16.msra.mxu0 %v6431_v14  ;;  %v7298_v44 = vld [vmem:[#allocation10 + $0xa4] ss:$16 sps:$4 sm:$0xff]   ;;  %v7302_v45 = vld [vmem:[#allocation10 + $0xac] ss:$16 sps:$4 sm:$0xff]   ;;  %v7306_v46 = vld [vmem:[#allocation10 + $0xa0] ss:$16 sps:$4 sm:$0xff]  }
  0x35   :  { %875 = vmatprep.subr.bf16.mxu0 %v7207_v19  ;;  %v7308_v47 = vld [vmem:[#allocation10 + $0xa8] ss:$16 sps:$4 sm:$0xff]   ;;  %v7312_v48 = vld [vmem:[#allocation10 + $0xc4] ss:$16 sps:$4 sm:$0xff]   ;;  %v7316_v49 = vld [vmem:[#allocation10 + $0xcc] ss:$16 sps:$4 sm:$0xff]  }
  0x36   :  { %572 = vmatpush1.bf16.msra.mxu1 %v6435_v16  ;;  %v6483_v50 = vld [vmem:[%s8700_s1 + $0x18] sm:$0xff]   ;;  %v7323_v51 = vld [vmem:[#allocation10 + $0xc0] ss:$16 sps:$4 sm:$0xff]   ;;  %v7327_v53 = vld [vmem:[#allocation10 + $0xe4] ss:$16 sps:$4 sm:$0xff]  }
  0x37   :  { %5802 = vmatmul.mubr.msk.bf16.gmra.mrb[4].mxu0 %vm193_vm0, %v6426_v18  ;;  %5806 = vmatmul.mubr.msk.bf16.gmra.mrb[4].mxu1 %vm193_vm0, %v6426_v18  ;;  %v7325_v52 = vld [vmem:[#allocation10 + $0xc8] ss:$16 sps:$4 sm:$0xff]   ;;  %v7329_v54 = vld [vmem:[#allocation10 + $0xec] ss:$16 sps:$4 sm:$0xff]   ;;  %v7335_v55 = vld [vmem:[#allocation10 + $0xe0] ss:$16 sps:$4 sm:$0xff]  }
  0x38   :  { %258 = vmatprep.mubr.bf16.mxu0 %v8706_v0  ;;  %331 = vmatprep.mubr.bf16.mxu1 %v8706_v0  ;;  %v7337_v56 = vld [vmem:[#allocation10 + $0xe8] ss:$16 sps:$4 sm:$0xff]   ;;  %v7341_v57 = vld [vmem:[#allocation10 + $0x104] ss:$16 sps:$4 sm:$0xff]   ;;  %v7343_v58 = vld [vmem:[#allocation10 + $0x10c] ss:$16 sps:$4 sm:$0xff]  }
  0x39   :  { %916 = vmatprep.subr.bf16.mxu1 %v7210_v20  ;;  %v7351_v59 = vld [vmem:[#allocation10 + $0x100] ss:$16 sps:$4 sm:$0xff]   ;;  %v7353_v60 = vld [vmem:[#allocation10 + $0x108] ss:$16 sps:$4 sm:$0xff]   ;;  %v7355_v61 = vld [vmem:[#allocation10 + $0x124] ss:$16 sps:$4 sm:$0xff]  }
  0x3a   :  { %v7357_v62 = vld [vmem:[#allocation10 + $0x12c] ss:$16 sps:$4 sm:$0xff]   ;;  %v7363_v63 = vld [vmem:[#allocation10 + $0x120] ss:$16 sps:$4 sm:$0xff]   ;;  %v7365_v1 = vld [vmem:[#allocation10 + $0x128] ss:$16 sps:$4 sm:$0xff]  }
  0x3b   :  { %v7367_v3 = vld [vmem:[#allocation10 + $0x144] ss:$16 sps:$4 sm:$0xff]   ;;  %v7369_v4 = vld [vmem:[#allocation10 + $0x14c] ss:$16 sps:$4 sm:$0xff]   ;;  %v7375_v5 = vld [vmem:[#allocation10 + $0x140] ss:$16 sps:$4 sm:$0xff]  }
  0x3c   :  { %v7377_v6 = vld [vmem:[#allocation10 + $0x148] ss:$16 sps:$4 sm:$0xff]   ;;  %v7381_v7 = vld [vmem:[#allocation10 + $0x164] ss:$16 sps:$4 sm:$0xff]   ;;  %v7383_v8 = vld [vmem:[#allocation10 + $0x16c] ss:$16 sps:$4 sm:$0xff]  }
  0x3d   :  { %v7389_v9 = vld [vmem:[#allocation10 + $0x160] ss:$16 sps:$4 sm:$0xff]   ;;  %v7391_v10 = vld [vmem:[#allocation10 + $0x168] ss:$16 sps:$4 sm:$0xff]   ;;  %v7393_v11 = vld [vmem:[#allocation10 + $0x184] ss:$16 sps:$4 sm:$0xff]  }
  0x3e   :  { %v7395_v12 = vld [vmem:[#allocation10 + $0x18c] ss:$16 sps:$4 sm:$0xff]   ;;  %v7401_v13 = vld [vmem:[#allocation10 + $0x180] ss:$16 sps:$4 sm:$0xff]   ;;  %v7403_v14 = vld [vmem:[#allocation10 + $0x188] ss:$16 sps:$4 sm:$0xff]  }
  0x3f   :  { %5803 = vmatmul.mubr.msk.bf16.gmra.mrb[8].mxu0 %vm193_vm0, %v6430_v21  ;;  %5807 = vmatmul.mubr.msk.bf16.gmra.mrb[8].mxu1 %vm193_vm0, %v6430_v21  ;;  %v7405_v15 = vld [vmem:[#allocation10 + $0x1a4] ss:$16 sps:$4 sm:$0xff]   ;;  %v7407_v16 = vld [vmem:[#allocation10 + $0x1ac] ss:$16 sps:$4 sm:$0xff]   ;;  %v7413_v17 = vld [vmem:[#allocation10 + $0x1a0] ss:$16 sps:$4 sm:$0xff]  }
  0x40   :  { %268 = vmatprep.mubr.bf16.mxu0 %v8706_v0  ;;  %341 = vmatprep.mubr.bf16.mxu1 %v8706_v0  ;;  %8735 = vst [vmem:[#allocation14_spill] sm:$0xff] %v7405_v15  ;;  %v7415_v18 = vld [vmem:[#allocation10 + $0x1a8] ss:$16 sps:$4 sm:$0xff]   ;;  %v7417_v21 = vld [vmem:[#allocation10 + $0x1c4] ss:$16 sps:$4 sm:$0xff]  }
  0x47   :  { %5804 = vmatmul.mubr.msk.bf16.gmra.mrb[12].mxu0 %vm193_vm0, %v6434_v22  ;;  %5808 = vmatmul.mubr.msk.bf16.gmra.mrb[12].mxu1 %vm193_vm0, %v6434_v22  ;;  %v7419_v22 = vld [vmem:[#allocation10 + $0x1cc] ss:$16 sps:$4 sm:$0xff]  }
  0x48   :  { %528 = vmatprep.mubr.bf16.mxu0 %v8706_v0  ;;  %601 = vmatprep.mubr.bf16.mxu1 %v8706_v0 }
  0x4f   :  { %5822 = vmatmul.mubr.msk.bf16.vlgmr.msra.gmra.mrb[16].mxu0 %vm193_vm0, %v6444_v25  ;;  %5826 = vmatmul.mubr.msk.bf16.vlgmr.msra.gmra.mrb[16].mxu1 %vm193_vm0, %v6444_v25  ;;  %v7425_v25 = vld [vmem:[#allocation10 + $0x1c0] ss:$16 sps:$4 sm:$0xff]  }
  0x50   :  { %876 = vmatpush1.bf16.msra.mxu0 %v7231_v23  ;;  %917 = vmatpush1.bf16.msra.mxu1 %v7233_v24 }
  0x51   :  { %877 = vmatprep.subr.bf16.mxu0 %v7238_v26  ;;  %918 = vmatprep.subr.bf16.mxu1 %v7240_v27 }
  0x52   :  { %538 = vmatprep.mubr.bf16.mxu0 %v8706_v0  ;;  %611 = vmatprep.mubr.bf16.mxu1 %v8706_v0 }
  0x54   :  { %878 = vmatpush1.bf16.msra.mxu0 %v7244_v28  ;;  %919 = vmatpush1.bf16.msra.mxu1 %v7246_v29 }
  0x55   :  { %879 = vmatprep.subr.bf16.mxu0 %v7250_v30  ;;  %920 = vmatprep.subr.bf16.mxu1 %v7254_v31 }
  0x57   :  { %5823 = vmatmul.mubr.msk.bf16.gmra.mrb[20].mxu0 %vm193_vm0, %v6457_v34  ;;  %5827 = vmatmul.mubr.msk.bf16.gmra.mrb[20].mxu1 %vm193_vm0, %v6457_v34  ;;  %v7427_v34 = vld [vmem:[#allocation10 + $0x1c8] ss:$16 sps:$4 sm:$0xff]  }
  0x58   :  { %880 = vmatpush1.bf16.msra.mxu0 %v7258_v32  ;;  %921 = vmatpush1.bf16.msra.mxu1 %v7260_v33 }
  0x59   :  { %881 = vmatprep.subr.bf16.mxu0 %v7267_v35  ;;  %922 = vmatprep.subr.bf16.mxu1 %v7271_v36 }
  0x5a   :  { %548 = vmatprep.mubr.bf16.mxu0 %v8706_v0  ;;  %621 = vmatprep.mubr.bf16.mxu1 %v8706_v0 }
  0x5c   :  { %882 = vmatpush1.bf16.msra.mxu0 %v7275_v37  ;;  %923 = vmatpush1.bf16.msra.mxu1 %v7277_v38 }
  0x5d   :  { %883 = vmatprep.subr.bf16.mxu0 %v7281_v39  ;;  %924 = vmatprep.subr.bf16.mxu1 %v7285_v40 }
  0x5f   :  { %5824 = vmatmul.mubr.msk.bf16.gmra.mrb[24].mxu0 %vm193_vm0, %v6470_v43  ;;  %5828 = vmatmul.mubr.msk.bf16.gmra.mrb[24].mxu1 %vm193_vm0, %v6470_v43  ;;  %v7429_v43 = vld [vmem:[#allocation10 + $0x1e4] ss:$16 sps:$4 sm:$0xff]  }
  0x60   :  { %884 = vmatpush1.bf16.msra.mxu0 %v7289_v41  ;;  %925 = vmatpush1.bf16.msra.mxu1 %v7291_v42  ;;  %8736 = vst [vmem:[#allocation15_spill] sm:$0xff] %v7429_v43 }
  0x61   :  { %885 = vmatprep.subr.bf16.mxu0 %v7298_v44  ;;  %926 = vmatprep.subr.bf16.mxu1 %v7302_v45 }
  0x62   :  { %558 = vmatprep.mubr.bf16.mxu0 %v8706_v0  ;;  %631 = vmatprep.mubr.bf16.mxu1 %v8706_v0 }
  0x64   :  { %886 = vmatpush1.bf16.msra.mxu0 %v7306_v46  ;;  %927 = vmatpush1.bf16.msra.mxu1 %v7308_v47 }
  0x65   :  { %887 = vmatprep.subr.bf16.mxu0 %v7312_v48  ;;  %928 = vmatprep.subr.bf16.mxu1 %v7316_v49 }
  0x67   :  { %5825 = vmatmul.mubr.msk.bf16.gmra.mrb[28].mxu0 %vm193_vm0, %v6483_v50  ;;  %5829 = vmatmul.mubr.msk.bf16.gmra.mrb[28].mxu1 %vm193_vm0, %v6483_v50  ;;  %v7431_v50 = vld [vmem:[#allocation10 + $0x1ec] ss:$16 sps:$4 sm:$0xff]  }
  0x68   :  { %888 = vmatpush1.bf16.msra.mxu0 %v7323_v51  ;;  %929 = vmatpush1.bf16.msra.mxu1 %v7325_v52 }
  0x69   :  { %889 = vmatprep.subr.bf16.mxu0 %v7327_v53  ;;  %930 = vmatprep.subr.bf16.mxu1 %v7329_v54 }
  0x6a   :  { %907 = vmatprep.mubr.bf16.mxu0 %v8706_v0  ;;  %948 = vmatprep.mubr.bf16.mxu1 %v8706_v0 }
  0x6c   :  { %890 = vmatpush1.bf16.msra.mxu0 %v7335_v55  ;;  %931 = vmatpush1.bf16.msra.mxu1 %v7337_v56 }
  0x6d   :  { %1192 = vmatprep.subr.bf16.mxu0 %v7341_v57  ;;  %1233 = vmatprep.subr.bf16.mxu1 %v7343_v58 }
  0x6f   :  { %908 = vmatmul.mubr.bf16.vlgmr.msra.gmra.mrb[32].mxu0 %v7135_v2  ;;  %949 = vmatmul.mubr.bf16.vlgmr.msra.gmra.mrb[32].mxu1 %v7135_v2 }
  0x70   :  { %1193 = vmatpush1.bf16.msra.mxu0 %v7351_v59  ;;  %1234 = vmatpush1.bf16.msra.mxu1 %v7353_v60 }
  0x71   :  { %1194 = vmatprep.subr.bf16.mxu0 %v7355_v61  ;;  %1235 = vmatprep.subr.bf16.mxu1 %v7357_v62 }
  0x72   :  { %1224 = vmatprep.mubr.bf16.mxu0 %v8706_v0  ;;  %1265 = vmatprep.mubr.bf16.mxu1 %v8706_v0  ;;  %v7437_v0 = vld [vmem:[#allocation10 + $0x1e0] ss:$16 sps:$4 sm:$0xff]  }
  0x74   :  { %1195 = vmatpush1.bf16.msra.mxu0 %v7363_v63  ;;  %1236 = vmatpush1.bf16.msra.mxu1 %v7365_v1 }
  0x75   :  { %1196 = vmatprep.subr.bf16.mxu0 %v7367_v3  ;;  %1237 = vmatprep.subr.bf16.mxu1 %v7369_v4 }
  0x78   :  { %1197 = vmatpush1.bf16.msra.mxu0 %v7375_v5  ;;  %1238 = vmatpush1.bf16.msra.mxu1 %v7377_v6 }
  0x79   :  { %1198 = vmatprep.subr.bf16.mxu0 %v7381_v7  ;;  %1239 = vmatprep.subr.bf16.mxu1 %v7383_v8 }
  0x7c   :  { %1199 = vmatpush1.bf16.msra.mxu0 %v7389_v9  ;;  %1240 = vmatpush1.bf16.msra.mxu1 %v7391_v10 }
  0x7d   :  { %1200 = vmatprep.subr.bf16.mxu0 %v7393_v11  ;;  %1241 = vmatprep.subr.bf16.mxu1 %v7395_v12 }
  0x80   :  { %1201 = vmatpush1.bf16.msra.mxu0 %v7401_v13  ;;  %1242 = vmatpush1.bf16.msra.mxu1 %v7403_v14 }
  0x81   :  { %1202 = vmatprep.subr.bf16.mxu0 %v7405_v15  ;;  %1243 = vmatprep.subr.bf16.mxu1 %v7407_v16  ;;  %v7439_v15 = vld [vmem:[#allocation10 + $0x1e8] ss:$16 sps:$4 sm:$0xff]  }
  0x84   :  { %1203 = vmatpush1.bf16.msra.mxu0 %v7413_v17  ;;  %1244 = vmatpush1.bf16.msra.mxu1 %v7415_v18 }
  0x85   :  { %1204 = vmatprep.subr.bf16.mxu0 %v7417_v21  ;;  %1245 = vmatprep.subr.bf16.mxu1 %v7419_v22 }
  0x88   :  { %1205 = vmatpush1.bf16.msra.mxu0 %v7425_v25  ;;  %1246 = vmatpush1.bf16.msra.mxu1 %v7427_v34 }
  0x89   :  { %1206 = vmatprep.subr.bf16.mxu0 %v7429_v43  ;;  %1247 = vmatprep.subr.bf16.mxu1 %v7431_v50  ;;  %v8737_v43 = vmov 0  }
  0x8c   :  { %1207 = vmatpush1.bf16.msra.mxu0 %v7437_v0  ;;  %1248 = vmatpush1.bf16.msra.mxu1 %v7439_v15 }
  0x8d   :  { %1509 = vmatprep.subr.bf16.mxu0 %v7207_v19  ;;  %1550 = vmatprep.subr.bf16.mxu1 %v7210_v20  ;;  %v113_v19 = vlaneseq }
  0x8f   :  { %1225 = vmatmul.mubr.bf16.vlgmr.msra.gmra.mrb[36].mxu0 %v7135_v2  ;;  %1266 = vmatmul.mubr.bf16.vlgmr.msra.gmra.mrb[36].mxu1 %v7135_v2  ;;  %v7483_v20 = vshrl.u32 %v113_v19, 7 }
  0x90   :  { %1510 = vmatpush1.bf16.msra.mxu0 %v7231_v23  ;;  %1551 = vmatpush1.bf16.msra.mxu1 %v7233_v24 }
  0x91   :  { %1511 = vmatprep.subr.bf16.mxu0 %v7238_v26  ;;  %1552 = vmatprep.subr.bf16.mxu1 %v7240_v27  ;;  %v8712_v23 = vsub.s32 2, %v7483_v20  ;;  %v8710_v24 = vsub.s32 3, %v7483_v20  ;;  %v8713_v26 = vsub.s32 0, %v7483_v20  ;;  %v111_v27 = vld [vmem:[%s8703_s4] sm:$0xf] }
  0x92   :  { %1541 = vmatprep.mubr.bf16.mxu0 %v8737_v43  ;;  %1582 = vmatprep.mubr.bf16.mxu1 %v8737_v43 }
  0x94   :  { %1512 = vmatpush1.bf16.msra.mxu0 %v7244_v28  ;;  %1553 = vmatpush1.bf16.msra.mxu1 %v7246_v29  ;;  %v8711_v28 = vsub.s32 1, %v7483_v20  ;;  %v7494_v29 = vrot.slane %v111_v27, %v8712_v23 }
  0x95   :  { %1513 = vmatprep.subr.bf16.mxu0 %v7250_v30  ;;  %1554 = vmatprep.subr.bf16.mxu1 %v7254_v31 }
  0x98   :  { %1514 = vmatpush1.bf16.msra.mxu0 %v7258_v32  ;;  %1555 = vmatpush1.bf16.msra.mxu1 %v7260_v33  ;;  %v7502_v32 = vrot.slane %v111_v27, %v8710_v24  ;;  %v7506_v33 = vrot.slane %v111_v27, %v8713_v26 }
  0x99   :  { %1515 = vmatprep.subr.bf16.mxu0 %v7267_v35  ;;  %1556 = vmatprep.subr.bf16.mxu1 %v7271_v36 }
  0x9c   :  { %1516 = vmatpush1.bf16.msra.mxu0 %v7275_v37  ;;  %1557 = vmatpush1.bf16.msra.mxu1 %v7277_v38  ;;  %v7514_v37 = vrot.slane %v111_v27, %v8711_v28 }
  0x9d   :  { %1517 = vmatprep.subr.bf16.mxu0 %v7281_v39  ;;  %1558 = vmatprep.subr.bf16.mxu1 %v7285_v40 }
  0xa0   :  { %1518 = vmatpush1.bf16.msra.mxu0 %v7289_v41  ;;  %1559 = vmatpush1.bf16.msra.mxu1 %v7291_v42 }
  0xa1   :  { %1519 = vmatprep.subr.bf16.mxu0 %v7298_v44  ;;  %1560 = vmatprep.subr.bf16.mxu1 %v7302_v45 }
  0xa4   :  { %1520 = vmatpush1.bf16.msra.mxu0 %v7306_v46  ;;  %1561 = vmatpush1.bf16.msra.mxu1 %v7308_v47 }
  0xa5   :  { %1521 = vmatprep.subr.bf16.mxu0 %v7312_v48  ;;  %1562 = vmatprep.subr.bf16.mxu1 %v7316_v49 }
  0xa8   :  { %1522 = vmatpush1.bf16.msra.mxu0 %v7323_v51  ;;  %1563 = vmatpush1.bf16.msra.mxu1 %v7325_v52 }
  0xa9   :  { %1523 = vmatprep.subr.bf16.mxu0 %v7327_v53  ;;  %1564 = vmatprep.subr.bf16.mxu1 %v7329_v54 }
  0xac   :  { %1524 = vmatpush1.bf16.msra.mxu0 %v7335_v55  ;;  %1565 = vmatpush1.bf16.msra.mxu1 %v7337_v56 }
  0xad   :  { %1826 = vmatprep.subr.bf16.mxu0 %v7341_v57  ;;  %1867 = vmatprep.subr.bf16.mxu1 %v7343_v58 }
 0x102   :  { %v7496_v30 = vpop.f32.mrb[0].mxu0  ;;  %v7498_v31 = vpop.f32.mrb[0].mxu1 }
 0x103   :  { %v7508_v35 = vpop.f32.mrb[1].mxu0  ;;  %v7510_v36 = vpop.f32.mrb[1].mxu1 }
 0x104   :  { %v244_v38 = vpop.f32.mrb[2].mxu0  ;;  %v317_v39 = vpop.f32.mrb[2].mxu1 }
 0x105   :  { %v7517_v40 = vadd.f32 %v244_v38, %v7506_v33  ;;  %v246_v41 = vpop.f32.mrb[3].mxu0  ;;  %v7520_v42 = vadd.f32 %v317_v39, %v7494_v29  ;;  %v319_v44 = vpop.f32.mrb[3].mxu1 }
 0x106   :  { %v7523_v45 = vadd.f32 %v246_v41, %v7514_v37  ;;  %v7526_v46 = vadd.f32 %v319_v44, %v7502_v32 }
 0x10a   :  { %v250_v47 = vpop.f32.mrb[4].mxu0  ;;  %v323_v48 = vpop.f32.mrb[4].mxu1 }
 0x10b   :  { %v7529_v49 = vadd.f32 %v250_v47, %v7506_v33  ;;  %v252_v51 = vpop.f32.mrb[5].mxu0  ;;  %v7532_v52 = vadd.f32 %v323_v48, %v7494_v29  ;;  %v325_v53 = vpop.f32.mrb[5].mxu1 }
 0x10c   :  { %v7535_v54 = vadd.f32 %v252_v51, %v7514_v37  ;;  %v254_v55 = vpop.f32.mrb[6].mxu0  ;;  %v7538_v56 = vadd.f32 %v325_v53, %v7502_v32  ;;  %v327_v57 = vpop.f32.mrb[6].mxu1 }
 0x10d   :  { %8738 = vst [vmem:[#allocation16_spill] sm:$0xff] %v7529_v49  ;;  %8739 = vst [vmem:[#allocation17_spill] sm:$0xff] %v7532_v52  ;;  %v7541_v58 = vadd.f32 %v254_v55, %v7506_v33  ;;  %v256_v2 = vpop.f32.mrb[7].mxu0  ;;  %v7544_v19 = vadd.f32 %v327_v57, %v7494_v29  ;;  %v329_v27 = vpop.f32.mrb[7].mxu1 }
 0x10e   :  { %8740 = vst [vmem:[#allocation18_spill] sm:$0xff] %v7535_v54  ;;  %8741 = vst [vmem:[#allocation19_spill] sm:$0xff] %v7538_v56  ;;  %v7547_v38 = vadd.f32 %v256_v2, %v7514_v37  ;;  %v7550_v39 = vadd.f32 %v329_v27, %v7502_v32 }
 0x10f   :  { %8742 = vst [vmem:[#allocation20_spill] sm:$0xff] %v7541_v58  ;;  %8743 = vst [vmem:[#allocation21_spill] sm:$0xff] %v7544_v19 }
 0x110   :  { %8744 = vst [vmem:[#allocation22_spill] sm:$0xff] %v7547_v38  ;;  %8745 = vst [vmem:[#allocation23_spill] sm:$0xff] %v7550_v39 }
 0x112   :  { %v260_v41 = vpop.f32.mrb[8].mxu0  ;;  %v333_v44 = vpop.f32.mrb[8].mxu1 }
 0x113   :  { %v7553_v47 = vadd.f32 %v260_v41, %v7506_v33  ;;  %v262_v48 = vpop.f32.mrb[9].mxu0  ;;  %v7556_v51 = vadd.f32 %v333_v44, %v7494_v29  ;;  %v335_v53 = vpop.f32.mrb[9].mxu1 }
 0x114   :  { %v7559_v55 = vadd.f32 %v262_v48, %v7514_v37  ;;  %v264_v57 = vpop.f32.mrb[10].mxu0  ;;  %v7562_v2 = vadd.f32 %v335_v53, %v7502_v32  ;;  %v337_v24 = vpop.f32.mrb[10].mxu1 }
 0x115   :  { %8746 = vst [vmem:[#allocation24_spill] sm:$0xff] %v7553_v47  ;;  %8747 = vst [vmem:[#allocation25_spill] sm:$0xff] %v7556_v51  ;;  %v7565_v27 = vadd.f32 %v264_v57, %v7506_v33  ;;  %v266_v28 = vpop.f32.mrb[11].mxu0  ;;  %v7568_v41 = vadd.f32 %v337_v24, %v7494_v29  ;;  %v339_v23 = vpop.f32.mrb[11].mxu1 }
 0x116   :  { %8748 = vst [vmem:[#allocation26_spill] sm:$0xff] %v7559_v55  ;;  %8749 = vst [vmem:[#allocation27_spill] sm:$0xff] %v7562_v2  ;;  %v7571_v44 = vadd.f32 %v266_v28, %v7514_v37  ;;  %v7574_v26 = vadd.f32 %v339_v23, %v7502_v32  ;;  %v5809_v28 = vld [vmem:[%s8703_s4 + $0x4] sm:$0xf] }
 0x117   :  { %8750 = vst [vmem:[#allocation28_spill] sm:$0xff] %v7565_v27  ;;  %8751 = vst [vmem:[#allocation29_spill] sm:$0xff] %v7568_v41 }
 0x118   :  { %8752 = vst [vmem:[#allocation30_spill] sm:$0xff] %v7571_v44  ;;  %8753 = vst [vmem:[#allocation31_spill] sm:$0xff] %v7574_v26  ;;  %v8762_v44 = vsub.s32 0, %v7483_v20 }
 0x11a   :  { %v270_v48 = vpop.f32.mrb[12].mxu0  ;;  %v343_v55 = vpop.f32.mrb[12].mxu1  ;;  %v7605_v51 = vrot.slane %v5809_v28, %v8762_v44 }
 0x11b   :  { %v7577_v53 = vadd.f32 %v270_v48, %v7506_v33  ;;  %v272_v2 = vpop.f32.mrb[13].mxu0  ;;  %v7580_v57 = vadd.f32 %v343_v55, %v7494_v29  ;;  %v345_v27 = vpop.f32.mrb[13].mxu1 }
 0x11c   :  { %v7583_v24 = vadd.f32 %v272_v2, %v7514_v37  ;;  %v274_v41 = vpop.f32.mrb[14].mxu0  ;;  %v7589_v23 = vadd.f32 %v345_v27, %v7502_v32  ;;  %v347_v26 = vpop.f32.mrb[14].mxu1  ;;  %v8763_v27 = vsub.s32 2, %v7483_v20 }
 0x11d   :  { %8754 = vst [vmem:[#allocation32_spill] sm:$0xff] %v7577_v53  ;;  %8755 = vst [vmem:[#allocation33_spill] sm:$0xff] %v7580_v57  ;;  %v7592_v48 = vadd.f32 %v274_v41, %v7506_v33  ;;  %v276_v53 = vpop.f32.mrb[15].mxu0  ;;  %v7595_v55 = vadd.f32 %v347_v26, %v7494_v29  ;;  %v349_v57 = vpop.f32.mrb[15].mxu1  ;;  %v8764_v41 = vsub.s32 1, %v7483_v20  ;;  %v8765_v26 = vsub.s32 3, %v7483_v20 }
 0x11e   :  { %8756 = vst [vmem:[#allocation34_spill] sm:$0xff] %v7583_v24  ;;  %8757 = vst [vmem:[#allocation35_spill] sm:$0xff] %v7589_v23  ;;  %v7598_v2 = vadd.f32 %v276_v53, %v7514_v37  ;;  %v7601_v24 = vadd.f32 %v349_v57, %v7502_v32  ;;  %v7609_v23 = vrot.slane %v5809_v28, %v8763_v27 }
 0x11f   :  { %8758 = vst [vmem:[#allocation36_spill] sm:$0xff] %v7592_v48  ;;  %8759 = vst [vmem:[#allocation37_spill] sm:$0xff] %v7595_v55  ;;  %v7613_v48 = vrot.slane %v5809_v28, %v8764_v41  ;;  %v7617_v55 = vrot.slane %v5809_v28, %v8765_v26 }
 0x120   :  { %8760 = vst [vmem:[#allocation38_spill] sm:$0xff] %v7598_v2  ;;  %8761 = vst [vmem:[#allocation39_spill] sm:$0xff] %v7601_v24 }
 0x122   :  { %v530_v53 = vpop.f32.mrb[16].mxu0  ;;  %v603_v2 = vpop.f32.mrb[16].mxu1 }
 0x123   :  { %v7620_v57 = vadd.f32 %v530_v53, %v7605_v51  ;;  %v532_v24 = vpop.f32.mrb[17].mxu0  ;;  %v7623_v44 = vadd.f32 %v603_v2, %v7609_v23  ;;  %v605_v47 = vpop.f32.mrb[17].mxu1 }
 0x124   :  { %v7626_v27 = vadd.f32 %v532_v24, %v7613_v48  ;;  %v534_v39 = vpop.f32.mrb[18].mxu0  ;;  %v7629_v41 = vadd.f32 %v605_v47, %v7617_v55  ;;  %v607_v20 = vpop.f32.mrb[18].mxu1 }
 0x125   :  { %8766 = vst [vmem:[#allocation40_spill] sm:$0xff] %v7620_v57  ;;  %8767 = vst [vmem:[#allocation41_spill] sm:$0xff] %v7623_v44  ;;  %v7632_v28 = vadd.f32 %v534_v39, %v7605_v51  ;;  %v536_v26 = vpop.f32.mrb[19].mxu0  ;;  %v7635_v53 = vadd.f32 %v607_v20, %v7609_v23  ;;  %v609_v57 = vpop.f32.mrb[19].mxu1 }
 0x126   :  { %8768 = vst [vmem:[#allocation42_spill] sm:$0xff] %v7626_v27  ;;  %8769 = vst [vmem:[#allocation43_spill] sm:$0xff] %v7629_v41  ;;  %v7638_v2 = vadd.f32 %v536_v26, %v7613_v48  ;;  %v7641_v44 = vadd.f32 %v609_v57, %v7617_v55 }
 0x127   :  { %8770 = vst [vmem:[#allocation44_spill] sm:$0xff] %v7632_v28  ;;  %8771 = vst [vmem:[#allocation45_spill] sm:$0xff] %v7635_v53 }
 0x128   :  { %8772 = vst [vmem:[#allocation46_spill] sm:$0xff] %v7638_v2  ;;  %8773 = vst [vmem:[#allocation47_spill] sm:$0xff] %v7641_v44 }
 0x12a   :  { %v540_v24 = vpop.f32.mrb[20].mxu0  ;;  %v613_v27 = vpop.f32.mrb[20].mxu1 }
 0x12b   :  { %v7644_v47 = vadd.f32 %v540_v24, %v7605_v51  ;;  %v542_v41 = vpop.f32.mrb[21].mxu0  ;;  %v7647_v39 = vadd.f32 %v613_v27, %v7609_v23  ;;  %v615_v28 = vpop.f32.mrb[21].mxu1 }
 0x12c   :  { %v7650_v20 = vadd.f32 %v542_v41, %v7613_v48  ;;  %v544_v53 = vpop.f32.mrb[22].mxu0  ;;  %v7653_v26 = vadd.f32 %v615_v28, %v7617_v55  ;;  %v617_v2 = vpop.f32.mrb[22].mxu1 }
 0x12d   :  { %8774 = vst [vmem:[#allocation48_spill] sm:$0xff] %v7644_v47  ;;  %8775 = vst [vmem:[#allocation49_spill] sm:$0xff] %v7647_v39  ;;  %v7656_v57 = vadd.f32 %v544_v53, %v7605_v51  ;;  %v546_v44 = vpop.f32.mrb[23].mxu0  ;;  %v7659_v24 = vadd.f32 %v617_v2, %v7609_v23  ;;  %v619_v47 = vpop.f32.mrb[23].mxu1 }
 0x12e   :  { %8776 = vst [vmem:[#allocation50_spill] sm:$0xff] %v7650_v20  ;;  %8777 = vst [vmem:[#allocation51_spill] sm:$0xff] %v7653_v26  ;;  %v7662_v27 = vadd.f32 %v546_v44, %v7613_v48  ;;  %v7665_v39 = vadd.f32 %v619_v47, %v7617_v55 }
 0x12f   :  { %8778 = vst [vmem:[#allocation52_spill] sm:$0xff] %v7656_v57  ;;  %8779 = vst [vmem:[#allocation53_spill] sm:$0xff] %v7659_v24 }
 0x130   :  { %8780 = vst [vmem:[#allocation54_spill] sm:$0xff] %v7662_v27  ;;  %8781 = vst [vmem:[#allocation55_spill] sm:$0xff] %v7665_v39 }
 0x132   :  { %v550_v41 = vpop.f32.mrb[24].mxu0  ;;  %v623_v20 = vpop.f32.mrb[24].mxu1 }
 0x133   :  { %v7668_v28 = vadd.f32 %v550_v41, %v7605_v51  ;;  %v552_v26 = vpop.f32.mrb[25].mxu0  ;;  %v7671_v53 = vadd.f32 %v623_v20, %v7609_v23  ;;  %v625_v57 = vpop.f32.mrb[25].mxu1 }
 0x134   :  { %v7674_v2 = vadd.f32 %v552_v26, %v7613_v48  ;;  %v554_v24 = vpop.f32.mrb[26].mxu0  ;;  %v7677_v44 = vadd.f32 %v625_v57, %v7617_v55  ;;  %v627_v27 = vpop.f32.mrb[26].mxu1 }
 0x135   :  { %8782 = vst [vmem:[#allocation56_spill] sm:$0xff] %v7668_v28  ;;  %8783 = vst [vmem:[#allocation57_spill] sm:$0xff] %v7671_v53  ;;  %v7680_v47 = vadd.f32 %v554_v24, %v7605_v51  ;;  %v556_v39 = vpop.f32.mrb[27].mxu0  ;;  %v7683_v41 = vadd.f32 %v627_v27, %v7609_v23  ;;  %v629_v28 = vpop.f32.mrb[27].mxu1 }
 0x136   :  { %8784 = vst [vmem:[#allocation58_spill] sm:$0xff] %v7674_v2  ;;  %8785 = vst [vmem:[#allocation59_spill] sm:$0xff] %v7677_v44  ;;  %v7686_v20 = vadd.f32 %v556_v39, %v7613_v48  ;;  %v7689_v53 = vadd.f32 %v629_v28, %v7617_v55 }
 0x137   :  { %8786 = vst [vmem:[#allocation60_spill] sm:$0xff] %v7680_v47  ;;  %8787 = vst [vmem:[#allocation61_spill] sm:$0xff] %v7683_v41 }
 0x138   :  { %8788 = vst [vmem:[#allocation62_spill] sm:$0xff] %v7686_v20  ;;  %8789 = vst [vmem:[#allocation63_spill] sm:$0xff] %v7689_v53  ;;  %v241_v20 = vadd.f32 %v7496_v30, %v7506_v33 }
 0x13a   :  { %v560_v26 = vpop.f32.mrb[28].mxu0  ;;  %v633_v2 = vpop.f32.mrb[28].mxu1 }
 0x13b   :  { %v7692_v57 = vadd.f32 %v560_v26, %v7605_v51  ;;  %v562_v44 = vpop.f32.mrb[29].mxu0  ;;  %v7695_v24 = vadd.f32 %v633_v2, %v7609_v23  ;;  %v635_v38 = vpop.f32.mrb[29].mxu1  ;;  %v314_v26 = vadd.f32 %v7498_v31, %v7494_v29  ;;  %v243_v2 = vadd.f32 %v7508_v35, %v7514_v37 }
 0x13c   :  { %v7698_v27 = vadd.f32 %v562_v44, %v7613_v48  ;;  %v564_v19 = vpop.f32.mrb[30].mxu0  ;;  %v7701_v39 = vadd.f32 %v635_v38, %v7617_v55  ;;  %v637_v58 = vpop.f32.mrb[30].mxu1  ;;  %v316_v44 = vadd.f32 %v7510_v36, %v7502_v32 }
 0x13d   :  { %8790 = vst [vmem:[#allocation64_spill] sm:$0xff] %v7692_v57  ;;  %8791 = vst [vmem:[#allocation65_spill] sm:$0xff] %v7695_v24  ;;  %v566_v28 = vpop.f32.mrb[31].mxu0  ;;  %v639_v53 = vpop.f32.mrb[31].mxu1 }
 0x13e   :  { %8792 = vst [vmem:[#allocation66_spill] sm:$0xff] %v7698_v27  ;;  %8793 = vst [vmem:[#allocation67_spill] sm:$0xff] %v7701_v39 }
 0x142   :  { %v909_v41 = vpop.f32.mrb[32].mxu0  ;;  %v950_v47 = vpop.f32.mrb[32].mxu1 }
 0x143   :  { %v957_v56 = vadd.f32 %v909_v41, %v241_v20  ;;  %v959_v38 = vadd.f32 %v950_v47, %v314_v26  ;;  %v911_v54 = vpop.f32.mrb[33].mxu0  ;;  %v952_v52 = vpop.f32.mrb[33].mxu1 }
 0x144   :  { %v958_v49 = vadd.f32 %v911_v54, %v243_v2  ;;  %v960_v39 = vadd.f32 %v952_v52, %v316_v44  ;;  %v913_v27 = vpop.f32.mrb[34].mxu0  ;;  %v954_v24 = vpop.f32.mrb[34].mxu1 }
 0x145   :  { %v5862_v30 = vmul.f32 -1.442695, %v957_v56  ;;  %v914_v33 = vpop.f32.mrb[35].mxu0  ;;  %v955_v57 = vpop.f32.mrb[35].mxu1  ;;  %v567_v27 = vadd.f32 %v566_v28, %v7613_v48 }
 0x146   :  { %v5863_v29 = vmul.f32 -1.442695, %v958_v49  ;;  %v5864_v31 = vmul.f32 -1.442695, %v960_v39  ;;  %v565_v49 = vadd.f32 %v564_v19, %v7605_v51  ;;  %v638_v57 = vadd.f32 %v637_v58, %v7609_v23 }
 0x147   :  { %6826 = vpow2.f32 %v5862_v30  ;;  %v640_v39 = vadd.f32 %v639_v53, %v7617_v55 }
 0x148   :  { %6828 = vpow2.f32 %v5863_v29 }
 0x149   :  { %6830 = vpow2.f32 %v5864_v31 }
 0x14a   :  { %6832 = vtanh.f32 %v959_v38 }
 0x151   :  { %v6827_v35 = vpop.eup %6826 }
 0x152   :  { %v6829_v37 = vpop.eup %6828  ;;  %v964_v32 = vadd.f32 1.0, %v6827_v35 }
 0x153   :  { %v970_v36 = vadd.f32 1.0, %v6829_v37  ;;  %v6831_v47 = vpop.eup %6830 }
 0x154   :  { %6834 = vrcp.f32 %v964_v32  ;;  %v6833_v54 = vpop.eup %6832  ;;  %v977_v56 = vadd.f32 1.0, %v6831_v47 }
 0x155   :  { %6836 = vrcp.f32 %v970_v36 }
 0x156   :  { %6838 = vrcp.f32 %v977_v56 }
 0x15e   :  { %v6835_v52 = vpop.eup %6834 }
 0x15f   :  { %v6837_v41 = vpop.eup %6836  ;;  %v982_v20 = vmul.f32 %v6835_v52, %v6833_v54 }
 0x160   :  { %v981_v24 = vmul.f32 0.0, %v6837_v41  ;;  %v6839_v55 = vpop.eup %6838 }
 0x162   :  { %v7715_v26 = vadd.f32 %v982_v20, %v981_v24  ;;  %v1226_v2 = vpop.f32.mrb[36].mxu0  ;;  %v1267_v44 = vpop.f32.mrb[36].mxu1  ;;  %v7809_v24 = vld [vmem:[#allocation10 + $0x84] ss:$16 sps:$4 sm:$0xff]  }
 0x163   :  { %v1274_v38 = vadd.f32 %v1226_v2, %v565_v49  ;;  %v1276_v30 = vadd.f32 %v1267_v44, %v638_v57  ;;  %v1228_v33 = vpop.f32.mrb[37].mxu0  ;;  %v1269_v29 = vpop.f32.mrb[37].mxu1  ;;  %v7811_v49 = vld [vmem:[#allocation10 + $0x8c] ss:$16 sps:$4 sm:$0xff]   ;;  %v7813_v57 = vld [vmem:[#allocation10 + $0x80] ss:$16 sps:$4 sm:$0xff]  }
 0x164   :  { %6840 = vtanh.f32 %v7715_v26  ;;  %v1275_v31 = vadd.f32 %v1228_v33, %v567_v27  ;;  %v1277_v35 = vadd.f32 %v1269_v29, %v640_v39  ;;  %v1230_v19 = vpop.f32.mrb[38].mxu0  ;;  %v1271_v51 = vpop.f32.mrb[38].mxu1  ;;  %v7815_v27 = vld [vmem:[#allocation10 + $0x88] ss:$16 sps:$4 sm:$0xff]   ;;  %v7821_v39 = vld [vmem:[#allocation10 + $0xa4] ss:$16 sps:$4 sm:$0xff]  }
 0x165   :  { %v5897_v58 = vmul.f32 -1.442695, %v1274_v38  ;;  %v1231_v23 = vpop.f32.mrb[39].mxu0  ;;  %v1272_v48 = vpop.f32.mrb[39].mxu1  ;;  %v7823_v2 = vld [vmem:[#allocation10 + $0xac] ss:$16 sps:$4 sm:$0xff]  }
 0x166   :  { %v5898_v28 = vmul.f32 -1.442695, %v1275_v31  ;;  %v5899_v37 = vmul.f32 -1.442695, %v1277_v35  ;;  %v7825_v44 = vld [vmem:[#allocation10 + $0xa0] ss:$16 sps:$4 sm:$0xff]  }
 0x167   :  { %6842 = vpow2.f32 %v5897_v58  ;;  %v7827_v38 = vld [vmem:[#allocation10 + $0xa8] ss:$16 sps:$4 sm:$0xff]   ;;  %v7835_v33 = vld [vmem:[#allocation10 + $0xcc] ss:$16 sps:$4 sm:$0xff]   ;;  %v7837_v29 = vld [vmem:[#allocation10 + $0xc0] ss:$16 sps:$4 sm:$0xff]  }
 0x168   :  { %6844 = vpow2.f32 %v5898_v28  ;;  %v7839_v31 = vld [vmem:[#allocation10 + $0xc8] ss:$16 sps:$4 sm:$0xff]   ;;  %v7845_v35 = vld [vmem:[#allocation10 + $0xe4] ss:$16 sps:$4 sm:$0xff]   ;;  %v7847_v19 = vld [vmem:[#allocation10 + $0xec] ss:$16 sps:$4 sm:$0xff]  }
 0x169   :  { %6846 = vpow2.f32 %v5899_v37  ;;  %v7849_v51 = vld [vmem:[#allocation10 + $0xe0] ss:$16 sps:$4 sm:$0xff]   ;;  %v7851_v58 = vld [vmem:[#allocation10 + $0xe8] ss:$16 sps:$4 sm:$0xff]   ;;  %v7857_v23 = vld [vmem:[#allocation10 + $0x104] ss:$16 sps:$4 sm:$0xff]  }
 0x16a   :  { %6848 = vtanh.f32 %v1276_v30  ;;  %v7833_v30 = vld [vmem:[#allocation10 + $0xc4] ss:$16 sps:$4 sm:$0xff]   ;;  %v7859_v48 = vld [vmem:[#allocation10 + $0x10c] ss:$16 sps:$4 sm:$0xff]  }
 0x16e   :  { %v6841_v53 = vpop.eup %6840 }
 0x16f   :  { %v985_v32 = vmul.f32 %v6841_v53, %v6839_v55 }
 0x171   :  { %v6843_v36 = vpop.eup %6842  ;;  %v988_v47 = vpack.c.bf16 %v985_v32, %v985_v32 }
 0x172   :  { %v6845_v54 = vpop.eup %6844  ;;  %v1281_v52 = vadd.f32 1.0, %v6843_v36 }
 0x173   :  { %v1287_v41 = vadd.f32 1.0, %v6845_v54  ;;  %989 = vst [vmem:[%s8704_s5] sm:$0xf] %v988_v47  ;;  %1542 = vmatmul.mubr.bf16.vlgmr.msra.gmra.mrb[40].mxu0 %v988_v47  ;;  %1583 = vmatmul.mubr.bf16.vlgmr.msra.gmra.mrb[40].mxu1 %v988_v47 }
 0x174   :  { %6850 = vrcp.f32 %v1281_v52  ;;  %1827 = vmatpush1.bf16.msra.mxu0 %v7351_v59  ;;  %1868 = vmatpush1.bf16.msra.mxu1 %v7353_v60  ;;  %v6847_v59 = vpop.eup %6846 }
 0x175   :  { %6852 = vrcp.f32 %v1287_v41  ;;  %1828 = vmatprep.subr.bf16.mxu0 %v7355_v61  ;;  %1869 = vmatprep.subr.bf16.mxu1 %v7357_v62  ;;  %v6849_v60 = vpop.eup %6848 }
 0x176   :  { %1858 = vmatprep.mubr.bf16.mxu0 %v8737_v43  ;;  %1899 = vmatprep.mubr.bf16.mxu1 %v8737_v43 }
 0x178   :  { %1829 = vmatpush1.bf16.msra.mxu0 %v7363_v63  ;;  %1870 = vmatpush1.bf16.msra.mxu1 %v7365_v1  ;;  %v1294_v63 = vadd.f32 1.0, %v6847_v59 }
 0x179   :  { %1830 = vmatprep.subr.bf16.mxu0 %v7367_v3  ;;  %1871 = vmatprep.subr.bf16.mxu1 %v7369_v4  ;;  %v8794_v3 = vld [vmem:[#allocation14_spill] sm:$0xff] }
 0x17a   :  { %6854 = vrcp.f32 %v1294_v63 }
 0x17c   :  { %1831 = vmatpush1.bf16.msra.mxu0 %v7375_v5  ;;  %1872 = vmatpush1.bf16.msra.mxu1 %v7377_v6  ;;  %v8795_v5 = vld [vmem:[#allocation15_spill] sm:$0xff] }
 0x17d   :  { %1832 = vmatprep.subr.bf16.mxu0 %v7381_v7  ;;  %1873 = vmatprep.subr.bf16.mxu1 %v7383_v8 }
 0x17e   :  { %v6851_v61 = vpop.eup %6850 }
 0x17f   :  { %v6853_v62 = vpop.eup %6852  ;;  %v1299_v20 = vmul.f32 %v6851_v61, %v6849_v60 }
 0x180   :  { %v1298_v56 = vmul.f32 0.0, %v6853_v62  ;;  %1833 = vmatpush1.bf16.msra.mxu0 %v7389_v9  ;;  %1874 = vmatpush1.bf16.msra.mxu1 %v7391_v10  ;;  %v7761_v9 = vld [vmem:[#allocation10 + $0x4] ss:$16 sps:$4 sm:$0xff]   ;;  %v7763_v10 = vld [vmem:[#allocation10 + $0xc] ss:$16 sps:$4 sm:$0xff]  }
 0x181   :  { %1834 = vmatprep.subr.bf16.mxu0 %v7393_v11  ;;  %1875 = vmatprep.subr.bf16.mxu1 %v7395_v12  ;;  %v7765_v11 = vld [vmem:[#allocation10] ss:$16 sps:$4 sm:$0xff]   ;;  %v7773_v12 = vld [vmem:[#allocation10 + $0x24] ss:$16 sps:$4 sm:$0xff]  }
 0x182   :  { %v7739_v1 = vadd.f32 %v1299_v20, %v1298_v56 }
 0x184   :  { %6856 = vtanh.f32 %v7739_v1  ;;  %1835 = vmatpush1.bf16.msra.mxu0 %v7401_v13  ;;  %1876 = vmatpush1.bf16.msra.mxu1 %v7403_v14  ;;  %v6855_v4 = vpop.eup %6854  ;;  %v7775_v13 = vld [vmem:[#allocation10 + $0x2c] ss:$16 sps:$4 sm:$0xff]   ;;  %v7777_v14 = vld [vmem:[#allocation10 + $0x20] ss:$16 sps:$4 sm:$0xff]  }
 0x185   :  { %1836 = vmatprep.subr.bf16.mxu0 %v8794_v3  ;;  %1877 = vmatprep.subr.bf16.mxu1 %v7407_v16  ;;  %v7785_v16 = vld [vmem:[#allocation10 + $0x44] ss:$16 sps:$4 sm:$0xff]  }
 0x188   :  { %1837 = vmatpush1.bf16.msra.mxu0 %v7413_v17  ;;  %1878 = vmatpush1.bf16.msra.mxu1 %v7415_v18  ;;  %v7787_v17 = vld [vmem:[#allocation10 + $0x4c] ss:$16 sps:$4 sm:$0xff]   ;;  %v7789_v18 = vld [vmem:[#allocation10 + $0x40] ss:$16 sps:$4 sm:$0xff]  }
 0x189   :  { %1838 = vmatprep.subr.bf16.mxu0 %v7417_v21  ;;  %1879 = vmatprep.subr.bf16.mxu1 %v7419_v22  ;;  %v7791_v21 = vld [vmem:[#allocation10 + $0x48] ss:$16 sps:$4 sm:$0xff]   ;;  %v7797_v22 = vld [vmem:[#allocation10 + $0x64] ss:$16 sps:$4 sm:$0xff]  }
 0x18c   :  { %1839 = vmatpush1.bf16.msra.mxu0 %v7425_v25  ;;  %1880 = vmatpush1.bf16.msra.mxu1 %v7427_v34  ;;  %v7799_v25 = vld [vmem:[#allocation10 + $0x6c] ss:$16 sps:$4 sm:$0xff]   ;;  %v7801_v34 = vld [vmem:[#allocation10 + $0x60] ss:$16 sps:$4 sm:$0xff]  }
 0x18d   :  { %1840 = vmatprep.subr.bf16.mxu0 %v8795_v5  ;;  %1881 = vmatprep.subr.bf16.mxu1 %v7431_v50  ;;  %v7803_v50 = vld [vmem:[#allocation10 + $0x68] ss:$16 sps:$4 sm:$0xff]  }
 0x18e   :  { %v6857_v6 = vpop.eup %6856 }
 0x18f   :  { %v1302_v7 = vmul.f32 %v6857_v6, %v6855_v4 }
 0x190   :  { %1841 = vmatpush1.bf16.msra.mxu0 %v7437_v0  ;;  %1882 = vmatpush1.bf16.msra.mxu1 %v7439_v15  ;;  %v7767_v0 = vld [vmem:[#allocation10 + $0x8] ss:$16 sps:$4 sm:$0xff]  }
 0x191   :  { %v1305_v8 = vpack.c.bf16 %v1302_v7, %v1302_v7  ;;  %2143 = vmatprep.subr.bf16.mxu0 %v7761_v9  ;;  %2184 = vmatprep.subr.bf16.mxu1 %v7763_v10  ;;  %v7779_v15 = vld [vmem:[#allocation10 + $0x28] ss:$16 sps:$4 sm:$0xff]  }
 0x193   :  { %5900 = vst [vmem:[%s8705_s6 + $0x1c] sm:$0xf] %v1305_v8  ;;  %1859 = vmatmul.mubr.bf16.vlgmr.msra.gmra.mrb[44].mxu0 %v1305_v8  ;;  %1900 = vmatmul.mubr.bf16.vlgmr.msra.gmra.mrb[44].mxu1 %v1305_v8 }
 0x194   :  { %2175 = vmatprep.mubr.bf16.mxu0 %v8737_v43  ;;  %2216 = vmatprep.mubr.bf16.mxu1 %v8737_v43 }
 0x195   :  { %2144 = vmatpush1.bf16.msra.mxu0 %v7765_v11  ;;  %2185 = vmatpush1.bf16.msra.mxu1 %v7767_v0 }
 0x196   :  { %2145 = vmatprep.subr.bf16.mxu0 %v7773_v12  ;;  %2186 = vmatprep.subr.bf16.mxu1 %v7775_v13 }
 0x199   :  { %2146 = vmatpush1.bf16.msra.mxu0 %v7777_v14  ;;  %2187 = vmatpush1.bf16.msra.mxu1 %v7779_v15 }
 0x19a   :  { %2147 = vmatprep.subr.bf16.mxu0 %v7785_v16  ;;  %2188 = vmatprep.subr.bf16.mxu1 %v7787_v17 }
 0x19d   :  { %2148 = vmatpush1.bf16.msra.mxu0 %v7789_v18  ;;  %2189 = vmatpush1.bf16.msra.mxu1 %v7791_v21 }
 0x19e   :  { %2149 = vmatprep.subr.bf16.mxu0 %v7797_v22  ;;  %2190 = vmatprep.subr.bf16.mxu1 %v7799_v25 }
 0x1a1   :  { %2150 = vmatpush1.bf16.msra.mxu0 %v7801_v34  ;;  %2191 = vmatpush1.bf16.msra.mxu1 %v7803_v50 }
 0x1a2   :  { %2151 = vmatprep.subr.bf16.mxu0 %v7809_v24  ;;  %2192 = vmatprep.subr.bf16.mxu1 %v7811_v49 }
 0x1a5   :  { %2152 = vmatpush1.bf16.msra.mxu0 %v7813_v57  ;;  %2193 = vmatpush1.bf16.msra.mxu1 %v7815_v27 }
 0x1a6   :  { %2153 = vmatprep.subr.bf16.mxu0 %v7821_v39  ;;  %2194 = vmatprep.subr.bf16.mxu1 %v7823_v2 }
 0x1a9   :  { %2154 = vmatpush1.bf16.msra.mxu0 %v7825_v44  ;;  %2195 = vmatpush1.bf16.msra.mxu1 %v7827_v38 }
 0x1aa   :  { %2155 = vmatprep.subr.bf16.mxu0 %v7833_v30  ;;  %2196 = vmatprep.subr.bf16.mxu1 %v7835_v33 }
 0x1ad   :  { %2156 = vmatpush1.bf16.msra.mxu0 %v7837_v29  ;;  %2197 = vmatpush1.bf16.msra.mxu1 %v7839_v31 }
 0x1ae   :  { %2157 = vmatprep.subr.bf16.mxu0 %v7845_v35  ;;  %2198 = vmatprep.subr.bf16.mxu1 %v7847_v19 }
 0x1b1   :  { %2158 = vmatpush1.bf16.msra.mxu0 %v7849_v51  ;;  %2199 = vmatpush1.bf16.msra.mxu1 %v7851_v58 }
 0x1b2   :  { %2460 = vmatprep.subr.bf16.mxu0 %v7857_v23  ;;  %2501 = vmatprep.subr.bf16.mxu1 %v7859_v48 }
 0x246   :  { %v1543_v28 = vpop.f32.mrb[40].mxu0  ;;  %v1584_v55 = vpop.f32.mrb[40].mxu1 }
 0x247   :  { %v1591_v53 = vadd.f32 %v1543_v28, %v7517_v40  ;;  %v1593_v37 = vadd.f32 %v1584_v55, %v7520_v42  ;;  %v1545_v32 = vpop.f32.mrb[41].mxu0  ;;  %v1586_v36 = vpop.f32.mrb[41].mxu1 }
 0x248   :  { %v1592_v47 = vadd.f32 %v1545_v32, %v7523_v45  ;;  %v1594_v54 = vadd.f32 %v1586_v36, %v7526_v46  ;;  %v1547_v52 = vpop.f32.mrb[42].mxu0  ;;  %v1588_v41 = vpop.f32.mrb[42].mxu1  ;;  %v8797_v36 = vld [vmem:[#allocation65_spill] sm:$0xff] }
 0x249   :  { %v5933_v59 = vmul.f32 -1.442695, %v1591_v53  ;;  %v1548_v60 = vpop.f32.mrb[43].mxu0  ;;  %v1589_v61 = vpop.f32.mrb[43].mxu1  ;;  %v8796_v53 = vld [vmem:[#allocation64_spill] sm:$0xff]  ;;  %v8798_v52 = vld [vmem:[#allocation66_spill] sm:$0xff] }
 0x24a   :  { %v5934_v62 = vmul.f32 -1.442695, %v1592_v47  ;;  %v5935_v20 = vmul.f32 -1.442695, %v1594_v54 }
 0x24b   :  { %6858 = vpow2.f32 %v5933_v59  ;;  %v8799_v59 = vld [vmem:[#allocation67_spill] sm:$0xff] }
 0x24c   :  { %6860 = vpow2.f32 %v5934_v62 }
 0x24d   :  { %6862 = vpow2.f32 %v5935_v20 }
 0x24e   :  { %6864 = vtanh.f32 %v1593_v37 }
 0x255   :  { %v6859_v63 = vpop.eup %6858 }
 0x256   :  { %v6861_v56 = vpop.eup %6860  ;;  %v1598_v40 = vadd.f32 1.0, %v6859_v63 }
 0x257   :  { %v1604_v42 = vadd.f32 1.0, %v6861_v56  ;;  %v6863_v45 = vpop.eup %6862 }
 0x258   :  { %6866 = vrcp.f32 %v1598_v40  ;;  %v6865_v3 = vpop.eup %6864  ;;  %v1611_v6 = vadd.f32 1.0, %v6863_v45 }
 0x259   :  { %6868 = vrcp.f32 %v1604_v42 }
 0x25a   :  { %6870 = vrcp.f32 %v1611_v6 }
 0x262   :  { %v6867_v46 = vpop.eup %6866 }
 0x263   :  { %v6869_v4 = vpop.eup %6868  ;;  %v1616_v5 = vmul.f32 %v6867_v46, %v6865_v3  ;;  %v7875_v46 = vld [vmem:[#allocation10 + $0x100] ss:$16 sps:$4 sm:$0xff]  }
 0x264   :  { %v1615_v7 = vmul.f32 %v6869_v4, %v7715_v26  ;;  %v6871_v40 = vpop.eup %6870  ;;  %v7877_v4 = vld [vmem:[#allocation10 + $0x108] ss:$16 sps:$4 sm:$0xff]  }
 0x266   :  { %v7868_v8 = vadd.f32 %v1616_v5, %v1615_v7  ;;  %v1860_v28 = vpop.f32.mrb[44].mxu0  ;;  %v1901_v55 = vpop.f32.mrb[44].mxu1  ;;  %v7879_v7 = vld [vmem:[#allocation10 + $0x124] ss:$16 sps:$4 sm:$0xff]  }
 0x267   :  { %v1908_v32 = vadd.f32 %v1860_v28, %v8796_v53  ;;  %v1910_v37 = vadd.f32 %v1901_v55, %v8797_v36  ;;  %v1862_v47 = vpop.f32.mrb[45].mxu0  ;;  %v1903_v54 = vpop.f32.mrb[45].mxu1  ;;  %v7881_v28 = vld [vmem:[#allocation10 + $0x12c] ss:$16 sps:$4 sm:$0xff]   ;;  %v7888_v36 = vld [vmem:[#allocation10 + $0x120] ss:$16 sps:$4 sm:$0xff]  }
 0x268   :  { %v1909_v41 = vadd.f32 %v1862_v47, %v8798_v52  ;;  %v1911_v60 = vadd.f32 %v1903_v54, %v8799_v59  ;;  %v1864_v61 = vpop.f32.mrb[46].mxu0  ;;  %v1905_v62 = vpop.f32.mrb[46].mxu1  ;;  %6872 = vtanh.f32 %v7868_v8  ;;  %v7890_v47 = vld [vmem:[#allocation10 + $0x128] ss:$16 sps:$4 sm:$0xff]   ;;  %v7896_v54 = vld [vmem:[#allocation10 + $0x14c] ss:$16 sps:$4 sm:$0xff]  }
 0x269   :  { %v5969_v26 = vmul.f32 -1.442695, %v1908_v32  ;;  %v1865_v20 = vpop.f32.mrb[47].mxu0  ;;  %v1906_v63 = vpop.f32.mrb[47].mxu1  ;;  %v7902_v52 = vld [vmem:[#allocation10 + $0x140] ss:$16 sps:$4 sm:$0xff]  }
 0x26a   :  { %v5970_v56 = vmul.f32 -1.442695, %v1909_v41  ;;  %v5971_v45 = vmul.f32 -1.442695, %v1911_v60  ;;  %v7904_v41 = vld [vmem:[#allocation10 + $0x148] ss:$16 sps:$4 sm:$0xff]  }
 0x26b   :  { %6874 = vpow2.f32 %v5969_v26  ;;  %v7908_v59 = vld [vmem:[#allocation10 + $0x164] ss:$16 sps:$4 sm:$0xff]   ;;  %v7910_v60 = vld [vmem:[#allocation10 + $0x16c] ss:$16 sps:$4 sm:$0xff]   ;;  %v7914_v62 = vld [vmem:[#allocation10 + $0x160] ss:$16 sps:$4 sm:$0xff]  }
 0x26c   :  { %6876 = vpow2.f32 %v5970_v56  ;;  %v7916_v26 = vld [vmem:[#allocation10 + $0x168] ss:$16 sps:$4 sm:$0xff]   ;;  %v7920_v63 = vld [vmem:[#allocation10 + $0x184] ss:$16 sps:$4 sm:$0xff]   ;;  %v7922_v56 = vld [vmem:[#allocation10 + $0x18c] ss:$16 sps:$4 sm:$0xff]  }
 0x26d   :  { %6878 = vpow2.f32 %v5971_v45 }
 0x26e   :  { %6880 = vtanh.f32 %v1910_v37  ;;  %v7894_v37 = vld [vmem:[#allocation10 + $0x144] ss:$16 sps:$4 sm:$0xff]  }
 0x272   :  { %v6873_v42 = vpop.eup %6872 }
 0x273   :  { %v1619_v3 = vmul.f32 %v6873_v42, %v6871_v40 }
 0x275   :  { %v6875_v5 = vpop.eup %6874  ;;  %v1622_v6 = vpack.c.bf16 %v1619_v3, %v1619_v3 }
 0x276   :  { %v6877_v55 = vpop.eup %6876  ;;  %v1915_v53 = vadd.f32 1.0, %v6875_v5 }
 0x277   :  { %v1921_v32 = vadd.f32 1.0, %v6877_v55  ;;  %5936 = vst [vmem:[%s8704_s5 + $0x4] sm:$0xf] %v1622_v6  ;;  %2176 = vmatmul.mubr.bf16.vlgmr.msra.gmra.mrb[48].mxu0 %v1622_v6  ;;  %2217 = vmatmul.mubr.bf16.vlgmr.msra.gmra.mrb[48].mxu1 %v1622_v6  ;;  %v6879_v61 = vpop.eup %6878  ;;  %v7927_v6 = vld [vmem:[#allocation10 + $0x180] ss:$16 sps:$4 sm:$0xff]  }
 0x278   :  { %6882 = vrcp.f32 %v1915_v53  ;;  %2461 = vmatpush1.bf16.msra.mxu0 %v7875_v46  ;;  %2502 = vmatpush1.bf16.msra.mxu1 %v7877_v4  ;;  %v6881_v20 = vpop.eup %6880  ;;  %v1928_v3 = vadd.f32 1.0, %v6879_v61  ;;  %v7929_v55 = vld [vmem:[#allocation10 + $0x188] ss:$16 sps:$4 sm:$0xff]   ;;  %v7933_v53 = vld [vmem:[#allocation10 + $0x1a4] ss:$16 sps:$4 sm:$0xff]  }
 0x279   :  { %6884 = vrcp.f32 %v1921_v32  ;;  %2462 = vmatprep.subr.bf16.mxu0 %v7879_v7  ;;  %2503 = vmatprep.subr.bf16.mxu1 %v7881_v28  ;;  %8800 = vst [vmem:[#allocation14_spill] sm:$0xff] %v7929_v55  ;;  %8801 = vst [vmem:[#allocation15_spill] sm:$0xff] %v7933_v53  ;;  %v7935_v32 = vld [vmem:[#allocation10 + $0x1ac] ss:$16 sps:$4 sm:$0xff]   ;;  %v7943_v61 = vld [vmem:[#allocation10 + $0x1a8] ss:$16 sps:$4 sm:$0xff]  }
 0x27a   :  { %2492 = vmatprep.mubr.bf16.mxu0 %v8737_v43  ;;  %2533 = vmatprep.mubr.bf16.mxu1 %v8737_v43  ;;  %8802 = vst [vmem:[#allocation64_spill] sm:$0xff] %v7935_v32  ;;  %6886 = vrcp.f32 %v1928_v3  ;;  %8804 = vst [vmem:[#allocation66_spill] sm:$0xff] %v7943_v61  ;;  %v7956_v3 = vld [vmem:[#allocation10 + $0x1c8] ss:$16 sps:$4 sm:$0xff]  }
 0x27c   :  { %2463 = vmatpush1.bf16.msra.mxu0 %v7888_v36  ;;  %2504 = vmatpush1.bf16.msra.mxu1 %v7890_v47 }
 0x27d   :  { %2464 = vmatprep.subr.bf16.mxu0 %v7894_v37  ;;  %2505 = vmatprep.subr.bf16.mxu1 %v7896_v54 }
 0x280   :  { %2465 = vmatpush1.bf16.msra.mxu0 %v7902_v52  ;;  %2506 = vmatpush1.bf16.msra.mxu1 %v7904_v41 }
 0x281   :  { %2466 = vmatprep.subr.bf16.mxu0 %v7908_v59  ;;  %2507 = vmatprep.subr.bf16.mxu1 %v7910_v60 }
 0x282   :  { %v6883_v40 = vpop.eup %6882 }
 0x283   :  { %v6885_v42 = vpop.eup %6884  ;;  %v1933_v45 = vmul.f32 %v6883_v40, %v6881_v20  ;;  %v7948_v40 = vld [vmem:[#allocation10 + $0x1c4] ss:$16 sps:$4 sm:$0xff]  }
 0x284   :  { %v1932_v5 = vmul.f32 %v6885_v42, %v7739_v1  ;;  %2467 = vmatpush1.bf16.msra.mxu0 %v7914_v62  ;;  %2508 = vmatpush1.bf16.msra.mxu1 %v7916_v26  ;;  %v7941_v1 = vld [vmem:[#allocation10 + $0x1a0] ss:$16 sps:$4 sm:$0xff]   ;;  %8805 = vst [vmem:[#allocation67_spill] sm:$0xff] %v7948_v40  ;;  %v7950_v42 = vld [vmem:[#allocation10 + $0x1cc] ss:$16 sps:$4 sm:$0xff]  }
 0x285   :  { %2468 = vmatprep.subr.bf16.mxu0 %v7920_v63  ;;  %2509 = vmatprep.subr.bf16.mxu1 %v7922_v56  ;;  %8803 = vst [vmem:[#allocation65_spill] sm:$0xff] %v7941_v1  ;;  %8806 = vst [vmem:[#allocation68_spill] sm:$0xff] %v7950_v42 }
 0x286   :  { %v7937_v20 = vadd.f32 %v1933_v45, %v1932_v5  ;;  %v7954_v45 = vld [vmem:[#allocation10 + $0x1c0] ss:$16 sps:$4 sm:$0xff]   ;;  %v7960_v5 = vld [vmem:[#allocation10 + $0x1e4] ss:$16 sps:$4 sm:$0xff]  }
 0x288   :  { %2469 = vmatpush1.bf16.msra.mxu0 %v7927_v6  ;;  %2510 = vmatpush1.bf16.msra.mxu1 %v7929_v55  ;;  %6888 = vtanh.f32 %v7937_v20 }
 0x289   :  { %2470 = vmatprep.subr.bf16.mxu0 %v7933_v53  ;;  %2511 = vmatprep.subr.bf16.mxu1 %v7935_v32  ;;  %v7962_v53 = vld [vmem:[#allocation10 + $0x1ec] ss:$16 sps:$4 sm:$0xff]   ;;  %v7966_v32 = vld [vmem:[#allocation10 + $0x1e0] ss:$16 sps:$4 sm:$0xff]  }
 0x28c   :  { %2471 = vmatpush1.bf16.msra.mxu0 %v7941_v1  ;;  %2512 = vmatpush1.bf16.msra.mxu1 %v7943_v61  ;;  %v7968_v1 = vld [vmem:[#allocation10 + $0x1e8] ss:$16 sps:$4 sm:$0xff]   ;;  %v6887_v61 = vpop.eup %6886 }
 0x28d   :  { %2472 = vmatprep.subr.bf16.mxu0 %v7948_v40  ;;  %2513 = vmatprep.subr.bf16.mxu1 %v7950_v42 }
 0x290   :  { %2473 = vmatpush1.bf16.msra.mxu0 %v7954_v45  ;;  %2514 = vmatpush1.bf16.msra.mxu1 %v7956_v3 }
 0x291   :  { %2474 = vmatprep.subr.bf16.mxu0 %v7960_v5  ;;  %2515 = vmatprep.subr.bf16.mxu1 %v7962_v53 }
 0x292   :  { %v6889_v40 = vpop.eup %6888 }
 0x293   :  { %v1936_v55 = vmul.f32 %v6889_v40, %v6887_v61  ;;  %v8812_v61 = vld [vmem:[#allocation61_spill] sm:$0xff] }
 0x294   :  { %2475 = vmatpush1.bf16.msra.mxu0 %v7966_v32  ;;  %2516 = vmatpush1.bf16.msra.mxu1 %v7968_v1 }
 0x295   :  { %v1939_v42 = vpack.c.bf16 %v1936_v55, %v1936_v55  ;;  %2777 = vmatprep.subr.bf16.mxu0 %v7761_v9  ;;  %2818 = vmatprep.subr.bf16.mxu1 %v7763_v10 }
 0x297   :  { %5972 = vst [vmem:[%s8705_s6 + $0x18] sm:$0xf] %v1939_v42  ;;  %2493 = vmatmul.mubr.bf16.vlgmr.msra.gmra.mrb[52].mxu0 %v1939_v42  ;;  %2534 = vmatmul.mubr.bf16.vlgmr.msra.gmra.mrb[52].mxu1 %v1939_v42 }
 0x298   :  { %2778 = vmatpush1.bf16.msra.mxu0 %v7765_v11  ;;  %2819 = vmatpush1.bf16.msra.mxu1 %v7767_v0  ;;  %v8807_v11 = vld [vmem:[#allocation16_spill] sm:$0xff] }
 0x299   :  { %2779 = vmatprep.subr.bf16.mxu0 %v7773_v12  ;;  %2820 = vmatprep.subr.bf16.mxu1 %v7775_v13  ;;  %v8808_v12 = vld [vmem:[#allocation17_spill] sm:$0xff] }
 0x29a   :  { %2809 = vmatprep.mubr.bf16.mxu0 %v8737_v43  ;;  %2850 = vmatprep.mubr.bf16.mxu1 %v8737_v43 }
 0x29c   :  { %2780 = vmatpush1.bf16.msra.mxu0 %v7777_v14  ;;  %2821 = vmatpush1.bf16.msra.mxu1 %v7779_v15 }
 0x29d   :  { %2781 = vmatprep.subr.bf16.mxu0 %v7785_v16  ;;  %2822 = vmatprep.subr.bf16.mxu1 %v7787_v17  ;;  %v8809_v16 = vld [vmem:[#allocation18_spill] sm:$0xff] }
 0x2a0   :  { %2782 = vmatpush1.bf16.msra.mxu0 %v7789_v18  ;;  %2823 = vmatpush1.bf16.msra.mxu1 %v7791_v21  ;;  %v8810_v18 = vld [vmem:[#allocation19_spill] sm:$0xff] }
 0x2a1   :  { %2783 = vmatprep.subr.bf16.mxu0 %v7797_v22  ;;  %2824 = vmatprep.subr.bf16.mxu1 %v7799_v25 }
 0x2a4   :  { %2784 = vmatpush1.bf16.msra.mxu0 %v7801_v34  ;;  %2825 = vmatpush1.bf16.msra.mxu1 %v7803_v50 }
 0x2a5   :  { %2785 = vmatprep.subr.bf16.mxu0 %v7809_v24  ;;  %2826 = vmatprep.subr.bf16.mxu1 %v7811_v49 }
 0x2a8   :  { %2786 = vmatpush1.bf16.msra.mxu0 %v7813_v57  ;;  %2827 = vmatpush1.bf16.msra.mxu1 %v7815_v27 }
 0x2a9   :  { %2787 = vmatprep.subr.bf16.mxu0 %v7821_v39  ;;  %2828 = vmatprep.subr.bf16.mxu1 %v7823_v2 }
 0x2ac   :  { %2788 = vmatpush1.bf16.msra.mxu0 %v7825_v44  ;;  %2829 = vmatpush1.bf16.msra.mxu1 %v7827_v38 }
 0x2ad   :  { %2789 = vmatprep.subr.bf16.mxu0 %v7833_v30  ;;  %2830 = vmatprep.subr.bf16.mxu1 %v7835_v33 }
 0x2b0   :  { %2790 = vmatpush1.bf16.msra.mxu0 %v7837_v29  ;;  %2831 = vmatpush1.bf16.msra.mxu1 %v7839_v31 }
 0x2b1   :  { %2791 = vmatprep.subr.bf16.mxu0 %v7845_v35  ;;  %2832 = vmatprep.subr.bf16.mxu1 %v7847_v19 }
 0x2b4   :  { %2792 = vmatpush1.bf16.msra.mxu0 %v7849_v51  ;;  %2833 = vmatpush1.bf16.msra.mxu1 %v7851_v58 }
 0x2b5   :  { %3094 = vmatprep.subr.bf16.mxu0 %v7857_v23  ;;  %3135 = vmatprep.subr.bf16.mxu1 %v7859_v48  ;;  %v8811_v48 = vld [vmem:[#allocation60_spill] sm:$0xff] }
 0x34a   :  { %v2177_v9 = vpop.f32.mrb[48].mxu0  ;;  %v2218_v10 = vpop.f32.mrb[48].mxu1 }
 0x34b   :  { %v2225_v0 = vadd.f32 %v2177_v9, %v8807_v11  ;;  %v2227_v13 = vadd.f32 %v2218_v10, %v8808_v12  ;;  %v2179_v14 = vpop.f32.mrb[49].mxu0  ;;  %v2220_v15 = vpop.f32.mrb[49].mxu1  ;;  %v8813_v10 = vld [vmem:[#allocation62_spill] sm:$0xff] }
 0x34c   :  { %v2226_v17 = vadd.f32 %v2179_v14, %v8809_v16  ;;  %v2228_v21 = vadd.f32 %v2220_v15, %v8810_v18  ;;  %v2181_v22 = vpop.f32.mrb[50].mxu0  ;;  %v2222_v25 = vpop.f32.mrb[50].mxu1 }
 0x34d   :  { %v6005_v34 = vmul.f32 -1.442695, %v2225_v0  ;;  %v2182_v50 = vpop.f32.mrb[51].mxu0  ;;  %v2223_v24 = vpop.f32.mrb[51].mxu1  ;;  %v8814_v0 = vld [vmem:[#allocation63_spill] sm:$0xff] }
 0x34e   :  { %v6006_v49 = vmul.f32 -1.442695, %v2226_v17  ;;  %v6007_v57 = vmul.f32 -1.442695, %v2228_v21 }
 0x34f   :  { %6890 = vpow2.f32 %v6005_v34 }
 0x350   :  { %6892 = vpow2.f32 %v6006_v49 }
 0x351   :  { %6894 = vpow2.f32 %v6007_v57 }
 0x352   :  { %6896 = vtanh.f32 %v2227_v13 }
 0x359   :  { %v6891_v27 = vpop.eup %6890 }
 0x35a   :  { %v6893_v39 = vpop.eup %6892  ;;  %v2232_v2 = vadd.f32 1.0, %v6891_v27 }
 0x35b   :  { %v2238_v44 = vadd.f32 1.0, %v6893_v39  ;;  %v6895_v38 = vpop.eup %6894  ;;  %v8085_v39 = vld [vmem:[#allocation10 + $0x20] ss:$16 sps:$4 sm:$0xff]  }
 0x35c   :  { %6898 = vrcp.f32 %v2232_v2  ;;  %v6897_v30 = vpop.eup %6896  ;;  %v2245_v35 = vadd.f32 1.0, %v6895_v38  ;;  %v8087_v2 = vld [vmem:[#allocation10 + $0x28] ss:$16 sps:$4 sm:$0xff]   ;;  %v8095_v38 = vld [vmem:[#allocation10 + $0x4c] ss:$16 sps:$4 sm:$0xff]  }
 0x35d   :  { %6900 = vrcp.f32 %v2238_v44  ;;  %v8093_v44 = vld [vmem:[#allocation10 + $0x44] ss:$16 sps:$4 sm:$0xff]  }
 0x35e   :  { %6902 = vrcp.f32 %v2245_v35  ;;  %v8109_v35 = vld [vmem:[#allocation10 + $0x60] ss:$16 sps:$4 sm:$0xff]  }
 0x366   :  { %v6899_v33 = vpop.eup %6898 }
 0x367   :  { %v6901_v29 = vpop.eup %6900  ;;  %v2250_v31 = vmul.f32 %v6899_v33, %v6897_v30  ;;  %v8097_v30 = vld [vmem:[#allocation10 + $0x40] ss:$16 sps:$4 sm:$0xff]   ;;  %v8099_v33 = vld [vmem:[#allocation10 + $0x48] ss:$16 sps:$4 sm:$0xff]  }
 0x368   :  { %v2249_v19 = vmul.f32 %v6901_v29, %v7868_v8  ;;  %v6903_v18 = vpop.eup %6902  ;;  %v8105_v29 = vld [vmem:[#allocation10 + $0x64] ss:$16 sps:$4 sm:$0xff]  }
 0x36a   :  { %v8018_v51 = vadd.f32 %v2250_v31, %v2249_v19  ;;  %v2494_v58 = vpop.f32.mrb[52].mxu0  ;;  %v2535_v23 = vpop.f32.mrb[52].mxu1  ;;  %v8107_v31 = vld [vmem:[#allocation10 + $0x6c] ss:$16 sps:$4 sm:$0xff]   ;;  %v8111_v19 = vld [vmem:[#allocation10 + $0x68] ss:$16 sps:$4 sm:$0xff]  }
 0x36b   :  { %v2542_v55 = vadd.f32 %v2494_v58, %v8811_v48  ;;  %v2544_v40 = vadd.f32 %v2535_v23, %v8812_v61  ;;  %v2496_v42 = vpop.f32.mrb[53].mxu0  ;;  %v2537_v9 = vpop.f32.mrb[53].mxu1  ;;  %v8117_v58 = vld [vmem:[#allocation10 + $0x84] ss:$16 sps:$4 sm:$0xff]   ;;  %v8119_v23 = vld [vmem:[#allocation10 + $0x8c] ss:$16 sps:$4 sm:$0xff]  }
 0x36c   :  { %v2543_v11 = vadd.f32 %v2496_v42, %v8813_v10  ;;  %v2545_v12 = vadd.f32 %v2537_v9, %v8814_v0  ;;  %v2498_v13 = vpop.f32.mrb[54].mxu0  ;;  %v2539_v14 = vpop.f32.mrb[54].mxu1  ;;  %6904 = vtanh.f32 %v8018_v51  ;;  %v8121_v48 = vld [vmem:[#allocation10 + $0x80] ss:$16 sps:$4 sm:$0xff]   ;;  %v8129_v61 = vld [vmem:[#allocation10 + $0xa4] ss:$16 sps:$4 sm:$0xff]  }
 0x36d   :  { %v6041_v8 = vmul.f32 -1.442695, %v2542_v55  ;;  %v2499_v15 = vpop.f32.mrb[55].mxu0  ;;  %v2540_v16 = vpop.f32.mrb[55].mxu1  ;;  %v8123_v55 = vld [vmem:[#allocation10 + $0x88] ss:$16 sps:$4 sm:$0xff]  }
 0x36e   :  { %v6042_v17 = vmul.f32 -1.442695, %v2543_v11  ;;  %v6043_v22 = vmul.f32 -1.442695, %v2545_v12  ;;  %v8133_v42 = vld [vmem:[#allocation10 + $0xa0] ss:$16 sps:$4 sm:$0xff]  }
 0x36f   :  { %6906 = vpow2.f32 %v6041_v8  ;;  %v8135_v9 = vld [vmem:[#allocation10 + $0xa8] ss:$16 sps:$4 sm:$0xff]   ;;  %v8141_v10 = vld [vmem:[#allocation10 + $0xc4] ss:$16 sps:$4 sm:$0xff]   ;;  %v8143_v11 = vld [vmem:[#allocation10 + $0xcc] ss:$16 sps:$4 sm:$0xff]  }
 0x370   :  { %6908 = vpow2.f32 %v6042_v17  ;;  %v8145_v0 = vld [vmem:[#allocation10 + $0xc0] ss:$16 sps:$4 sm:$0xff]   ;;  %v8147_v12 = vld [vmem:[#allocation10 + $0xc8] ss:$16 sps:$4 sm:$0xff]   ;;  %v8153_v13 = vld [vmem:[#allocation10 + $0xe4] ss:$16 sps:$4 sm:$0xff]  }
 0x371   :  { %6910 = vpow2.f32 %v6043_v22  ;;  %v8155_v14 = vld [vmem:[#allocation10 + $0xec] ss:$16 sps:$4 sm:$0xff]   ;;  %v8157_v8 = vld [vmem:[#allocation10 + $0xe0] ss:$16 sps:$4 sm:$0xff]   ;;  %v8159_v15 = vld [vmem:[#allocation10 + $0xe8] ss:$16 sps:$4 sm:$0xff]  }
 0x372   :  { %6912 = vtanh.f32 %v2544_v40  ;;  %v8131_v40 = vld [vmem:[#allocation10 + $0xac] ss:$16 sps:$4 sm:$0xff]   ;;  %v8165_v16 = vld [vmem:[#allocation10 + $0x104] ss:$16 sps:$4 sm:$0xff]  }
 0x373   :  { %v8167_v17 = vld [vmem:[#allocation10 + $0x10c] ss:$16 sps:$4 sm:$0xff]   ;;  %v8822_v22 = vld [vmem:[#allocation20_spill] sm:$0xff] }
 0x376   :  { %v6905_v21 = vpop.eup %6904 }
 0x377   :  { %v2253_v25 = vmul.f32 %v6905_v21, %v6903_v18 }
 0x379   :  { %v6907_v34 = vpop.eup %6906  ;;  %v2256_v50 = vpack.c.bf16 %v2253_v25, %v2253_v25 }
 0x37a   :  { %v6909_v24 = vpop.eup %6908  ;;  %v2549_v49 = vadd.f32 1.0, %v6907_v34  ;;  %v8823_v34 = vld [vmem:[#allocation21_spill] sm:$0xff] }
 0x37b   :  { %v2555_v57 = vadd.f32 1.0, %v6909_v24  ;;  %6008 = vst [vmem:[%s8704_s5 + $0x8] sm:$0xf] %v2256_v50  ;;  %2810 = vmatmul.mubr.bf16.vlgmr.msra.gmra.mrb[56].mxu0 %v2256_v50  ;;  %2851 = vmatmul.mubr.bf16.vlgmr.msra.gmra.mrb[56].mxu1 %v2256_v50 }
 0x37c   :  { %6914 = vrcp.f32 %v2549_v49  ;;  %3095 = vmatpush1.bf16.msra.mxu0 %v7875_v46  ;;  %3136 = vmatpush1.bf16.msra.mxu1 %v7877_v4  ;;  %v6911_v46 = vpop.eup %6910 }
 0x37d   :  { %6916 = vrcp.f32 %v2555_v57  ;;  %3096 = vmatprep.subr.bf16.mxu0 %v7879_v7  ;;  %3137 = vmatprep.subr.bf16.mxu1 %v7881_v28  ;;  %v6913_v4 = vpop.eup %6912  ;;  %v8824_v57 = vld [vmem:[#allocation22_spill] sm:$0xff] }
 0x37e   :  { %3126 = vmatprep.mubr.bf16.mxu0 %v8737_v43  ;;  %3167 = vmatprep.mubr.bf16.mxu1 %v8737_v43 }
 0x380   :  { %3097 = vmatpush1.bf16.msra.mxu0 %v7888_v36  ;;  %3138 = vmatpush1.bf16.msra.mxu1 %v7890_v47  ;;  %v2562_v36 = vadd.f32 1.0, %v6911_v46 }
 0x381   :  { %3098 = vmatprep.subr.bf16.mxu0 %v7894_v37  ;;  %3139 = vmatprep.subr.bf16.mxu1 %v7896_v54  ;;  %v8815_v54 = vld [vmem:[#allocation14_spill] sm:$0xff] }
 0x382   :  { %6918 = vrcp.f32 %v2562_v36 }
 0x384   :  { %3099 = vmatpush1.bf16.msra.mxu0 %v7902_v52  ;;  %3140 = vmatpush1.bf16.msra.mxu1 %v7904_v41  ;;  %v8816_v52 = vld [vmem:[#allocation15_spill] sm:$0xff]  ;;  %v8817_v41 = vld [vmem:[#allocation64_spill] sm:$0xff] }
 0x385   :  { %3100 = vmatprep.subr.bf16.mxu0 %v7908_v59  ;;  %3141 = vmatprep.subr.bf16.mxu1 %v7910_v60  ;;  %v8818_v59 = vld [vmem:[#allocation65_spill] sm:$0xff]  ;;  %v8819_v60 = vld [vmem:[#allocation66_spill] sm:$0xff] }
 0x386   :  { %v6915_v7 = vpop.eup %6914 }
 0x387   :  { %v6917_v28 = vpop.eup %6916  ;;  %v2567_v27 = vmul.f32 %v6915_v7, %v6913_v4  ;;  %v8825_v4 = vld [vmem:[#allocation23_spill] sm:$0xff] }
 0x388   :  { %v2566_v47 = vmul.f32 %v6917_v28, %v7937_v20  ;;  %3101 = vmatpush1.bf16.msra.mxu0 %v7914_v62  ;;  %3142 = vmatpush1.bf16.msra.mxu1 %v7916_v26  ;;  %v8820_v62 = vld [vmem:[#allocation67_spill] sm:$0xff]  ;;  %v8821_v26 = vld [vmem:[#allocation68_spill] sm:$0xff] }
 0x389   :  { %3102 = vmatprep.subr.bf16.mxu0 %v7920_v63  ;;  %3143 = vmatprep.subr.bf16.mxu1 %v7922_v56 }
 0x38a   :  { %v8047_v37 = vadd.f32 %v2567_v27, %v2566_v47 }
 0x38c   :  { %3103 = vmatpush1.bf16.msra.mxu0 %v7927_v6  ;;  %3144 = vmatpush1.bf16.msra.mxu1 %v8815_v54  ;;  %6920 = vtanh.f32 %v8047_v37  ;;  %v6919_v63 = vpop.eup %6918 }
 0x38d   :  { %3104 = vmatprep.subr.bf16.mxu0 %v8816_v52  ;;  %3145 = vmatprep.subr.bf16.mxu1 %v8817_v41 }
 0x390   :  { %3105 = vmatpush1.bf16.msra.mxu0 %v8818_v59  ;;  %3146 = vmatpush1.bf16.msra.mxu1 %v8819_v60 }
 0x391   :  { %3106 = vmatprep.subr.bf16.mxu0 %v8820_v62  ;;  %3147 = vmatprep.subr.bf16.mxu1 %v8821_v26 }
 0x394   :  { %3107 = vmatpush1.bf16.msra.mxu0 %v7954_v45  ;;  %3148 = vmatpush1.bf16.msra.mxu1 %v7956_v3  ;;  %v8069_v45 = vld [vmem:[#allocation10 + $0x4] ss:$16 sps:$4 sm:$0xff]   ;;  %v8073_v3 = vld [vmem:[#allocation10] ss:$16 sps:$4 sm:$0xff]  }
 0x395   :  { %3108 = vmatprep.subr.bf16.mxu0 %v7960_v5  ;;  %3149 = vmatprep.subr.bf16.mxu1 %v7962_v53  ;;  %v8071_v53 = vld [vmem:[#allocation10 + $0xc] ss:$16 sps:$4 sm:$0xff]  }
 0x396   :  { %v6921_v56 = vpop.eup %6920  ;;  %v8083_v5 = vld [vmem:[#allocation10 + $0x2c] ss:$16 sps:$4 sm:$0xff]  }
 0x397   :  { %v2570_v6 = vmul.f32 %v6921_v56, %v6919_v63 }
 0x398   :  { %3109 = vmatpush1.bf16.msra.mxu0 %v7966_v32  ;;  %3150 = vmatpush1.bf16.msra.mxu1 %v7968_v1  ;;  %v8075_v32 = vld [vmem:[#allocation10 + $0x8] ss:$16 sps:$4 sm:$0xff]   ;;  %v8081_v1 = vld [vmem:[#allocation10 + $0x24] ss:$16 sps:$4 sm:$0xff]  }
 0x399   :  { %v2573_v20 = vpack.c.bf16 %v2570_v6, %v2570_v6  ;;  %3410 = vmatprep.subr.bf16.mxu0 %v8069_v45  ;;  %3451 = vmatprep.subr.bf16.mxu1 %v8071_v53 }
 0x39b   :  { %6044 = vst [vmem:[%s8705_s6 + $0x14] sm:$0xf] %v2573_v20  ;;  %3127 = vmatmul.mubr.bf16.vlgmr.msra.gmra.mrb[60].mxu0 %v2573_v20  ;;  %3168 = vmatmul.mubr.bf16.vlgmr.msra.gmra.mrb[60].mxu1 %v2573_v20 }
 0x39c   :  { %3442 = vmatprep.mubr.bf16.mxu0 %v8737_v43  ;;  %3483 = vmatprep.mubr.bf16.mxu1 %v8737_v43 }
 0x39d   :  { %3411 = vmatpush1.bf16.msra.mxu0 %v8073_v3  ;;  %3452 = vmatpush1.bf16.msra.mxu1 %v8075_v32 }
 0x39e   :  { %3412 = vmatprep.subr.bf16.mxu0 %v8081_v1  ;;  %3453 = vmatprep.subr.bf16.mxu1 %v8083_v5 }
 0x3a1   :  { %3413 = vmatpush1.bf16.msra.mxu0 %v8085_v39  ;;  %3454 = vmatpush1.bf16.msra.mxu1 %v8087_v2 }
 0x3a2   :  { %3414 = vmatprep.subr.bf16.mxu0 %v8093_v44  ;;  %3455 = vmatprep.subr.bf16.mxu1 %v8095_v38 }
 0x3a5   :  { %3415 = vmatpush1.bf16.msra.mxu0 %v8097_v30  ;;  %3456 = vmatpush1.bf16.msra.mxu1 %v8099_v33 }
 0x3a6   :  { %3416 = vmatprep.subr.bf16.mxu0 %v8105_v29  ;;  %3457 = vmatprep.subr.bf16.mxu1 %v8107_v31 }
 0x3a9   :  { %3417 = vmatpush1.bf16.msra.mxu0 %v8109_v35  ;;  %3458 = vmatpush1.bf16.msra.mxu1 %v8111_v19 }
 0x3aa   :  { %3418 = vmatprep.subr.bf16.mxu0 %v8117_v58  ;;  %3459 = vmatprep.subr.bf16.mxu1 %v8119_v23 }
 0x3ad   :  { %3419 = vmatpush1.bf16.msra.mxu0 %v8121_v48  ;;  %3460 = vmatpush1.bf16.msra.mxu1 %v8123_v55 }
 0x3ae   :  { %3420 = vmatprep.subr.bf16.mxu0 %v8129_v61  ;;  %3461 = vmatprep.subr.bf16.mxu1 %v8131_v40 }
 0x3b1   :  { %3421 = vmatpush1.bf16.msra.mxu0 %v8133_v42  ;;  %3462 = vmatpush1.bf16.msra.mxu1 %v8135_v9 }
 0x3b2   :  { %3422 = vmatprep.subr.bf16.mxu0 %v8141_v10  ;;  %3463 = vmatprep.subr.bf16.mxu1 %v8143_v11 }
 0x3b5   :  { %3423 = vmatpush1.bf16.msra.mxu0 %v8145_v0  ;;  %3464 = vmatpush1.bf16.msra.mxu1 %v8147_v12 }
 0x3b6   :  { %3424 = vmatprep.subr.bf16.mxu0 %v8153_v13  ;;  %3465 = vmatprep.subr.bf16.mxu1 %v8155_v14 }
 0x3b9   :  { %3425 = vmatpush1.bf16.msra.mxu0 %v8157_v8  ;;  %3466 = vmatpush1.bf16.msra.mxu1 %v8159_v15 }
 0x3ba   :  { %3726 = vmatprep.subr.bf16.mxu0 %v8165_v16  ;;  %3767 = vmatprep.subr.bf16.mxu1 %v8167_v17 }
 0x44e   :  { %v2811_v18 = vpop.f32.mrb[56].mxu0  ;;  %v2852_v21 = vpop.f32.mrb[56].mxu1 }
 0x44f   :  { %v2859_v25 = vadd.f32 %v2811_v18, %v8822_v22  ;;  %v2861_v50 = vadd.f32 %v2852_v21, %v8823_v34  ;;  %v2813_v24 = vpop.f32.mrb[57].mxu0  ;;  %v2854_v49 = vpop.f32.mrb[57].mxu1 }
 0x450   :  { %v2860_v46 = vadd.f32 %v2813_v24, %v8824_v57  ;;  %v2862_v7 = vadd.f32 %v2854_v49, %v8825_v4  ;;  %v2815_v28 = vpop.f32.mrb[58].mxu0  ;;  %v2856_v27 = vpop.f32.mrb[58].mxu1  ;;  %v8826_v49 = vld [vmem:[#allocation56_spill] sm:$0xff] }
 0x451   :  { %v6077_v36 = vmul.f32 -1.442695, %v2859_v25  ;;  %v2816_v47 = vpop.f32.mrb[59].mxu0  ;;  %v2857_v54 = vpop.f32.mrb[59].mxu1  ;;  %v8828_v28 = vld [vmem:[#allocation58_spill] sm:$0xff] }
 0x452   :  { %v6078_v52 = vmul.f32 -1.442695, %v2860_v46  ;;  %v6079_v41 = vmul.f32 -1.442695, %v2862_v7  ;;  %v8827_v46 = vld [vmem:[#allocation57_spill] sm:$0xff] }
 0x453   :  { %6922 = vpow2.f32 %v6077_v36  ;;  %v8829_v36 = vld [vmem:[#allocation59_spill] sm:$0xff] }
 0x454   :  { %6924 = vpow2.f32 %v6078_v52 }
 0x455   :  { %6926 = vpow2.f32 %v6079_v41 }
 0x456   :  { %6928 = vtanh.f32 %v2861_v50 }
 0x45d   :  { %v6923_v59 = vpop.eup %6922 }
 0x45e   :  { %v6925_v60 = vpop.eup %6924  ;;  %v2866_v62 = vadd.f32 1.0, %v6923_v59 }
 0x45f   :  { %v2872_v26 = vadd.f32 1.0, %v6925_v60  ;;  %v6927_v63 = vpop.eup %6926 }
 0x460   :  { %6930 = vrcp.f32 %v2866_v62  ;;  %v6929_v56 = vpop.eup %6928  ;;  %v2879_v21 = vadd.f32 1.0, %v6927_v63 }
 0x461   :  { %6932 = vrcp.f32 %v2872_v26 }
 0x462   :  { %6934 = vrcp.f32 %v2879_v21 }
 0x46a   :  { %v6931_v6 = vpop.eup %6930 }
 0x46b   :  { %v6933_v20 = vpop.eup %6932  ;;  %v2884_v18 = vmul.f32 %v6931_v6, %v6929_v56  ;;  %v8183_v6 = vld [vmem:[#allocation10 + $0x100] ss:$16 sps:$4 sm:$0xff]  }
 0x46c   :  { %v2883_v22 = vmul.f32 %v6933_v20, %v8018_v51  ;;  %v6935_v62 = vpop.eup %6934  ;;  %v8185_v20 = vld [vmem:[#allocation10 + $0x108] ss:$16 sps:$4 sm:$0xff]  }
 0x46e   :  { %v8176_v25 = vadd.f32 %v2884_v18, %v2883_v22  ;;  %v3128_v34 = vpop.f32.mrb[60].mxu0  ;;  %v3169_v24 = vpop.f32.mrb[60].mxu1  ;;  %v8187_v22 = vld [vmem:[#allocation10 + $0x124] ss:$16 sps:$4 sm:$0xff]  }
 0x46f   :  { %v3176_v57 = vadd.f32 %v3128_v34, %v8826_v49  ;;  %v3178_v50 = vadd.f32 %v3169_v24, %v8827_v46  ;;  %v3130_v4 = vpop.f32.mrb[61].mxu0  ;;  %v3171_v7 = vpop.f32.mrb[61].mxu1  ;;  %v8189_v34 = vld [vmem:[#allocation10 + $0x12c] ss:$16 sps:$4 sm:$0xff]   ;;  %v8196_v46 = vld [vmem:[#allocation10 + $0x120] ss:$16 sps:$4 sm:$0xff]  }
 0x470   :  { %v3177_v27 = vadd.f32 %v3130_v4, %v8828_v28  ;;  %v3179_v47 = vadd.f32 %v3171_v7, %v8829_v36  ;;  %v3132_v54 = vpop.f32.mrb[62].mxu0  ;;  %v3173_v52 = vpop.f32.mrb[62].mxu1  ;;  %6936 = vtanh.f32 %v8176_v25  ;;  %v8198_v4 = vld [vmem:[#allocation10 + $0x128] ss:$16 sps:$4 sm:$0xff]   ;;  %v8204_v7 = vld [vmem:[#allocation10 + $0x14c] ss:$16 sps:$4 sm:$0xff]  }
 0x471   :  { %v6113_v51 = vmul.f32 -1.442695, %v3176_v57  ;;  %v3133_v41 = vpop.f32.mrb[63].mxu0  ;;  %v3174_v59 = vpop.f32.mrb[63].mxu1  ;;  %v8210_v28 = vld [vmem:[#allocation10 + $0x140] ss:$16 sps:$4 sm:$0xff]  }
 0x472   :  { %v6114_v60 = vmul.f32 -1.442695, %v3177_v27  ;;  %v6115_v63 = vmul.f32 -1.442695, %v3179_v47  ;;  %v8212_v27 = vld [vmem:[#allocation10 + $0x148] ss:$16 sps:$4 sm:$0xff]  }
 0x473   :  { %6938 = vpow2.f32 %v6113_v51  ;;  %v8216_v36 = vld [vmem:[#allocation10 + $0x164] ss:$16 sps:$4 sm:$0xff]   ;;  %v8218_v47 = vld [vmem:[#allocation10 + $0x16c] ss:$16 sps:$4 sm:$0xff]   ;;  %v8222_v52 = vld [vmem:[#allocation10 + $0x160] ss:$16 sps:$4 sm:$0xff]  }
 0x474   :  { %6940 = vpow2.f32 %v6114_v60  ;;  %v8224_v51 = vld [vmem:[#allocation10 + $0x168] ss:$16 sps:$4 sm:$0xff]   ;;  %v8228_v59 = vld [vmem:[#allocation10 + $0x184] ss:$16 sps:$4 sm:$0xff]   ;;  %v8230_v60 = vld [vmem:[#allocation10 + $0x18c] ss:$16 sps:$4 sm:$0xff]  }
 0x475   :  { %6942 = vpow2.f32 %v6115_v63 }
 0x476   :  { %6944 = vtanh.f32 %v3178_v50  ;;  %v8202_v50 = vld [vmem:[#allocation10 + $0x144] ss:$16 sps:$4 sm:$0xff]  }
 0x47a   :  { %v6937_v26 = vpop.eup %6936 }
 0x47b   :  { %v2887_v56 = vmul.f32 %v6937_v26, %v6935_v62 }
 0x47d   :  { %v6939_v18 = vpop.eup %6938  ;;  %v2890_v21 = vpack.c.bf16 %v2887_v56, %v2887_v56 }
 0x47e   :  { %v6941_v24 = vpop.eup %6940  ;;  %v3183_v49 = vadd.f32 1.0, %v6939_v18 }
 0x47f   :  { %v3189_v57 = vadd.f32 1.0, %v6941_v24  ;;  %6080 = vst [vmem:[%s8704_s5 + $0xc] sm:$0xf] %v2890_v21  ;;  %3443 = vmatmul.mubr.bf16.vlgmr.msra.gmra.mrb[64].mxu0 %v2890_v21  ;;  %3484 = vmatmul.mubr.bf16.vlgmr.msra.gmra.mrb[64].mxu1 %v2890_v21  ;;  %v6943_v54 = vpop.eup %6942  ;;  %v8235_v21 = vld [vmem:[#allocation10 + $0x180] ss:$16 sps:$4 sm:$0xff]  }
 0x480   :  { %6946 = vrcp.f32 %v3183_v49  ;;  %3727 = vmatpush1.bf16.msra.mxu0 %v8183_v6  ;;  %3768 = vmatpush1.bf16.msra.mxu1 %v8185_v20  ;;  %v6945_v41 = vpop.eup %6944  ;;  %v3196_v56 = vadd.f32 1.0, %v6943_v54  ;;  %v8237_v24 = vld [vmem:[#allocation10 + $0x188] ss:$16 sps:$4 sm:$0xff]   ;;  %v8241_v49 = vld [vmem:[#allocation10 + $0x1a4] ss:$16 sps:$4 sm:$0xff]  }
 0x481   :  { %6948 = vrcp.f32 %v3189_v57  ;;  %3728 = vmatprep.subr.bf16.mxu0 %v8187_v22  ;;  %3769 = vmatprep.subr.bf16.mxu1 %v8189_v34  ;;  %8830 = vst [vmem:[#allocation16_spill] sm:$0xff] %v8237_v24  ;;  %8831 = vst [vmem:[#allocation17_spill] sm:$0xff] %v8241_v49  ;;  %v8243_v57 = vld [vmem:[#allocation10 + $0x1ac] ss:$16 sps:$4 sm:$0xff]   ;;  %v8251_v54 = vld [vmem:[#allocation10 + $0x1a8] ss:$16 sps:$4 sm:$0xff]  }
 0x482   :  { %3758 = vmatprep.mubr.bf16.mxu0 %v8737_v43  ;;  %3799 = vmatprep.mubr.bf16.mxu1 %v8737_v43  ;;  %8832 = vst [vmem:[#allocation18_spill] sm:$0xff] %v8243_v57  ;;  %6950 = vrcp.f32 %v3196_v56  ;;  %8834 = vst [vmem:[#allocation60_spill] sm:$0xff] %v8251_v54  ;;  %v8264_v56 = vld [vmem:[#allocation10 + $0x1c8] ss:$16 sps:$4 sm:$0xff]  }
 0x484   :  { %3729 = vmatpush1.bf16.msra.mxu0 %v8196_v46  ;;  %3770 = vmatpush1.bf16.msra.mxu1 %v8198_v4 }
 0x485   :  { %3730 = vmatprep.subr.bf16.mxu0 %v8202_v50  ;;  %3771 = vmatprep.subr.bf16.mxu1 %v8204_v7 }
 0x488   :  { %3731 = vmatpush1.bf16.msra.mxu0 %v8210_v28  ;;  %3772 = vmatpush1.bf16.msra.mxu1 %v8212_v27 }
 0x489   :  { %3732 = vmatprep.subr.bf16.mxu0 %v8216_v36  ;;  %3773 = vmatprep.subr.bf16.mxu1 %v8218_v47 }
 0x48a   :  { %v6947_v62 = vpop.eup %6946 }
 0x48b   :  { %v6949_v26 = vpop.eup %6948  ;;  %v3201_v63 = vmul.f32 %v6947_v62, %v6945_v41  ;;  %v8256_v62 = vld [vmem:[#allocation10 + $0x1c4] ss:$16 sps:$4 sm:$0xff]  }
 0x48c   :  { %v3200_v18 = vmul.f32 %v6949_v26, %v8047_v37  ;;  %3733 = vmatpush1.bf16.msra.mxu0 %v8222_v52  ;;  %3774 = vmatpush1.bf16.msra.mxu1 %v8224_v51  ;;  %v8249_v37 = vld [vmem:[#allocation10 + $0x1a0] ss:$16 sps:$4 sm:$0xff]   ;;  %8835 = vst [vmem:[#allocation61_spill] sm:$0xff] %v8256_v62  ;;  %v8258_v26 = vld [vmem:[#allocation10 + $0x1cc] ss:$16 sps:$4 sm:$0xff]  }
 0x48d   :  { %3734 = vmatprep.subr.bf16.mxu0 %v8228_v59  ;;  %3775 = vmatprep.subr.bf16.mxu1 %v8230_v60  ;;  %8833 = vst [vmem:[#allocation19_spill] sm:$0xff] %v8249_v37  ;;  %8836 = vst [vmem:[#allocation62_spill] sm:$0xff] %v8258_v26 }
 0x48e   :  { %v8245_v41 = vadd.f32 %v3201_v63, %v3200_v18  ;;  %v8262_v63 = vld [vmem:[#allocation10 + $0x1c0] ss:$16 sps:$4 sm:$0xff]   ;;  %v8268_v18 = vld [vmem:[#allocation10 + $0x1e4] ss:$16 sps:$4 sm:$0xff]  }
 0x490   :  { %3735 = vmatpush1.bf16.msra.mxu0 %v8235_v21  ;;  %3776 = vmatpush1.bf16.msra.mxu1 %v8237_v24  ;;  %6952 = vtanh.f32 %v8245_v41 }
 0x491   :  { %3736 = vmatprep.subr.bf16.mxu0 %v8241_v49  ;;  %3777 = vmatprep.subr.bf16.mxu1 %v8243_v57  ;;  %v8270_v49 = vld [vmem:[#allocation10 + $0x1ec] ss:$16 sps:$4 sm:$0xff]   ;;  %v8274_v57 = vld [vmem:[#allocation10 + $0x1e0] ss:$16 sps:$4 sm:$0xff]  }
 0x494   :  { %3737 = vmatpush1.bf16.msra.mxu0 %v8249_v37  ;;  %3778 = vmatpush1.bf16.msra.mxu1 %v8251_v54  ;;  %v8276_v37 = vld [vmem:[#allocation10 + $0x1e8] ss:$16 sps:$4 sm:$0xff]   ;;  %v6951_v54 = vpop.eup %6950 }
 0x495   :  { %3738 = vmatprep.subr.bf16.mxu0 %v8256_v62  ;;  %3779 = vmatprep.subr.bf16.mxu1 %v8258_v26 }
 0x498   :  { %3739 = vmatpush1.bf16.msra.mxu0 %v8262_v63  ;;  %3780 = vmatpush1.bf16.msra.mxu1 %v8264_v56 }
 0x499   :  { %3740 = vmatprep.subr.bf16.mxu0 %v8268_v18  ;;  %3781 = vmatprep.subr.bf16.mxu1 %v8270_v49 }
 0x49a   :  { %v6953_v62 = vpop.eup %6952 }
 0x49b   :  { %v3204_v24 = vmul.f32 %v6953_v62, %v6951_v54  ;;  %v8842_v54 = vld [vmem:[#allocation53_spill] sm:$0xff] }
 0x49c   :  { %3741 = vmatpush1.bf16.msra.mxu0 %v8274_v57  ;;  %3782 = vmatpush1.bf16.msra.mxu1 %v8276_v37 }
 0x49d   :  { %v3207_v26 = vpack.c.bf16 %v3204_v24, %v3204_v24  ;;  %4042 = vmatprep.subr.bf16.mxu0 %v8069_v45  ;;  %4083 = vmatprep.subr.bf16.mxu1 %v8071_v53 }
 0x49f   :  { %6116 = vst [vmem:[%s8705_s6 + $0x10] sm:$0xf] %v3207_v26  ;;  %3759 = vmatmul.mubr.bf16.vlgmr.msra.gmra.mrb[68].mxu0 %v3207_v26  ;;  %3800 = vmatmul.mubr.bf16.vlgmr.msra.gmra.mrb[68].mxu1 %v3207_v26 }
 0x4a0   :  { %4043 = vmatpush1.bf16.msra.mxu0 %v8073_v3  ;;  %4084 = vmatpush1.bf16.msra.mxu1 %v8075_v32  ;;  %v8837_v3 = vld [vmem:[#allocation24_spill] sm:$0xff] }
 0x4a1   :  { %4044 = vmatprep.subr.bf16.mxu0 %v8081_v1  ;;  %4085 = vmatprep.subr.bf16.mxu1 %v8083_v5  ;;  %v8838_v1 = vld [vmem:[#allocation25_spill] sm:$0xff] }
 0x4a2   :  { %4074 = vmatprep.mubr.bf16.mxu0 %v8737_v43  ;;  %4115 = vmatprep.mubr.bf16.mxu1 %v8737_v43 }
 0x4a4   :  { %4045 = vmatpush1.bf16.msra.mxu0 %v8085_v39  ;;  %4086 = vmatpush1.bf16.msra.mxu1 %v8087_v2 }
 0x4a5   :  { %4046 = vmatprep.subr.bf16.mxu0 %v8093_v44  ;;  %4087 = vmatprep.subr.bf16.mxu1 %v8095_v38  ;;  %v8839_v44 = vld [vmem:[#allocation26_spill] sm:$0xff] }
 0x4a8   :  { %4047 = vmatpush1.bf16.msra.mxu0 %v8097_v30  ;;  %4088 = vmatpush1.bf16.msra.mxu1 %v8099_v33  ;;  %v8840_v30 = vld [vmem:[#allocation27_spill] sm:$0xff] }
 0x4a9   :  { %4048 = vmatprep.subr.bf16.mxu0 %v8105_v29  ;;  %4089 = vmatprep.subr.bf16.mxu1 %v8107_v31 }
 0x4ac   :  { %4049 = vmatpush1.bf16.msra.mxu0 %v8109_v35  ;;  %4090 = vmatpush1.bf16.msra.mxu1 %v8111_v19 }
 0x4ad   :  { %4050 = vmatprep.subr.bf16.mxu0 %v8117_v58  ;;  %4091 = vmatprep.subr.bf16.mxu1 %v8119_v23 }
 0x4b0   :  { %4051 = vmatpush1.bf16.msra.mxu0 %v8121_v48  ;;  %4092 = vmatpush1.bf16.msra.mxu1 %v8123_v55 }
 0x4b1   :  { %4052 = vmatprep.subr.bf16.mxu0 %v8129_v61  ;;  %4093 = vmatprep.subr.bf16.mxu1 %v8131_v40 }
 0x4b4   :  { %4053 = vmatpush1.bf16.msra.mxu0 %v8133_v42  ;;  %4094 = vmatpush1.bf16.msra.mxu1 %v8135_v9 }
 0x4b5   :  { %4054 = vmatprep.subr.bf16.mxu0 %v8141_v10  ;;  %4095 = vmatprep.subr.bf16.mxu1 %v8143_v11 }
 0x4b8   :  { %4055 = vmatpush1.bf16.msra.mxu0 %v8145_v0  ;;  %4096 = vmatpush1.bf16.msra.mxu1 %v8147_v12 }
 0x4b9   :  { %4056 = vmatprep.subr.bf16.mxu0 %v8153_v13  ;;  %4097 = vmatprep.subr.bf16.mxu1 %v8155_v14 }
 0x4bc   :  { %4057 = vmatpush1.bf16.msra.mxu0 %v8157_v8  ;;  %4098 = vmatpush1.bf16.msra.mxu1 %v8159_v15 }
 0x4bd   :  { %4358 = vmatprep.subr.bf16.mxu0 %v8165_v16  ;;  %4399 = vmatprep.subr.bf16.mxu1 %v8167_v17  ;;  %v8841_v17 = vld [vmem:[#allocation52_spill] sm:$0xff] }
 0x552   :  { %v3444_v45 = vpop.f32.mrb[64].mxu0  ;;  %v3485_v53 = vpop.f32.mrb[64].mxu1 }
 0x553   :  { %v3492_v32 = vadd.f32 %v3444_v45, %v8837_v3  ;;  %v3494_v5 = vadd.f32 %v3485_v53, %v8838_v1  ;;  %v3446_v39 = vpop.f32.mrb[65].mxu0  ;;  %v3487_v2 = vpop.f32.mrb[65].mxu1  ;;  %v8843_v53 = vld [vmem:[#allocation54_spill] sm:$0xff] }
 0x554   :  { %v3493_v38 = vadd.f32 %v3446_v39, %v8839_v44  ;;  %v3495_v33 = vadd.f32 %v3487_v2, %v8840_v30  ;;  %v3448_v29 = vpop.f32.mrb[66].mxu0  ;;  %v3489_v31 = vpop.f32.mrb[66].mxu1 }
 0x555   :  { %v6149_v35 = vmul.f32 -1.442695, %v3492_v32  ;;  %v3449_v19 = vpop.f32.mrb[67].mxu0  ;;  %v3490_v58 = vpop.f32.mrb[67].mxu1  ;;  %v8844_v32 = vld [vmem:[#allocation55_spill] sm:$0xff] }
 0x556   :  { %v6150_v23 = vmul.f32 -1.442695, %v3493_v38  ;;  %v6151_v48 = vmul.f32 -1.442695, %v3495_v33 }
 0x557   :  { %6954 = vpow2.f32 %v6149_v35 }
 0x558   :  { %6956 = vpow2.f32 %v6150_v23 }
 0x559   :  { %6958 = vpow2.f32 %v6151_v48 }
 0x55a   :  { %6960 = vtanh.f32 %v3494_v5 }
 0x561   :  { %v6955_v55 = vpop.eup %6954 }
 0x562   :  { %v6957_v61 = vpop.eup %6956  ;;  %v3499_v40 = vadd.f32 1.0, %v6955_v55 }
 0x563   :  { %v3505_v42 = vadd.f32 1.0, %v6957_v61  ;;  %v6959_v9 = vpop.eup %6958  ;;  %v8393_v61 = vld [vmem:[#allocation10 + $0x20] ss:$16 sps:$4 sm:$0xff]  }
 0x564   :  { %6962 = vrcp.f32 %v3499_v40  ;;  %v6961_v10 = vpop.eup %6960  ;;  %v3512_v13 = vadd.f32 1.0, %v6959_v9  ;;  %v8395_v40 = vld [vmem:[#allocation10 + $0x28] ss:$16 sps:$4 sm:$0xff]   ;;  %v8403_v9 = vld [vmem:[#allocation10 + $0x4c] ss:$16 sps:$4 sm:$0xff]  }
 0x565   :  { %6964 = vrcp.f32 %v3505_v42  ;;  %v8401_v42 = vld [vmem:[#allocation10 + $0x44] ss:$16 sps:$4 sm:$0xff]  }
 0x566   :  { %6966 = vrcp.f32 %v3512_v13  ;;  %v8417_v13 = vld [vmem:[#allocation10 + $0x60] ss:$16 sps:$4 sm:$0xff]  }
 0x56e   :  { %v6963_v11 = vpop.eup %6962 }
 0x56f   :  { %v6965_v0 = vpop.eup %6964  ;;  %v3517_v12 = vmul.f32 %v6963_v11, %v6961_v10  ;;  %v8405_v10 = vld [vmem:[#allocation10 + $0x40] ss:$16 sps:$4 sm:$0xff]   ;;  %v8407_v11 = vld [vmem:[#allocation10 + $0x48] ss:$16 sps:$4 sm:$0xff]  }
 0x570   :  { %v3516_v14 = vmul.f32 %v6965_v0, %v8176_v25  ;;  %v6967_v30 = vpop.eup %6966  ;;  %v8413_v0 = vld [vmem:[#allocation10 + $0x64] ss:$16 sps:$4 sm:$0xff]  }
 0x572   :  { %v8326_v8 = vadd.f32 %v3517_v12, %v3516_v14  ;;  %v3760_v15 = vpop.f32.mrb[68].mxu0  ;;  %v3801_v16 = vpop.f32.mrb[68].mxu1  ;;  %v8415_v12 = vld [vmem:[#allocation10 + $0x6c] ss:$16 sps:$4 sm:$0xff]   ;;  %v8419_v14 = vld [vmem:[#allocation10 + $0x68] ss:$16 sps:$4 sm:$0xff]  }
 0x573   :  { %v3808_v24 = vadd.f32 %v3760_v15, %v8841_v17  ;;  %v3810_v62 = vadd.f32 %v3801_v16, %v8842_v54  ;;  %v3762_v26 = vpop.f32.mrb[69].mxu0  ;;  %v3803_v45 = vpop.f32.mrb[69].mxu1  ;;  %v8425_v15 = vld [vmem:[#allocation10 + $0x84] ss:$16 sps:$4 sm:$0xff]   ;;  %v8427_v16 = vld [vmem:[#allocation10 + $0x8c] ss:$16 sps:$4 sm:$0xff]  }
 0x574   :  { %v3809_v3 = vadd.f32 %v3762_v26, %v8843_v53  ;;  %v3811_v1 = vadd.f32 %v3803_v45, %v8844_v32  ;;  %v3764_v5 = vpop.f32.mrb[70].mxu0  ;;  %v3805_v39 = vpop.f32.mrb[70].mxu1  ;;  %6968 = vtanh.f32 %v8326_v8  ;;  %v8429_v17 = vld [vmem:[#allocation10 + $0x80] ss:$16 sps:$4 sm:$0xff]   ;;  %v8437_v54 = vld [vmem:[#allocation10 + $0xa4] ss:$16 sps:$4 sm:$0xff]  }
 0x575   :  { %v6185_v25 = vmul.f32 -1.442695, %v3808_v24  ;;  %v3765_v2 = vpop.f32.mrb[71].mxu0  ;;  %v3806_v44 = vpop.f32.mrb[71].mxu1  ;;  %v8431_v24 = vld [vmem:[#allocation10 + $0x88] ss:$16 sps:$4 sm:$0xff]  }
 0x576   :  { %v6186_v38 = vmul.f32 -1.442695, %v3809_v3  ;;  %v6187_v29 = vmul.f32 -1.442695, %v3811_v1  ;;  %v8441_v26 = vld [vmem:[#allocation10 + $0xa0] ss:$16 sps:$4 sm:$0xff]  }
 0x577   :  { %6970 = vpow2.f32 %v6185_v25  ;;  %v8443_v45 = vld [vmem:[#allocation10 + $0xa8] ss:$16 sps:$4 sm:$0xff]   ;;  %v8449_v53 = vld [vmem:[#allocation10 + $0xc4] ss:$16 sps:$4 sm:$0xff]   ;;  %v8451_v3 = vld [vmem:[#allocation10 + $0xcc] ss:$16 sps:$4 sm:$0xff]  }
 0x578   :  { %6972 = vpow2.f32 %v6186_v38  ;;  %v8453_v32 = vld [vmem:[#allocation10 + $0xc0] ss:$16 sps:$4 sm:$0xff]   ;;  %v8455_v1 = vld [vmem:[#allocation10 + $0xc8] ss:$16 sps:$4 sm:$0xff]   ;;  %v8461_v5 = vld [vmem:[#allocation10 + $0xe4] ss:$16 sps:$4 sm:$0xff]  }
 0x579   :  { %6974 = vpow2.f32 %v6187_v29  ;;  %v8463_v39 = vld [vmem:[#allocation10 + $0xec] ss:$16 sps:$4 sm:$0xff]   ;;  %v8465_v25 = vld [vmem:[#allocation10 + $0xe0] ss:$16 sps:$4 sm:$0xff]   ;;  %v8467_v2 = vld [vmem:[#allocation10 + $0xe8] ss:$16 sps:$4 sm:$0xff]  }
 0x57a   :  { %6976 = vtanh.f32 %v3810_v62  ;;  %v8439_v62 = vld [vmem:[#allocation10 + $0xac] ss:$16 sps:$4 sm:$0xff]   ;;  %v8473_v44 = vld [vmem:[#allocation10 + $0x104] ss:$16 sps:$4 sm:$0xff]  }
 0x57b   :  { %v8475_v38 = vld [vmem:[#allocation10 + $0x10c] ss:$16 sps:$4 sm:$0xff]   ;;  %v8852_v29 = vld [vmem:[#allocation28_spill] sm:$0xff] }
 0x57e   :  { %v6969_v33 = vpop.eup %6968 }
 0x57f   :  { %v3520_v31 = vmul.f32 %v6969_v33, %v6967_v30 }
 0x581   :  { %v6971_v35 = vpop.eup %6970  ;;  %v3523_v19 = vpack.c.bf16 %v3520_v31, %v3520_v31 }
 0x582   :  { %v6973_v58 = vpop.eup %6972  ;;  %v3815_v23 = vadd.f32 1.0, %v6971_v35  ;;  %v8853_v35 = vld [vmem:[#allocation29_spill] sm:$0xff] }
 0x583   :  { %v3821_v48 = vadd.f32 1.0, %v6973_v58  ;;  %6152 = vst [vmem:[%s8704_s5 + $0x10] sm:$0xf] %v3523_v19  ;;  %4075 = vmatmul.mubr.bf16.vlgmr.msra.gmra.mrb[72].mxu0 %v3523_v19  ;;  %4116 = vmatmul.mubr.bf16.vlgmr.msra.gmra.mrb[72].mxu1 %v3523_v19 }
 0x584   :  { %6978 = vrcp.f32 %v3815_v23  ;;  %4359 = vmatpush1.bf16.msra.mxu0 %v8183_v6  ;;  %4400 = vmatpush1.bf16.msra.mxu1 %v8185_v20  ;;  %v6975_v6 = vpop.eup %6974 }
 0x585   :  { %6980 = vrcp.f32 %v3821_v48  ;;  %4360 = vmatprep.subr.bf16.mxu0 %v8187_v22  ;;  %4401 = vmatprep.subr.bf16.mxu1 %v8189_v34  ;;  %v6977_v20 = vpop.eup %6976  ;;  %v8854_v48 = vld [vmem:[#allocation30_spill] sm:$0xff] }
 0x586   :  { %4390 = vmatprep.mubr.bf16.mxu0 %v8737_v43  ;;  %4431 = vmatprep.mubr.bf16.mxu1 %v8737_v43 }
 0x588   :  { %4361 = vmatpush1.bf16.msra.mxu0 %v8196_v46  ;;  %4402 = vmatpush1.bf16.msra.mxu1 %v8198_v4  ;;  %v3828_v46 = vadd.f32 1.0, %v6975_v6 }
 0x589   :  { %4362 = vmatprep.subr.bf16.mxu0 %v8202_v50  ;;  %4403 = vmatprep.subr.bf16.mxu1 %v8204_v7  ;;  %v8845_v7 = vld [vmem:[#allocation16_spill] sm:$0xff] }
 0x58a   :  { %6982 = vrcp.f32 %v3828_v46 }
 0x58c   :  { %4363 = vmatpush1.bf16.msra.mxu0 %v8210_v28  ;;  %4404 = vmatpush1.bf16.msra.mxu1 %v8212_v27  ;;  %v8846_v28 = vld [vmem:[#allocation17_spill] sm:$0xff]  ;;  %v8847_v27 = vld [vmem:[#allocation18_spill] sm:$0xff] }
 0x58d   :  { %4364 = vmatprep.subr.bf16.mxu0 %v8216_v36  ;;  %4405 = vmatprep.subr.bf16.mxu1 %v8218_v47  ;;  %v8848_v36 = vld [vmem:[#allocation19_spill] sm:$0xff]  ;;  %v8849_v47 = vld [vmem:[#allocation60_spill] sm:$0xff] }
 0x58e   :  { %v6979_v22 = vpop.eup %6978 }
 0x58f   :  { %v6981_v34 = vpop.eup %6980  ;;  %v3833_v55 = vmul.f32 %v6979_v22, %v6977_v20  ;;  %v8855_v20 = vld [vmem:[#allocation31_spill] sm:$0xff] }
 0x590   :  { %v3832_v4 = vmul.f32 %v6981_v34, %v8245_v41  ;;  %4365 = vmatpush1.bf16.msra.mxu0 %v8222_v52  ;;  %4406 = vmatpush1.bf16.msra.mxu1 %v8224_v51  ;;  %v8850_v52 = vld [vmem:[#allocation61_spill] sm:$0xff]  ;;  %v8851_v51 = vld [vmem:[#allocation62_spill] sm:$0xff] }
 0x591   :  { %4366 = vmatprep.subr.bf16.mxu0 %v8228_v59  ;;  %4407 = vmatprep.subr.bf16.mxu1 %v8230_v60 }
 0x592   :  { %v8355_v50 = vadd.f32 %v3833_v55, %v3832_v4 }
 0x594   :  { %4367 = vmatpush1.bf16.msra.mxu0 %v8235_v21  ;;  %4408 = vmatpush1.bf16.msra.mxu1 %v8845_v7  ;;  %6984 = vtanh.f32 %v8355_v50  ;;  %v6983_v59 = vpop.eup %6982 }
 0x595   :  { %4368 = vmatprep.subr.bf16.mxu0 %v8846_v28  ;;  %4409 = vmatprep.subr.bf16.mxu1 %v8847_v27 }
 0x598   :  { %4369 = vmatpush1.bf16.msra.mxu0 %v8848_v36  ;;  %4410 = vmatpush1.bf16.msra.mxu1 %v8849_v47 }
 0x599   :  { %4370 = vmatprep.subr.bf16.mxu0 %v8850_v52  ;;  %4411 = vmatprep.subr.bf16.mxu1 %v8851_v51 }
 0x59c   :  { %4371 = vmatpush1.bf16.msra.mxu0 %v8262_v63  ;;  %4412 = vmatpush1.bf16.msra.mxu1 %v8264_v56  ;;  %v8377_v63 = vld [vmem:[#allocation10 + $0x4] ss:$16 sps:$4 sm:$0xff]   ;;  %v8381_v56 = vld [vmem:[#allocation10] ss:$16 sps:$4 sm:$0xff]  }
 0x59d   :  { %4372 = vmatprep.subr.bf16.mxu0 %v8268_v18  ;;  %4413 = vmatprep.subr.bf16.mxu1 %v8270_v49  ;;  %v8379_v49 = vld [vmem:[#allocation10 + $0xc] ss:$16 sps:$4 sm:$0xff]  }
 0x59e   :  { %v6985_v60 = vpop.eup %6984  ;;  %v8391_v18 = vld [vmem:[#allocation10 + $0x2c] ss:$16 sps:$4 sm:$0xff]  }
 0x59f   :  { %v3836_v21 = vmul.f32 %v6985_v60, %v6983_v59 }
 0x5a0   :  { %4373 = vmatpush1.bf16.msra.mxu0 %v8274_v57  ;;  %4414 = vmatpush1.bf16.msra.mxu1 %v8276_v37  ;;  %v8383_v57 = vld [vmem:[#allocation10 + $0x8] ss:$16 sps:$4 sm:$0xff]   ;;  %v8389_v37 = vld [vmem:[#allocation10 + $0x24] ss:$16 sps:$4 sm:$0xff]  }
 0x5a1   :  { %v3839_v41 = vpack.c.bf16 %v3836_v21, %v3836_v21  ;;  %4674 = vmatprep.subr.bf16.mxu0 %v8377_v63  ;;  %4715 = vmatprep.subr.bf16.mxu1 %v8379_v49 }
 0x5a3   :  { %6188 = vst [vmem:[%s8705_s6 + $0xc] sm:$0xf] %v3839_v41  ;;  %4391 = vmatmul.mubr.bf16.vlgmr.msra.gmra.mrb[76].mxu0 %v3839_v41  ;;  %4432 = vmatmul.mubr.bf16.vlgmr.msra.gmra.mrb[76].mxu1 %v3839_v41 }
 0x5a4   :  { %4706 = vmatprep.mubr.bf16.mxu0 %v8737_v43  ;;  %4747 = vmatprep.mubr.bf16.mxu1 %v8737_v43 }
 0x5a5   :  { %4675 = vmatpush1.bf16.msra.mxu0 %v8381_v56  ;;  %4716 = vmatpush1.bf16.msra.mxu1 %v8383_v57 }
 0x5a6   :  { %4676 = vmatprep.subr.bf16.mxu0 %v8389_v37  ;;  %4717 = vmatprep.subr.bf16.mxu1 %v8391_v18 }
 0x5a9   :  { %4677 = vmatpush1.bf16.msra.mxu0 %v8393_v61  ;;  %4718 = vmatpush1.bf16.msra.mxu1 %v8395_v40 }
 0x5aa   :  { %4678 = vmatprep.subr.bf16.mxu0 %v8401_v42  ;;  %4719 = vmatprep.subr.bf16.mxu1 %v8403_v9 }
 0x5ad   :  { %4679 = vmatpush1.bf16.msra.mxu0 %v8405_v10  ;;  %4720 = vmatpush1.bf16.msra.mxu1 %v8407_v11 }
 0x5ae   :  { %4680 = vmatprep.subr.bf16.mxu0 %v8413_v0  ;;  %4721 = vmatprep.subr.bf16.mxu1 %v8415_v12 }
 0x5b1   :  { %4681 = vmatpush1.bf16.msra.mxu0 %v8417_v13  ;;  %4722 = vmatpush1.bf16.msra.mxu1 %v8419_v14 }
 0x5b2   :  { %4682 = vmatprep.subr.bf16.mxu0 %v8425_v15  ;;  %4723 = vmatprep.subr.bf16.mxu1 %v8427_v16 }
 0x5b5   :  { %4683 = vmatpush1.bf16.msra.mxu0 %v8429_v17  ;;  %4724 = vmatpush1.bf16.msra.mxu1 %v8431_v24 }
 0x5b6   :  { %4684 = vmatprep.subr.bf16.mxu0 %v8437_v54  ;;  %4725 = vmatprep.subr.bf16.mxu1 %v8439_v62 }
 0x5b9   :  { %4685 = vmatpush1.bf16.msra.mxu0 %v8441_v26  ;;  %4726 = vmatpush1.bf16.msra.mxu1 %v8443_v45 }
 0x5ba   :  { %4686 = vmatprep.subr.bf16.mxu0 %v8449_v53  ;;  %4727 = vmatprep.subr.bf16.mxu1 %v8451_v3 }
 0x5bd   :  { %4687 = vmatpush1.bf16.msra.mxu0 %v8453_v32  ;;  %4728 = vmatpush1.bf16.msra.mxu1 %v8455_v1 }
 0x5be   :  { %4688 = vmatprep.subr.bf16.mxu0 %v8461_v5  ;;  %4729 = vmatprep.subr.bf16.mxu1 %v8463_v39 }
 0x5c1   :  { %4689 = vmatpush1.bf16.msra.mxu0 %v8465_v25  ;;  %4730 = vmatpush1.bf16.msra.mxu1 %v8467_v2 }
 0x5c2   :  { %4990 = vmatprep.subr.bf16.mxu0 %v8473_v44  ;;  %5031 = vmatprep.subr.bf16.mxu1 %v8475_v38 }
 0x656   :  { %v4076_v30 = vpop.f32.mrb[72].mxu0  ;;  %v4117_v33 = vpop.f32.mrb[72].mxu1 }
 0x657   :  { %v4124_v31 = vadd.f32 %v4076_v30, %v8852_v29  ;;  %v4126_v19 = vadd.f32 %v4117_v33, %v8853_v35  ;;  %v4078_v58 = vpop.f32.mrb[73].mxu0  ;;  %v4119_v23 = vpop.f32.mrb[73].mxu1 }
 0x658   :  { %v4125_v6 = vadd.f32 %v4078_v58, %v8854_v48  ;;  %v4127_v22 = vadd.f32 %v4119_v23, %v8855_v20  ;;  %v4080_v34 = vpop.f32.mrb[74].mxu0  ;;  %v4121_v55 = vpop.f32.mrb[74].mxu1  ;;  %v8856_v23 = vld [vmem:[#allocation48_spill] sm:$0xff] }
 0x659   :  { %v6221_v46 = vmul.f32 -1.442695, %v4124_v31  ;;  %v4081_v4 = vpop.f32.mrb[75].mxu0  ;;  %v4122_v7 = vpop.f32.mrb[75].mxu1  ;;  %v8858_v34 = vld [vmem:[#allocation50_spill] sm:$0xff] }
 0x65a   :  { %v6222_v28 = vmul.f32 -1.442695, %v4125_v6  ;;  %v6223_v27 = vmul.f32 -1.442695, %v4127_v22  ;;  %v8857_v6 = vld [vmem:[#allocation49_spill] sm:$0xff] }
 0x65b   :  { %6986 = vpow2.f32 %v6221_v46  ;;  %v8859_v46 = vld [vmem:[#allocation51_spill] sm:$0xff] }
 0x65c   :  { %6988 = vpow2.f32 %v6222_v28 }
 0x65d   :  { %6990 = vpow2.f32 %v6223_v27 }
 0x65e   :  { %6992 = vtanh.f32 %v4126_v19 }
 0x665   :  { %v6987_v36 = vpop.eup %6986 }
 0x666   :  { %v6989_v47 = vpop.eup %6988  ;;  %v4131_v52 = vadd.f32 1.0, %v6987_v36 }
 0x667   :  { %v4137_v51 = vadd.f32 1.0, %v6989_v47  ;;  %v6991_v59 = vpop.eup %6990 }
 0x668   :  { %6994 = vrcp.f32 %v4131_v52  ;;  %v6993_v60 = vpop.eup %6992  ;;  %v4144_v33 = vadd.f32 1.0, %v6991_v59 }
 0x669   :  { %6996 = vrcp.f32 %v4137_v51 }
 0x66a   :  { %6998 = vrcp.f32 %v4144_v33 }
 0x672   :  { %v6995_v21 = vpop.eup %6994 }
 0x673   :  { %v6997_v41 = vpop.eup %6996  ;;  %v4149_v30 = vmul.f32 %v6995_v21, %v6993_v60  ;;  %v8491_v21 = vld [vmem:[#allocation10 + $0x100] ss:$16 sps:$4 sm:$0xff]  }
 0x674   :  { %v4148_v29 = vmul.f32 %v6997_v41, %v8326_v8  ;;  %v6999_v52 = vpop.eup %6998  ;;  %v8493_v41 = vld [vmem:[#allocation10 + $0x108] ss:$16 sps:$4 sm:$0xff]  }
 0x676   :  { %v8484_v31 = vadd.f32 %v4149_v30, %v4148_v29  ;;  %v4392_v35 = vpop.f32.mrb[76].mxu0  ;;  %v4433_v58 = vpop.f32.mrb[76].mxu1  ;;  %v8495_v29 = vld [vmem:[#allocation10 + $0x124] ss:$16 sps:$4 sm:$0xff]  }
 0x677   :  { %v4440_v48 = vadd.f32 %v4392_v35, %v8856_v23  ;;  %v4442_v19 = vadd.f32 %v4433_v58, %v8857_v6  ;;  %v4394_v20 = vpop.f32.mrb[77].mxu0  ;;  %v4435_v22 = vpop.f32.mrb[77].mxu1  ;;  %v8497_v35 = vld [vmem:[#allocation10 + $0x12c] ss:$16 sps:$4 sm:$0xff]   ;;  %v8504_v6 = vld [vmem:[#allocation10 + $0x120] ss:$16 sps:$4 sm:$0xff]  }
 0x678   :  { %v4441_v55 = vadd.f32 %v4394_v20, %v8858_v34  ;;  %v4443_v4 = vadd.f32 %v4435_v22, %v8859_v46  ;;  %v4396_v7 = vpop.f32.mrb[78].mxu0  ;;  %v4437_v28 = vpop.f32.mrb[78].mxu1  ;;  %7000 = vtanh.f32 %v8484_v31  ;;  %v8506_v20 = vld [vmem:[#allocation10 + $0x128] ss:$16 sps:$4 sm:$0xff]   ;;  %v8512_v22 = vld [vmem:[#allocation10 + $0x14c] ss:$16 sps:$4 sm:$0xff]  }
 0x679   :  { %v6257_v8 = vmul.f32 -1.442695, %v4440_v48  ;;  %v4397_v27 = vpop.f32.mrb[79].mxu0  ;;  %v4438_v36 = vpop.f32.mrb[79].mxu1  ;;  %v8518_v34 = vld [vmem:[#allocation10 + $0x140] ss:$16 sps:$4 sm:$0xff]  }
 0x67a   :  { %v6258_v47 = vmul.f32 -1.442695, %v4441_v55  ;;  %v6259_v59 = vmul.f32 -1.442695, %v4443_v4  ;;  %v8520_v55 = vld [vmem:[#allocation10 + $0x148] ss:$16 sps:$4 sm:$0xff]  }
 0x67b   :  { %7002 = vpow2.f32 %v6257_v8  ;;  %v8524_v46 = vld [vmem:[#allocation10 + $0x164] ss:$16 sps:$4 sm:$0xff]   ;;  %v8526_v4 = vld [vmem:[#allocation10 + $0x16c] ss:$16 sps:$4 sm:$0xff]   ;;  %v8530_v28 = vld [vmem:[#allocation10 + $0x160] ss:$16 sps:$4 sm:$0xff]  }
 0x67c   :  { %7004 = vpow2.f32 %v6258_v47  ;;  %v8532_v8 = vld [vmem:[#allocation10 + $0x168] ss:$16 sps:$4 sm:$0xff]   ;;  %v8536_v36 = vld [vmem:[#allocation10 + $0x184] ss:$16 sps:$4 sm:$0xff]   ;;  %v8538_v47 = vld [vmem:[#allocation10 + $0x18c] ss:$16 sps:$4 sm:$0xff]  }
 0x67d   :  { %7006 = vpow2.f32 %v6259_v59 }
 0x67e   :  { %7008 = vtanh.f32 %v4442_v19  ;;  %v8510_v19 = vld [vmem:[#allocation10 + $0x144] ss:$16 sps:$4 sm:$0xff]  }
 0x682   :  { %v7001_v51 = vpop.eup %7000 }
 0x683   :  { %v4152_v60 = vmul.f32 %v7001_v51, %v6999_v52 }
 0x685   :  { %v7003_v30 = vpop.eup %7002  ;;  %v4155_v33 = vpack.c.bf16 %v4152_v60, %v4152_v60 }
 0x686   :  { %v7005_v58 = vpop.eup %7004  ;;  %v4447_v23 = vadd.f32 1.0, %v7003_v30 }
 0x687   :  { %v4453_v48 = vadd.f32 1.0, %v7005_v58  ;;  %6224 = vst [vmem:[%s8704_s5 + $0x14] sm:$0xf] %v4155_v33  ;;  %4707 = vmatmul.mubr.bf16.vlgmr.msra.gmra.mrb[80].mxu0 %v4155_v33  ;;  %4748 = vmatmul.mubr.bf16.vlgmr.msra.gmra.mrb[80].mxu1 %v4155_v33  ;;  %v7007_v7 = vpop.eup %7006  ;;  %v8543_v33 = vld [vmem:[#allocation10 + $0x180] ss:$16 sps:$4 sm:$0xff]  }
 0x688   :  { %7010 = vrcp.f32 %v4447_v23  ;;  %4991 = vmatpush1.bf16.msra.mxu0 %v8491_v21  ;;  %5032 = vmatpush1.bf16.msra.mxu1 %v8493_v41  ;;  %v7009_v27 = vpop.eup %7008  ;;  %v4460_v60 = vadd.f32 1.0, %v7007_v7  ;;  %v8545_v58 = vld [vmem:[#allocation10 + $0x188] ss:$16 sps:$4 sm:$0xff]   ;;  %v8549_v23 = vld [vmem:[#allocation10 + $0x1a4] ss:$16 sps:$4 sm:$0xff]  }
 0x689   :  { %7012 = vrcp.f32 %v4453_v48  ;;  %4992 = vmatprep.subr.bf16.mxu0 %v8495_v29  ;;  %5033 = vmatprep.subr.bf16.mxu1 %v8497_v35  ;;  %8860 = vst [vmem:[#allocation63_spill] sm:$0xff] %v8545_v58  ;;  %8861 = vst [vmem:[#allocation14_spill] sm:$0xff] %v8549_v23  ;;  %v8551_v48 = vld [vmem:[#allocation10 + $0x1ac] ss:$16 sps:$4 sm:$0xff]   ;;  %v8559_v7 = vld [vmem:[#allocation10 + $0x1a8] ss:$16 sps:$4 sm:$0xff]  }
 0x68a   :  { %5022 = vmatprep.mubr.bf16.mxu0 %v8737_v43  ;;  %5063 = vmatprep.mubr.bf16.mxu1 %v8737_v43  ;;  %8862 = vst [vmem:[#allocation15_spill] sm:$0xff] %v8551_v48  ;;  %7014 = vrcp.f32 %v4460_v60  ;;  %8864 = vst [vmem:[#allocation65_spill] sm:$0xff] %v8559_v7  ;;  %v8572_v60 = vld [vmem:[#allocation10 + $0x1c8] ss:$16 sps:$4 sm:$0xff]  }
 0x68c   :  { %4993 = vmatpush1.bf16.msra.mxu0 %v8504_v6  ;;  %5034 = vmatpush1.bf16.msra.mxu1 %v8506_v20 }
 0x68d   :  { %4994 = vmatprep.subr.bf16.mxu0 %v8510_v19  ;;  %5035 = vmatprep.subr.bf16.mxu1 %v8512_v22 }
 0x690   :  { %4995 = vmatpush1.bf16.msra.mxu0 %v8518_v34  ;;  %5036 = vmatpush1.bf16.msra.mxu1 %v8520_v55 }
 0x691   :  { %4996 = vmatprep.subr.bf16.mxu0 %v8524_v46  ;;  %5037 = vmatprep.subr.bf16.mxu1 %v8526_v4 }
 0x692   :  { %v7011_v52 = vpop.eup %7010 }
 0x693   :  { %v7013_v51 = vpop.eup %7012  ;;  %v4465_v59 = vmul.f32 %v7011_v52, %v7009_v27  ;;  %v8564_v52 = vld [vmem:[#allocation10 + $0x1c4] ss:$16 sps:$4 sm:$0xff]  }
 0x694   :  { %v4464_v30 = vmul.f32 %v7013_v51, %v8355_v50  ;;  %4997 = vmatpush1.bf16.msra.mxu0 %v8530_v28  ;;  %5038 = vmatpush1.bf16.msra.mxu1 %v8532_v8  ;;  %v8557_v50 = vld [vmem:[#allocation10 + $0x1a0] ss:$16 sps:$4 sm:$0xff]   ;;  %8865 = vst [vmem:[#allocation66_spill] sm:$0xff] %v8564_v52  ;;  %v8566_v51 = vld [vmem:[#allocation10 + $0x1cc] ss:$16 sps:$4 sm:$0xff]  }
 0x695   :  { %4998 = vmatprep.subr.bf16.mxu0 %v8536_v36  ;;  %5039 = vmatprep.subr.bf16.mxu1 %v8538_v47  ;;  %8863 = vst [vmem:[#allocation64_spill] sm:$0xff] %v8557_v50  ;;  %8866 = vst [vmem:[#allocation67_spill] sm:$0xff] %v8566_v51 }
 0x696   :  { %v8553_v27 = vadd.f32 %v4465_v59, %v4464_v30  ;;  %v8570_v59 = vld [vmem:[#allocation10 + $0x1c0] ss:$16 sps:$4 sm:$0xff]   ;;  %v8576_v30 = vld [vmem:[#allocation10 + $0x1e4] ss:$16 sps:$4 sm:$0xff]  }
 0x698   :  { %4999 = vmatpush1.bf16.msra.mxu0 %v8543_v33  ;;  %5040 = vmatpush1.bf16.msra.mxu1 %v8545_v58  ;;  %7016 = vtanh.f32 %v8553_v27 }
 0x699   :  { %5000 = vmatprep.subr.bf16.mxu0 %v8549_v23  ;;  %5041 = vmatprep.subr.bf16.mxu1 %v8551_v48  ;;  %v8578_v23 = vld [vmem:[#allocation10 + $0x1ec] ss:$16 sps:$4 sm:$0xff]   ;;  %v8582_v48 = vld [vmem:[#allocation10 + $0x1e0] ss:$16 sps:$4 sm:$0xff]  }
 0x69c   :  { %5001 = vmatpush1.bf16.msra.mxu0 %v8557_v50  ;;  %5042 = vmatpush1.bf16.msra.mxu1 %v8559_v7  ;;  %v8584_v50 = vld [vmem:[#allocation10 + $0x1e8] ss:$16 sps:$4 sm:$0xff]   ;;  %v7015_v7 = vpop.eup %7014 }
 0x69d   :  { %5002 = vmatprep.subr.bf16.mxu0 %v8564_v52  ;;  %5043 = vmatprep.subr.bf16.mxu1 %v8566_v51 }
 0x6a0   :  { %5003 = vmatpush1.bf16.msra.mxu0 %v8570_v59  ;;  %5044 = vmatpush1.bf16.msra.mxu1 %v8572_v60 }
 0x6a1   :  { %5004 = vmatprep.subr.bf16.mxu0 %v8576_v30  ;;  %5045 = vmatprep.subr.bf16.mxu1 %v8578_v23 }
 0x6a2   :  { %v7017_v52 = vpop.eup %7016 }
 0x6a3   :  { %v4468_v58 = vmul.f32 %v7017_v52, %v7015_v7  ;;  %v8872_v7 = vld [vmem:[#allocation45_spill] sm:$0xff] }
 0x6a4   :  { %5005 = vmatpush1.bf16.msra.mxu0 %v8582_v48  ;;  %5046 = vmatpush1.bf16.msra.mxu1 %v8584_v50 }
 0x6a5   :  { %v4471_v51 = vpack.c.bf16 %v4468_v58, %v4468_v58  ;;  %5306 = vmatprep.subr.bf16.mxu0 %v8377_v63  ;;  %5347 = vmatprep.subr.bf16.mxu1 %v8379_v49 }
 0x6a7   :  { %6260 = vst [vmem:[%s8705_s6 + $0x8] sm:$0xf] %v4471_v51  ;;  %5023 = vmatmul.mubr.bf16.vlgmr.msra.gmra.mrb[84].mxu0 %v4471_v51  ;;  %5064 = vmatmul.mubr.bf16.vlgmr.msra.gmra.mrb[84].mxu1 %v4471_v51 }
 0x6a8   :  { %5307 = vmatpush1.bf16.msra.mxu0 %v8381_v56  ;;  %5348 = vmatpush1.bf16.msra.mxu1 %v8383_v57  ;;  %v8867_v56 = vld [vmem:[#allocation32_spill] sm:$0xff] }
 0x6a9   :  { %5308 = vmatprep.subr.bf16.mxu0 %v8389_v37  ;;  %5349 = vmatprep.subr.bf16.mxu1 %v8391_v18  ;;  %v8868_v37 = vld [vmem:[#allocation33_spill] sm:$0xff] }
 0x6aa   :  { %5338 = vmatprep.mubr.bf16.mxu0 %v8737_v43  ;;  %5379 = vmatprep.mubr.bf16.mxu1 %v8737_v43 }
 0x6ac   :  { %5309 = vmatpush1.bf16.msra.mxu0 %v8393_v61  ;;  %5350 = vmatpush1.bf16.msra.mxu1 %v8395_v40 }
 0x6ad   :  { %5310 = vmatprep.subr.bf16.mxu0 %v8401_v42  ;;  %5351 = vmatprep.subr.bf16.mxu1 %v8403_v9  ;;  %v8869_v42 = vld [vmem:[#allocation34_spill] sm:$0xff] }
 0x6b0   :  { %5311 = vmatpush1.bf16.msra.mxu0 %v8405_v10  ;;  %5352 = vmatpush1.bf16.msra.mxu1 %v8407_v11  ;;  %v8870_v10 = vld [vmem:[#allocation35_spill] sm:$0xff] }
 0x6b1   :  { %5312 = vmatprep.subr.bf16.mxu0 %v8413_v0  ;;  %5353 = vmatprep.subr.bf16.mxu1 %v8415_v12 }
 0x6b4   :  { %5313 = vmatpush1.bf16.msra.mxu0 %v8417_v13  ;;  %5354 = vmatpush1.bf16.msra.mxu1 %v8419_v14 }
 0x6b5   :  { %5314 = vmatprep.subr.bf16.mxu0 %v8425_v15  ;;  %5355 = vmatprep.subr.bf16.mxu1 %v8427_v16 }
 0x6b8   :  { %5315 = vmatpush1.bf16.msra.mxu0 %v8429_v17  ;;  %5356 = vmatpush1.bf16.msra.mxu1 %v8431_v24 }
 0x6b9   :  { %5316 = vmatprep.subr.bf16.mxu0 %v8437_v54  ;;  %5357 = vmatprep.subr.bf16.mxu1 %v8439_v62 }
 0x6bc   :  { %5317 = vmatpush1.bf16.msra.mxu0 %v8441_v26  ;;  %5358 = vmatpush1.bf16.msra.mxu1 %v8443_v45 }
 0x6bd   :  { %5318 = vmatprep.subr.bf16.mxu0 %v8449_v53  ;;  %5359 = vmatprep.subr.bf16.mxu1 %v8451_v3 }
 0x6c0   :  { %5319 = vmatpush1.bf16.msra.mxu0 %v8453_v32  ;;  %5360 = vmatpush1.bf16.msra.mxu1 %v8455_v1 }
 0x6c1   :  { %5320 = vmatprep.subr.bf16.mxu0 %v8461_v5  ;;  %5361 = vmatprep.subr.bf16.mxu1 %v8463_v39 }
 0x6c4   :  { %5321 = vmatpush1.bf16.msra.mxu0 %v8465_v25  ;;  %5362 = vmatpush1.bf16.msra.mxu1 %v8467_v2 }
 0x6c5   :  { %5622 = vmatprep.subr.bf16.mxu0 %v8473_v44  ;;  %5663 = vmatprep.subr.bf16.mxu1 %v8475_v38  ;;  %v8871_v38 = vld [vmem:[#allocation44_spill] sm:$0xff] }
 0x75a   :  { %v4708_v63 = vpop.f32.mrb[80].mxu0  ;;  %v4749_v49 = vpop.f32.mrb[80].mxu1 }
 0x75b   :  { %v4756_v57 = vadd.f32 %v4708_v63, %v8867_v56  ;;  %v4758_v18 = vadd.f32 %v4749_v49, %v8868_v37  ;;  %v4710_v61 = vpop.f32.mrb[81].mxu0  ;;  %v4751_v40 = vpop.f32.mrb[81].mxu1  ;;  %v8873_v49 = vld [vmem:[#allocation46_spill] sm:$0xff] }
 0x75c   :  { %v4757_v9 = vadd.f32 %v4710_v61, %v8869_v42  ;;  %v4759_v11 = vadd.f32 %v4751_v40, %v8870_v10  ;;  %v4712_v0 = vpop.f32.mrb[82].mxu0  ;;  %v4753_v12 = vpop.f32.mrb[82].mxu1 }
 0x75d   :  { %v6293_v13 = vmul.f32 -1.442695, %v4756_v57  ;;  %v4713_v14 = vpop.f32.mrb[83].mxu0  ;;  %v4754_v15 = vpop.f32.mrb[83].mxu1  ;;  %v8874_v57 = vld [vmem:[#allocation47_spill] sm:$0xff] }
 0x75e   :  { %v6294_v16 = vmul.f32 -1.442695, %v4757_v9  ;;  %v6295_v17 = vmul.f32 -1.442695, %v4759_v11 }
 0x75f   :  { %7018 = vpow2.f32 %v6293_v13 }
 0x760   :  { %7020 = vpow2.f32 %v6294_v16 }
 0x761   :  { %7022 = vpow2.f32 %v6295_v17 }
 0x762   :  { %7024 = vtanh.f32 %v4758_v18 }
 0x769   :  { %v7019_v24 = vpop.eup %7018 }
 0x76a   :  { %v7021_v54 = vpop.eup %7020  ;;  %v4763_v62 = vadd.f32 1.0, %v7019_v24  ;;  %v8882_v24 = vld [vmem:[#allocation36_spill] sm:$0xff] }
 0x76b   :  { %v4769_v26 = vadd.f32 1.0, %v7021_v54  ;;  %v7023_v45 = vpop.eup %7022 }
 0x76c   :  { %7026 = vrcp.f32 %v4763_v62  ;;  %v7025_v53 = vpop.eup %7024  ;;  %v4776_v5 = vadd.f32 1.0, %v7023_v45  ;;  %v8884_v45 = vld [vmem:[#allocation38_spill] sm:$0xff] }
 0x76d   :  { %7028 = vrcp.f32 %v4769_v26 }
 0x76e   :  { %7030 = vrcp.f32 %v4776_v5 }
 0x776   :  { %v7027_v3 = vpop.eup %7026 }
 0x777   :  { %v7029_v32 = vpop.eup %7028  ;;  %v4781_v1 = vmul.f32 %v7027_v3, %v7025_v53 }
 0x778   :  { %v4780_v39 = vmul.f32 %v7029_v32, %v8484_v31  ;;  %v7031_v10 = vpop.eup %7030 }
 0x77a   :  { %v8634_v25 = vadd.f32 %v4781_v1, %v4780_v39  ;;  %v5024_v2 = vpop.f32.mrb[84].mxu0  ;;  %v5065_v44 = vpop.f32.mrb[84].mxu1 }
 0x77b   :  { %v5072_v58 = vadd.f32 %v5024_v2, %v8871_v38  ;;  %v5074_v52 = vadd.f32 %v5065_v44, %v8872_v7  ;;  %v5026_v51 = vpop.f32.mrb[85].mxu0  ;;  %v5067_v63 = vpop.f32.mrb[85].mxu1 }
 0x77c   :  { %v5073_v56 = vadd.f32 %v5026_v51, %v8873_v49  ;;  %v5075_v37 = vadd.f32 %v5067_v63, %v8874_v57  ;;  %v5028_v18 = vpop.f32.mrb[86].mxu0  ;;  %v5069_v61 = vpop.f32.mrb[86].mxu1  ;;  %7032 = vtanh.f32 %v8634_v25 }
 0x77d   :  { %v6329_v31 = vmul.f32 -1.442695, %v5072_v58  ;;  %v5029_v40 = vpop.f32.mrb[87].mxu0  ;;  %v5070_v42 = vpop.f32.mrb[87].mxu1 }
 0x77e   :  { %v6330_v9 = vmul.f32 -1.442695, %v5073_v56  ;;  %v6331_v0 = vmul.f32 -1.442695, %v5075_v37  ;;  %v8886_v42 = vld [vmem:[#allocation40_spill] sm:$0xff] }
 0x77f   :  { %7034 = vpow2.f32 %v6329_v31 }
 0x780   :  { %7036 = vpow2.f32 %v6330_v9 }
 0x781   :  { %7038 = vpow2.f32 %v6331_v0 }
 0x782   :  { %7040 = vtanh.f32 %v5074_v52 }
 0x786   :  { %v7033_v11 = vpop.eup %7032 }
 0x787   :  { %v4784_v12 = vmul.f32 %v7033_v11, %v7031_v10  ;;  %v8887_v10 = vld [vmem:[#allocation41_spill] sm:$0xff] }
 0x789   :  { %v7035_v13 = vpop.eup %7034  ;;  %v4787_v14 = vpack.c.bf16 %v4784_v12, %v4784_v12 }
 0x78a   :  { %v7037_v15 = vpop.eup %7036  ;;  %v5079_v16 = vadd.f32 1.0, %v7035_v13  ;;  %v8888_v13 = vld [vmem:[#allocation42_spill] sm:$0xff] }
 0x78b   :  { %v5085_v17 = vadd.f32 1.0, %v7037_v15  ;;  %6296 = vst [vmem:[%s8704_s5 + $0x18] sm:$0xf] %v4787_v14  ;;  %5339 = vmatmul.mubr.bf16.vlgmr.msra.gmra.mrb[88].mxu0 %v4787_v14  ;;  %5380 = vmatmul.mubr.bf16.vlgmr.msra.gmra.mrb[88].mxu1 %v4787_v14  ;;  %v8889_v15 = vld [vmem:[#allocation43_spill] sm:$0xff] }
 0x78c   :  { %7042 = vrcp.f32 %v5079_v16  ;;  %5623 = vmatpush1.bf16.msra.mxu0 %v8491_v21  ;;  %5664 = vmatpush1.bf16.msra.mxu1 %v8493_v41  ;;  %v7039_v21 = vpop.eup %7038 }
 0x78d   :  { %7044 = vrcp.f32 %v5085_v17  ;;  %5624 = vmatprep.subr.bf16.mxu0 %v8495_v29  ;;  %5665 = vmatprep.subr.bf16.mxu1 %v8497_v35  ;;  %v7041_v41 = vpop.eup %7040 }
 0x78e   :  { %5654 = vmatprep.mubr.bf16.mxu0 %v8737_v43  ;;  %5695 = vmatprep.mubr.bf16.mxu1 %v8737_v43 }
 0x790   :  { %5625 = vmatpush1.bf16.msra.mxu0 %v8504_v6  ;;  %5666 = vmatpush1.bf16.msra.mxu1 %v8506_v20  ;;  %v5092_v6 = vadd.f32 1.0, %v7039_v21 }
 0x791   :  { %5626 = vmatprep.subr.bf16.mxu0 %v8510_v19  ;;  %5667 = vmatprep.subr.bf16.mxu1 %v8512_v22  ;;  %v8875_v22 = vld [vmem:[#allocation63_spill] sm:$0xff] }
 0x792   :  { %7046 = vrcp.f32 %v5092_v6 }
 0x794   :  { %5627 = vmatpush1.bf16.msra.mxu0 %v8518_v34  ;;  %5668 = vmatpush1.bf16.msra.mxu1 %v8520_v55  ;;  %v8876_v34 = vld [vmem:[#allocation14_spill] sm:$0xff]  ;;  %v8877_v55 = vld [vmem:[#allocation15_spill] sm:$0xff] }
 0x795   :  { %5628 = vmatprep.subr.bf16.mxu0 %v8524_v46  ;;  %5669 = vmatprep.subr.bf16.mxu1 %v8526_v4  ;;  %v8878_v46 = vld [vmem:[#allocation64_spill] sm:$0xff]  ;;  %v8879_v4 = vld [vmem:[#allocation65_spill] sm:$0xff] }
 0x796   :  { %v7043_v29 = vpop.eup %7042 }
 0x797   :  { %v7045_v43 = vpop.eup %7044  ;;  %v5097_v35 = vmul.f32 %v7043_v29, %v7041_v41 }
 0x798   :  { %v5096_v20 = vmul.f32 %v7045_v43, %v8553_v27  ;;  %5629 = vmatpush1.bf16.msra.mxu0 %v8530_v28  ;;  %5670 = vmatpush1.bf16.msra.mxu1 %v8532_v8  ;;  %v8880_v28 = vld [vmem:[#allocation66_spill] sm:$0xff]  ;;  %v8881_v8 = vld [vmem:[#allocation67_spill] sm:$0xff] }
 0x799   :  { %5630 = vmatprep.subr.bf16.mxu0 %v8536_v36  ;;  %5671 = vmatprep.subr.bf16.mxu1 %v8538_v47 }
 0x79a   :  { %v8663_v19 = vadd.f32 %v5097_v35, %v5096_v20 }
 0x79c   :  { %5631 = vmatpush1.bf16.msra.mxu0 %v8543_v33  ;;  %5672 = vmatpush1.bf16.msra.mxu1 %v8875_v22  ;;  %7048 = vtanh.f32 %v8663_v19  ;;  %v7047_v36 = vpop.eup %7046 }
 0x79d   :  { %5632 = vmatprep.subr.bf16.mxu0 %v8876_v34  ;;  %5673 = vmatprep.subr.bf16.mxu1 %v8877_v55 }
 0x7a0   :  { %5633 = vmatpush1.bf16.msra.mxu0 %v8878_v46  ;;  %5674 = vmatpush1.bf16.msra.mxu1 %v8879_v4 }
 0x7a1   :  { %5634 = vmatprep.subr.bf16.mxu0 %v8880_v28  ;;  %5675 = vmatprep.subr.bf16.mxu1 %v8881_v8 }
 0x7a4   :  { %5635 = vmatpush1.bf16.msra.mxu0 %v8570_v59  ;;  %5676 = vmatpush1.bf16.msra.mxu1 %v8572_v60 }
 0x7a5   :  { %5636 = vmatprep.subr.bf16.mxu0 %v8576_v30  ;;  %5677 = vmatprep.subr.bf16.mxu1 %v8578_v23  ;;  %v8883_v30 = vld [vmem:[#allocation37_spill] sm:$0xff] }
 0x7a6   :  { %v7049_v47 = vpop.eup %7048 }
 0x7a7   :  { %v5100_v33 = vmul.f32 %v7049_v47, %v7047_v36 }
 0x7a8   :  { %5637 = vmatpush1.bf16.msra.mxu0 %v8582_v48  ;;  %5678 = vmatpush1.bf16.msra.mxu1 %v8584_v50  ;;  %v8885_v48 = vld [vmem:[#allocation39_spill] sm:$0xff] }
 0x7a9   :  { %v5103_v27 = vpack.c.bf16 %v5100_v33, %v5100_v33 }
 0x7ab   :  { %6332 = vst [vmem:[%s8705_s6 + $0x4] sm:$0xf] %v5103_v27  ;;  %5655 = vmatmul.mubr.bf16.vlgmr.msra.gmra.mrb[92].mxu0 %v5103_v27  ;;  %5696 = vmatmul.mubr.bf16.vlgmr.msra.gmra.mrb[92].mxu1 %v5103_v27 }
 0x85e   :  { %v5340_v59 = vpop.f32.mrb[88].mxu0  ;;  %v5381_v60 = vpop.f32.mrb[88].mxu1 }
 0x85f   :  { %v5388_v54 = vadd.f32 %v5340_v59, %v8882_v24  ;;  %v5390_v62 = vadd.f32 %v5381_v60, %v8883_v30  ;;  %v5342_v23 = vpop.f32.mrb[89].mxu0  ;;  %v5383_v26 = vpop.f32.mrb[89].mxu1 }
 0x860   :  { %v5389_v53 = vadd.f32 %v5342_v23, %v8884_v45  ;;  %v5391_v3 = vadd.f32 %v5383_v26, %v8885_v48  ;;  %v5344_v50 = vpop.f32.mrb[90].mxu0  ;;  %v5385_v32 = vpop.f32.mrb[90].mxu1 }
 0x861   :  { %v6365_v1 = vmul.f32 -1.442695, %v5388_v54  ;;  %v5345_v5 = vpop.f32.mrb[91].mxu0  ;;  %v5386_v39 = vpop.f32.mrb[91].mxu1 }
 0x862   :  { %v6366_v2 = vmul.f32 -1.442695, %v5389_v53  ;;  %v6367_v44 = vmul.f32 -1.442695, %v5391_v3 }
 0x863   :  { %7050 = vpow2.f32 %v6365_v1 }
 0x864   :  { %7052 = vpow2.f32 %v6366_v2 }
 0x865   :  { %7054 = vpow2.f32 %v6367_v44 }
 0x866   :  { %7056 = vtanh.f32 %v5390_v62 }
 0x86d   :  { %v7051_v38 = vpop.eup %7050 }
 0x86e   :  { %v7053_v58 = vpop.eup %7052  ;;  %v5395_v7 = vadd.f32 1.0, %v7051_v38 }
 0x86f   :  { %v5401_v52 = vadd.f32 1.0, %v7053_v58  ;;  %v7055_v51 = vpop.eup %7054 }
 0x870   :  { %7058 = vrcp.f32 %v5395_v7  ;;  %v7057_v63 = vpop.eup %7056  ;;  %v5408_v37 = vadd.f32 1.0, %v7055_v51 }
 0x871   :  { %7060 = vrcp.f32 %v5401_v52 }
 0x872   :  { %7062 = vrcp.f32 %v5408_v37 }
 0x87a   :  { %v7059_v49 = vpop.eup %7058 }
 0x87b   :  { %v7061_v56 = vpop.eup %7060  ;;  %v5413_v57 = vmul.f32 %v7059_v49, %v7057_v63 }
 0x87c   :  { %v5412_v18 = vmul.f32 %v7061_v56, %v8634_v25  ;;  %v7063_v35 = vpop.eup %7062 }
 0x87e   :  { %v5414_v61 = vadd.f32 %v5413_v57, %v5412_v18  ;;  %v5656_v31 = vpop.f32.mrb[92].mxu0  ;;  %v5697_v40 = vpop.f32.mrb[92].mxu1 }
 0x87f   :  { %v5704_v9 = vadd.f32 %v5656_v31, %v8886_v42  ;;  %v5706_v11 = vadd.f32 %v5697_v40, %v8887_v10  ;;  %v5658_v0 = vpop.f32.mrb[93].mxu0  ;;  %v5699_v12 = vpop.f32.mrb[93].mxu1 }
 0x880   :  { %7064 = vtanh.f32 %v5414_v61  ;;  %v5705_v14 = vadd.f32 %v5658_v0, %v8888_v13  ;;  %v5707_v16 = vadd.f32 %v5699_v12, %v8889_v15  ;;  %v5660_v17 = vpop.f32.mrb[94].mxu0  ;;  %v5701_v21 = vpop.f32.mrb[94].mxu1 }
 0x881   :  { %v6401_v41 = vmul.f32 -1.442695, %v5704_v9  ;;  %v5661_v29 = vpop.f32.mrb[95].mxu0  ;;  %v5702_v25 = vpop.f32.mrb[95].mxu1 }
 0x882   :  { %v6402_v43 = vmul.f32 -1.442695, %v5705_v14  ;;  %v6403_v20 = vmul.f32 -1.442695, %v5707_v16 }
 0x883   :  { %7066 = vpow2.f32 %v6401_v41 }
 0x884   :  { %7068 = vpow2.f32 %v6402_v43 }
 0x885   :  { %7070 = vpow2.f32 %v6403_v20 }
 0x886   :  { %7072 = vtanh.f32 %v5706_v11 }
 0x88a   :  { %v7065_v6 = vpop.eup %7064 }
 0x88b   :  { %v5416_v22 = vmul.f32 %v7065_v6, %v7063_v35 }
 0x88d   :  { %v7067_v34 = vpop.eup %7066  ;;  %v5419_v55 = vpack.c.bf16 %v5416_v22, %v5416_v22 }
 0x88e   :  { %v7069_v46 = vpop.eup %7068  ;;  %v5711_v4 = vadd.f32 1.0, %v7067_v34 }
 0x88f   :  { %6368 = vst [vmem:[%s8704_s5 + $0x1c] sm:$0xf] %v5419_v55  ;;  %v5717_v28 = vadd.f32 1.0, %v7069_v46  ;;  %v7071_v8 = vpop.eup %7070 }
 0x890   :  { %7074 = vrcp.f32 %v5711_v4  ;;  %v7073_v36 = vpop.eup %7072  ;;  %v5724_v59 = vadd.f32 1.0, %v7071_v8 }
 0x891   :  { %7076 = vrcp.f32 %v5717_v28 }
 0x892   :  { %7078 = vrcp.f32 %v5724_v59 }
 0x89a   :  { %v7075_v47 = vpop.eup %7074 }
 0x89b   :  { %v7077_v33 = vpop.eup %7076  ;;  %v5729_v27 = vmul.f32 %v7075_v47, %v7073_v36 }
 0x89c   :  { %v5728_v60 = vmul.f32 %v7077_v33, %v8663_v19  ;;  %v7079_v54 = vpop.eup %7078 }
 0x89e   :  { %v5730_v24 = vadd.f32 %v5729_v27, %v5728_v60 }
 0x8a0   :  { %7080 = vtanh.f32 %v5730_v24 }
 0x8aa   :  { %v7081_v30 = vpop.eup %7080 }
 0x8ab   :  { %v5732_v62 = vmul.f32 %v7081_v30, %v7079_v54 }
 0x8ad   :  { %v5735_v23 = vpack.c.bf16 %v5732_v62, %v5732_v62 }
 0x8af   :  { %5736 = vst [vmem:[%s8705_s6] sm:$0xf] %v5735_v23 }
 0x8b0   :  { %5759 = vsyncpa [#allocation9], 1 }
 0x8b1   :  { %5760 = vsyncpa [#allocation11], 1 }

</bundles_post_ra>
